<compile_context>
chip_gen: v7x
topology: tpu7x:2x2x1
jax: 0.10.0
libtpu: 0.0.40
codegen_flags: <defaults>
</compile_context>

<pallas_src>
import math
from functools import partial

import jax
import jax.numpy as jnp
from jax.experimental import pallas as pl
from jax.experimental.pallas import tpu as pltpu


def _round_up(x, m):
    return ((x + m - 1) // m) * m


_MAX_SINGLE_K = 2048  # contraction dims <= this run as one MXU K tile (no K padding).


# ----------------------------------------------------------------------------
# Pallas kernels: MXU matmul (bf16 in, f32 accumulate) + fused bias + activation
# ----------------------------------------------------------------------------
def _apply_act(y, act):
    if act == "elu":                                  # ELU(alpha=1.0)
        return jnp.where(y > 0, y, jnp.exp(jnp.minimum(y, 0.0)) - 1.0)
    if act == "sigmoid":
        return 1.0 / (1.0 + jnp.exp(-y))
    return y


def _make_single_k_kernel(act):
    # Whole K contraction in one pass: no scratch accumulator, no init/finalize phases.
    def kernel(a_ref, b_ref, bias_ref, o_ref):
        y = jnp.dot(a_ref[...], b_ref[...], preferred_element_type=jnp.float32)
        y = y + bias_ref[...]
        o_ref[...] = _apply_act(y, act).astype(o_ref.dtype)
    return kernel


def _make_multi_k_kernel(act):
    def kernel(a_ref, b_ref, bias_ref, o_ref, acc_ref):
        @pl.when(pl.program_id(2) == 0)
        def _():
            acc_ref[...] = jnp.zeros_like(acc_ref)

        acc_ref[...] += jnp.dot(a_ref[...], b_ref[...],
                                preferred_element_type=jnp.float32)

        @pl.when(pl.program_id(2) == pl.num_programs(2) - 1)
        def _():
            y = acc_ref[...] + bias_ref[...]
            o_ref[...] = _apply_act(y, act).astype(o_ref.dtype)
    return kernel


def matmul_bias_act(a, b, bias, act=None):
    """out = act(a @ b + bias).

    a: [M, K] f32, b: [K, N] f32, bias: [N] f32.
    MXU runs in bf16, accumulates in f32; bias + activation fused in the epilogue.
    """
    M, K = a.shape
    Kb, N = b.shape
    assert K == Kb

    # ---- M tiling -------------------------------------------------------------
    if M <= 512:
        Mp = _round_up(M, 16)
        tm = Mp                                       # single M block for small M
    elif M % 256 == 0:
        Mp, tm = M, 256
    elif M % 128 == 0:
        Mp, tm = M, 128
    else:
        Mp, tm = _round_up(M, 128), 128

    # ---- N tiling (lane-dense output) ------------------------------------------
    Np = _round_up(N, 128)
    tn = 256 if Np % 256 == 0 else 128

    a_bf = a.astype(jnp.bfloat16)
    b_bf = b.astype(jnp.bfloat16)
    bias_p = bias.astype(jnp.float32)
    if Np != N:
        b_bf = jnp.pad(b_bf, ((0, 0), (0, Np - N)))   # weights/bias: cheap to pad
        bias_p = jnp.pad(bias_p, (0, Np - N))
    bias_p = bias_p.reshape(1, Np)

    if K <= _MAX_SINGLE_K:
        # Whole-K tile: block dim equals the full array dim, so no 128 padding of K
        # is required and A is never rewritten in HBM (only M padding if needed).
        if Mp != M:
            a_bf = jnp.pad(a_bf, ((0, Mp - M), (0, 0)))
        out = pl.pallas_call(
            _make_single_k_kernel(act),
            out_shape=jax.ShapeDtypeStruct((Mp, Np), jnp.float32),
            grid=(Mp // tm, Np // tn),
            in_specs=[pl.BlockSpec((tm, K), lambda i, j: (i, 0)),
                      pl.BlockSpec((K, tn), lambda i, j: (0, j)),
                      pl.BlockSpec((1, tn), lambda i, j: (0, j))],
            out_specs=pl.BlockSpec((tm, tn), lambda i, j: (i, j)),
            compiler_params=pltpu.CompilerParams(
                dimension_semantics=("parallel", "parallel")),
        )(a_bf, b_bf, bias_p)
    else:
        # Fallback for very large channel counts: pad + tile K, accumulate in VMEM.
        Kp = _round_up(K, 128)
        tk = 128
        for cand in range(min(Kp, 1024), 127, -128):  # largest 128-mult divisor <= 1024
            if Kp % cand == 0:
                tk = cand
                break
        if (Mp, Kp) != (M, K):
            a_bf = jnp.pad(a_bf, ((0, Mp - M), (0, Kp - K)))
        if Kp != K:
            b_bf = jnp.pad(b_bf, ((0, Kp - K), (0, 0)))
        out = pl.pallas_call(
            _make_multi_k_kernel(act),
            out_shape=jax.ShapeDtypeStruct((Mp, Np), jnp.float32),
            grid=(Mp // tm, Np // tn, Kp // tk),
            in_specs=[pl.BlockSpec((tm, tk), lambda i, j, k: (i, k)),
                      pl.BlockSpec((tk, tn), lambda i, j, k: (k, j)),
                      pl.BlockSpec((1, tn), lambda i, j, k: (0, j))],
            out_specs=pl.BlockSpec((tm, tn), lambda i, j, k: (i, j)),
            scratch_shapes=[pltpu.VMEM((tm, tn), jnp.float32)],
            compiler_params=pltpu.CompilerParams(
                dimension_semantics=("parallel", "parallel", "arbitrary")),
        )(a_bf, b_bf, bias_p)

    if (Mp, Np) != (M, N):
        out = out[:M, :N]
    return out


# ----------------------------------------------------------------------------
# ConvNormAct pieces (NHWC inside)
# ----------------------------------------------------------------------------
def conv3x3_dilated(x, w, b, dilation, act):
    """ReflectionPad2d(d) + Conv2d(k=3, dilation=d, stride=1, bias) + act.

    x: (N, H, W, Cin); w: (3, 3, Cin, Cout) HWIO (permute OIHW PyTorch weights first).
    """
    N, H, W, Cin = x.shape
    Cout = w.shape[-1]
    d = dilation
    xp = jnp.pad(x, ((0, 0), (d, d), (d, d), (0, 0)), mode="reflect")
    patches = [xp[:, kh * d:kh * d + H, kw * d:kw * d + W, :]
               for kh in range(3) for kw in range(3)]
    a = jnp.concatenate(patches, axis=-1).reshape(N * H * W, 9 * Cin)
    y = matmul_bias_act(a, w.reshape(9 * Cin, Cout), b, act=act)
    return y.reshape(N, H, W, Cout)


def _conv_layer_3x3(h, layer, d, gatedconv):
    if gatedconv:
        wc, bc, wg, bg = layer
        return (conv3x3_dilated(h, wc, bc, d, act="elu")
                * conv3x3_dilated(h, wg, bg, d, act="sigmoid"))
    w, b = layer
    return conv3x3_dilated(h, w, b, d, act="elu")


# ----------------------------------------------------------------------------
# DilationBlock forward (PyTorch NCHW at the boundary)
# ----------------------------------------------------------------------------
def dilation_block_forward(params, x_nchw, dilations, gatedconv=False):
    x = jnp.transpose(x_nchw, (0, 2, 3, 1)).astype(jnp.float32)    # -> NHWC
    h = x
    for layer, d in zip(params["conv"], dilations):
        h = _conv_layer_3x3(h, layer, d, gatedconv)

    # out: 1x1 conv (+ELU) on cat([x, conv], channel).
    N, H, W, _ = x.shape
    cat_c = x.shape[-1] + h.shape[-1]
    a = jnp.concatenate([x, h], axis=-1).reshape(N * H * W, cat_c)

    if gatedconv:
        wc, bc, wg, bg = params["out"]
        y = (matmul_bias_act(a, wc, bc, act="elu")
             * matmul_bias_act(a, wg, bg, act="sigmoid"))
    else:
        w, b = params["out"]
        y = matmul_bias_act(a, w, b, act="elu")
    y = y.reshape(N, H, W, -1)
    return jnp.transpose(y, (0, 3, 1, 2))                          # back to NCHW


# ----------------------------------------------------------------------------
# Parameter init (deterministic, PyTorch-Conv2d-style uniform bounds)
# ----------------------------------------------------------------------------
def init_params(key, in_channels, out_channels, mid_channels, dilations,
                gatedconv=False):
    i_channels = [in_channels] + [mid_channels] * (len(dilations) - 1)
    o_channels = [mid_channels] * len(dilations)

    def conv_init(k, shape, fan_in):
        bound = 1.0 / math.sqrt(fan_in)
        kw, kb = jax.random.split(k)
        w = jax.random.uniform(kw, shape, jnp.float32, -bound, bound)
        b = jax.random.uniform(kb, shape[-1:], jnp.float32, -bound, bound)
        return w, b

    per_layer = 2 if gatedconv else 1
    keys = jax.random.split(key, per_layer * (len(dilations) + 1))
    ki = iter(keys)

    conv_layers = []
    for cin, cout in zip(i_channels, o_channels):
        w, b = conv_init(next(ki), (3, 3, cin, cout), cin * 9)
        if gatedconv:
            wg, bg = conv_init(next(ki), (3, 3, cin, cout), cin * 9)
            conv_layers.append((w, b, wg, bg))
        else:
            conv_layers.append((w, b))

    cat_c = in_channels + mid_channels
    w, b = conv_init(next(ki), (cat_c, out_channels), cat_c)
    if gatedconv:
        wg, bg = conv_init(next(ki), (cat_c, out_channels), cat_c)
        out_layer = (w, b, wg, bg)
    else:
        out_layer = (w, b)

    return {"conv": conv_layers, "out": out_layer}


if __name__ == "__main__":
    key = jax.random.PRNGKey(0)
    pkey, xkey = jax.random.split(key)

    in_c, out_c, mid_c = 4, 32, 32
    dilations = (1, 2, 4)
    params = init_params(pkey, in_c, out_c, mid_c, dilations, gatedconv=False)
    x = jax.random.normal(xkey, (2, in_c, 16, 16), jnp.float32)    # NCHW like PyTorch

    fwd = jax.jit(partial(dilation_block_forward,
                          dilations=dilations, gatedconv=False))
    y = fwd(params, x)
    jax.block_until_ready(y)
    assert y.shape == (2, out_c, 16, 16), y.shape
    assert bool(jnp.all(jnp.isfinite(y)))
    print("KERNEL_OK")
</pallas_src>

<mosaic_0001>
module attributes {stable_mosaic.version = 11 : i64} {
  func.func @kernel(%arg0: i32, %arg1: i32, %arg2: memref<512x36xbf16, #tpu.memory_space<vmem>>, %arg3: memref<36x128xbf16, #tpu.memory_space<vmem>>, %arg4: memref<1x128xf32, #tpu.memory_space<vmem>>, %arg5: memref<512x128xf32, #tpu.memory_space<vmem>>) attributes {dimension_semantics = [#tpu.dimension_semantics<parallel>, #tpu.dimension_semantics<parallel>], iteration_bounds = array<i64: 1, 1>, scalar_prefetch = 0 : i64, scratch_operands = 0 : i64, tpu.core_type = #tpu.core_type<tc>, window_params = [{transform_indices = @transform_0, window_bounds = array<i64: 512, 36>}, {transform_indices = @transform_1, window_bounds = array<i64: 36, 128>}, {transform_indices = @transform_2, window_bounds = array<i64: 1, 128>}, {transform_indices = @transform_3, window_bounds = array<i64: 512, 128>}]} {
    %c0 = arith.constant 0 : index
    %c0_0 = arith.constant 0 : index
    %0 = vector.load %arg2[%c0, %c0_0] : memref<512x36xbf16, #tpu.memory_space<vmem>>, vector<512x36xbf16>
    %c0_1 = arith.constant 0 : index
    %c0_2 = arith.constant 0 : index
    %1 = vector.load %arg3[%c0_1, %c0_2] : memref<36x128xbf16, #tpu.memory_space<vmem>>, vector<36x128xbf16>
    %cst = arith.constant dense<0.000000e+00> : vector<512x128xf32>
    %2 = tpu.matmul %0, %1, %cst {dimension_numbers = #tpu.dot_dimension_numbers<[1], [0], [0], [1], [0, 0, 1, 1], [], []>} : vector<512x36xbf16>, vector<36x128xbf16>, vector<512x128xf32> -> vector<512x128xf32>
    %c0_3 = arith.constant 0 : index
    %c0_4 = arith.constant 0 : index
    %3 = vector.load %arg4[%c0_3, %c0_4] : memref<1x128xf32, #tpu.memory_space<vmem>>, vector<1x128xf32>
    %4 = vector.broadcast %3 : vector<1x128xf32> to vector<512x128xf32>
    %5 = arith.addf %2, %4 : vector<512x128xf32>
    %cst_5 = arith.constant 0.000000e+00 : f32
    %6 = vector.broadcast %cst_5 : f32 to vector<512x128xf32>
    %7 = arith.cmpf ogt, %5, %6 : vector<512x128xf32>
    %cst_6 = arith.constant 0.000000e+00 : f32
    %8 = vector.broadcast %cst_6 : f32 to vector<512x128xf32>
    %9 = arith.minimumf %5, %8 : vector<512x128xf32>
    %10 = math.exp %9 : vector<512x128xf32>
    %cst_7 = arith.constant 1.000000e+00 : f32
    %11 = vector.broadcast %cst_7 : f32 to vector<512x128xf32>
    %12 = arith.subf %10, %11 : vector<512x128xf32>
    %13 = arith.select %7, %5, %12 : vector<512x128xi1>, vector<512x128xf32>
    %c0_8 = arith.constant 0 : index
    %c0_9 = arith.constant 0 : index
    %14 = vector.load %arg5[%c0_8, %c0_9] : memref<512x128xf32, #tpu.memory_space<vmem>>, vector<512x128xf32>
    tpu.vector_store %arg5[%c0_8, %c0_9], %13 {strides = array<i32>} : memref<512x128xf32, #tpu.memory_space<vmem>>, vector<512x128xf32>,
    return
  }
  func.func @transform_0(%arg0: i32, %arg1: i32) -> (i32, i32) {
    %c0_i32 = arith.constant 0 : i32
    %c0_i32_0 = arith.constant 0 : i32
    return %arg0, %c0_i32 : i32, i32
  }
  func.func @transform_1(%arg0: i32, %arg1: i32) -> (i32, i32) {
    %c0_i32 = arith.constant 0 : i32
    %c0_i32_0 = arith.constant 0 : i32
    return %c0_i32, %arg1 : i32, i32
  }
  func.func @transform_2(%arg0: i32, %arg1: i32) -> (i32, i32) {
    %c0_i32 = arith.constant 0 : i32
    %c0_i32_0 = arith.constant 0 : i32
    return %c0_i32, %arg1 : i32, i32
  }
  func.func @transform_3(%arg0: i32, %arg1: i32) -> (i32, i32) {
    %c0_i32 = arith.constant 0 : i32
    return %arg0, %arg1 : i32, i32
  }
}

module attributes {stable_mosaic.version = 11 : i64} {
  func.func @kernel(%arg0: i32, %arg1: i32, %arg2: memref<512x288xbf16, #tpu.memory_space<vmem>>, %arg3: memref<288x128xbf16, #tpu.memory_space<vmem>>, %arg4: memref<1x128xf32, #tpu.memory_space<vmem>>, %arg5: memref<512x128xf32, #tpu.memory_space<vmem>>) attributes {dimension_semantics = [#tpu.dimension_semantics<parallel>, #tpu.dimension_semantics<parallel>], iteration_bounds = array<i64: 1, 1>, scalar_prefetch = 0 : i64, scratch_operands = 0 : i64, tpu.core_type = #tpu.core_type<tc>, window_params = [{transform_indices = @transform_0, window_bounds = array<i64: 512, 288>}, {transform_indices = @transform_1, window_bounds = array<i64: 288, 128>}, {transform_indices = @transform_2, window_bounds = array<i64: 1, 128>}, {transform_indices = @transform_3, window_bounds = array<i64: 512, 128>}]} {
    %c0 = arith.constant 0 : index
    %c0_0 = arith.constant 0 : index
    %0 = vector.load %arg2[%c0, %c0_0] : memref<512x288xbf16, #tpu.memory_space<vmem>>, vector<512x288xbf16>
    %c0_1 = arith.constant 0 : index
    %c0_2 = arith.constant 0 : index
    %1 = vector.load %arg3[%c0_1, %c0_2] : memref<288x128xbf16, #tpu.memory_space<vmem>>, vector<288x128xbf16>
    %cst = arith.constant dense<0.000000e+00> : vector<512x128xf32>
    %2 = tpu.matmul %0, %1, %cst {dimension_numbers = #tpu.dot_dimension_numbers<[1], [0], [0], [1], [0, 0, 1, 1], [], []>} : vector<512x288xbf16>, vector<288x128xbf16>, vector<512x128xf32> -> vector<512x128xf32>
    %c0_3 = arith.constant 0 : index
    %c0_4 = arith.constant 0 : index
    %3 = vector.load %arg4[%c0_3, %c0_4] : memref<1x128xf32, #tpu.memory_space<vmem>>, vector<1x128xf32>
    %4 = vector.broadcast %3 : vector<1x128xf32> to vector<512x128xf32>
    %5 = arith.addf %2, %4 : vector<512x128xf32>
    %cst_5 = arith.constant 0.000000e+00 : f32
    %6 = vector.broadcast %cst_5 : f32 to vector<512x128xf32>
    %7 = arith.cmpf ogt, %5, %6 : vector<512x128xf32>
    %cst_6 = arith.constant 0.000000e+00 : f32
    %8 = vector.broadcast %cst_6 : f32 to vector<512x128xf32>
    %9 = arith.minimumf %5, %8 : vector<512x128xf32>
    %10 = math.exp %9 : vector<512x128xf32>
    %cst_7 = arith.constant 1.000000e+00 : f32
    %11 = vector.broadcast %cst_7 : f32 to vector<512x128xf32>
    %12 = arith.subf %10, %11 : vector<512x128xf32>
    %13 = arith.select %7, %5, %12 : vector<512x128xi1>, vector<512x128xf32>
    %c0_8 = arith.constant 0 : index
    %c0_9 = arith.constant 0 : index
    %14 = vector.load %arg5[%c0_8, %c0_9] : memref<512x128xf32, #tpu.memory_space<vmem>>, vector<512x128xf32>
    tpu.vector_store %arg5[%c0_8, %c0_9], %13 {strides = array<i32>} : memref<512x128xf32, #tpu.memory_space<vmem>>, vector<512x128xf32>,
    return
  }
  func.func @transform_0(%arg0: i32, %arg1: i32) -> (i32, i32) {
    %c0_i32 = arith.constant 0 : i32
    %c0_i32_0 = arith.constant 0 : i32
    return %arg0, %c0_i32 : i32, i32
  }
  func.func @transform_1(%arg0: i32, %arg1: i32) -> (i32, i32) {
    %c0_i32 = arith.constant 0 : i32
    %c0_i32_0 = arith.constant 0 : i32
    return %c0_i32, %arg1 : i32, i32
  }
  func.func @transform_2(%arg0: i32, %arg1: i32) -> (i32, i32) {
    %c0_i32 = arith.constant 0 : i32
    %c0_i32_0 = arith.constant 0 : i32
    return %c0_i32, %arg1 : i32, i32
  }
  func.func @transform_3(%arg0: i32, %arg1: i32) -> (i32, i32) {
    %c0_i32 = arith.constant 0 : i32
    return %arg0, %arg1 : i32, i32
  }
}

module attributes {stable_mosaic.version = 11 : i64} {
  func.func @kernel(%arg0: i32, %arg1: i32, %arg2: memref<512x36xbf16, #tpu.memory_space<vmem>>, %arg3: memref<36x128xbf16, #tpu.memory_space<vmem>>, %arg4: memref<1x128xf32, #tpu.memory_space<vmem>>, %arg5: memref<512x128xf32, #tpu.memory_space<vmem>>) attributes {dimension_semantics = [#tpu.dimension_semantics<parallel>, #tpu.dimension_semantics<parallel>], iteration_bounds = array<i64: 1, 1>, scalar_prefetch = 0 : i64, scratch_operands = 0 : i64, tpu.core_type = #tpu.core_type<tc>, window_params = [{transform_indices = @transform_0, window_bounds = array<i64: 512, 36>}, {transform_indices = @transform_1, window_bounds = array<i64: 36, 128>}, {transform_indices = @transform_2, window_bounds = array<i64: 1, 128>}, {transform_indices = @transform_3, window_bounds = array<i64: 512, 128>}]} {
    %c0 = arith.constant 0 : index
    %c0_0 = arith.constant 0 : index
    %0 = vector.load %arg2[%c0, %c0_0] : memref<512x36xbf16, #tpu.memory_space<vmem>>, vector<512x36xbf16>
    %c0_1 = arith.constant 0 : index
    %c0_2 = arith.constant 0 : index
    %1 = vector.load %arg3[%c0_1, %c0_2] : memref<36x128xbf16, #tpu.memory_space<vmem>>, vector<36x128xbf16>
    %cst = arith.constant dense<0.000000e+00> : vector<512x128xf32>
    %2 = tpu.matmul %0, %1, %cst {dimension_numbers = #tpu.dot_dimension_numbers<[1], [0], [0], [1], [0, 0, 1, 1], [], []>} : vector<512x36xbf16>, vector<36x128xbf16>, vector<512x128xf32> -> vector<512x128xf32>
    %c0_3 = arith.constant 0 : index
    %c0_4 = arith.constant 0 : index
    %3 = vector.load %arg4[%c0_3, %c0_4] : memref<1x128xf32, #tpu.memory_space<vmem>>, vector<1x128xf32>
    %4 = vector.broadcast %3 : vector<1x128xf32> to vector<512x128xf32>
    %5 = arith.addf %2, %4 : vector<512x128xf32>
    %cst_5 = arith.constant 0.000000e+00 : f32
    %6 = vector.broadcast %cst_5 : f32 to vector<512x128xf32>
    %7 = arith.cmpf ogt, %5, %6 : vector<512x128xf32>
    %cst_6 = arith.constant 0.000000e+00 : f32
    %8 = vector.broadcast %cst_6 : f32 to vector<512x128xf32>
    %9 = arith.minimumf %5, %8 : vector<512x128xf32>
    %10 = math.exp %9 : vector<512x128xf32>
    %cst_7 = arith.constant 1.000000e+00 : f32
    %11 = vector.broadcast %cst_7 : f32 to vector<512x128xf32>
    %12 = arith.subf %10, %11 : vector<512x128xf32>
    %13 = arith.select %7, %5, %12 : vector<512x128xi1>, vector<512x128xf32>
    %c0_8 = arith.constant 0 : index
    %c0_9 = arith.constant 0 : index
    %14 = vector.load %arg5[%c0_8, %c0_9] : memref<512x128xf32, #tpu.memory_space<vmem>>, vector<512x128xf32>
    tpu.vector_store %arg5[%c0_8, %c0_9], %13 {strides = array<i32>} : memref<512x128xf32, #tpu.memory_space<vmem>>, vector<512x128xf32>,
    return
  }
  func.func @transform_0(%arg0: i32, %arg1: i32) -> (i32, i32) {
    %c0_i32 = arith.constant 0 : i32
    %c0_i32_0 = arith.constant 0 : i32
    return %arg0, %c0_i32 : i32, i32
  }
  func.func @transform_1(%arg0: i32, %arg1: i32) -> (i32, i32) {
    %c0_i32 = arith.constant 0 : i32
    %c0_i32_0 = arith.constant 0 : i32
    return %c0_i32, %arg1 : i32, i32
  }
  func.func @transform_2(%arg0: i32, %arg1: i32) -> (i32, i32) {
    %c0_i32 = arith.constant 0 : i32
    %c0_i32_0 = arith.constant 0 : i32
    return %c0_i32, %arg1 : i32, i32
  }
  func.func @transform_3(%arg0: i32, %arg1: i32) -> (i32, i32) {
    %c0_i32 = arith.constant 0 : i32
    return %arg0, %arg1 : i32, i32
  }
}

</mosaic_0001>

<bundles_post_ra>
// kernel: dilation_block_forward.4
= control target key start
LH: loop header
LB: loop body
LE: loop exit
PB: predicated region body
PF: predicated region fallthrough
CT: control target
= control target key end

     0   :  { %vm266_vm0 = vcmask 293888   ;;  %vm363_vm1 = vcmask 1041408   ;;  %s2433_s1 = inlined_call_operand.vmem [shape: bf16[36,128], index: 1, kind: input, shape index: {}]   ;;  %s2434_s0 = inlined_call_operand.vmem [shape: bf16[512,36], index: 0, kind: input, shape index: {}]   ;;  %s2435_s2 = inlined_call_operand.vmem [shape: f32[1,128], index: 2, kind: input, shape index: {}]   ;;  %s2436_s3 = inlined_call_operand.vmem [shape: f32[512,128], index: 3, kind: output, shape index: {}]  }
   0x1   :  { %v1353_v0 = vld [vmem:[%s2433_s1] sm:$0xff]   ;;  %v1354_v1 = vld [vmem:[%s2433_s1 + $0x8] sm:$0xff]   ;;  %v1355_v2 = vld [vmem:[%s2433_s1 + $0x10] ss:$0 sps:$4 sm:$0x33]  }
   0x2   :  { %1275 = vmatprep.subr.bf16.mxu0 %v1353_v0  ;;  %1345 = vmatprep.subr.bf16.mxu1 %v1353_v0  ;;  %v1356_v3 = vld [vmem:[%s2434_s0] sm:$0xff]   ;;  %v365_v5 = vsel %vm363_vm1, %v1355_v2, 0  ;;  %v1358_v6 = vld [vmem:[%s2434_s0 + $0x8] sm:$0xff]   ;;  %v1360_v8 = vld [vmem:[%s2434_s0 + $0x10] sm:$0xff]  }
   0x3   :  { %1276 = vmatpush3.bf16.msra.mxu0 %v1353_v0  ;;  %1348 = vmatpush3.bf16.msra.mxu1 %v1353_v0  ;;  %v1357_v4 = vld [vmem:[%s2434_s0 + $0x80] sm:$0xff]   ;;  %v1359_v7 = vld [vmem:[%s2434_s0 + $0x88] sm:$0xff]   ;;  %v1361_v9 = vld [vmem:[%s2434_s0 + $0x90] sm:$0xff]  }
   0x4   :  { %1277 = vmatprep.subr.bf16.mxu0 %v1354_v1  ;;  %1346 = vmatprep.subr.bf16.mxu1 %v1354_v1  ;;  %v1362_v10 = vld [vmem:[%s2434_s0 + $0x18] sm:$0xff]   ;;  %v1364_v12 = vld [vmem:[%s2434_s0 + $0x20] sm:$0xff]   ;;  %v1366_v14 = vld [vmem:[%s2434_s0 + $0x28] sm:$0xff]  }
   0x5   :  { %1281 = vmatprep.mubr.msk.bf16.mxu0 %vm266_vm0, %v1356_v3  ;;  %1313 = vmatprep.mubr.msk.bf16.mxu1 %vm266_vm0, %v1357_v4  ;;  %v1363_v11 = vld [vmem:[%s2434_s0 + $0x98] sm:$0xff]   ;;  %v1365_v13 = vld [vmem:[%s2434_s0 + $0xa0] sm:$0xff]   ;;  %v1367_v15 = vld [vmem:[%s2434_s0 + $0xa8] sm:$0xff]  }
   0x6   :  { %v1368_v16 = vld [vmem:[%s2434_s0 + $0x30] sm:$0xff]   ;;  %v1370_v18 = vld [vmem:[%s2434_s0 + $0x38] sm:$0xff]   ;;  %v1372_v20 = vld [vmem:[%s2434_s0 + $0x40] sm:$0xff]  }
   0x7   :  { %1278 = vmatpush3.bf16.msra.mxu0 %v1354_v1  ;;  %1349 = vmatpush3.bf16.msra.mxu1 %v1354_v1  ;;  %v1369_v17 = vld [vmem:[%s2434_s0 + $0xb0] sm:$0xff]   ;;  %v1371_v19 = vld [vmem:[%s2434_s0 + $0xb8] sm:$0xff]   ;;  %v1373_v21 = vld [vmem:[%s2434_s0 + $0xc0] sm:$0xff]  }
   0x8   :  { %1351 = vmatprep.subr.msk.bf16.mxu0 %vm363_vm1, %v1355_v2  ;;  %1352 = vmatprep.subr.msk.bf16.mxu1 %vm363_vm1, %v1355_v2  ;;  %v1374_v22 = vld [vmem:[%s2434_s0 + $0x48] sm:$0xff]   ;;  %v1376_v24 = vld [vmem:[%s2434_s0 + $0x50] sm:$0xff]   ;;  %v1378_v26 = vld [vmem:[%s2434_s0 + $0x58] sm:$0xff]  }
   0x9   :  { %v1375_v23 = vld [vmem:[%s2434_s0 + $0xc8] sm:$0xff]   ;;  %v1377_v25 = vld [vmem:[%s2434_s0 + $0xd0] sm:$0xff]   ;;  %v1379_v27 = vld [vmem:[%s2434_s0 + $0xd8] sm:$0xff]  }
   0xa   :  { %v1380_v28 = vld [vmem:[%s2434_s0 + $0x60] sm:$0xff]   ;;  %v1382_v30 = vld [vmem:[%s2434_s0 + $0x68] sm:$0xff]   ;;  %v1384_v32 = vld [vmem:[%s2434_s0 + $0x70] sm:$0xff]  }
   0xb   :  { %1280 = vmatpush3.bf16.msra.mxu0 %v365_v5  ;;  %1350 = vmatpush3.bf16.msra.mxu1 %v365_v5  ;;  %v1381_v29 = vld [vmem:[%s2434_s0 + $0xe0] sm:$0xff]   ;;  %v1383_v31 = vld [vmem:[%s2434_s0 + $0xe8] sm:$0xff]   ;;  %v1385_v33 = vld [vmem:[%s2434_s0 + $0xf0] sm:$0xff]  }
   0xc   :  { %v1386_v34 = vld [vmem:[%s2434_s0 + $0x78] sm:$0xff]   ;;  %v1677_v36 = vld [vmem:[%s2435_s2] ss:$0 sm:$0xff] }
   0xd   :  { %v1387_v35 = vld [vmem:[%s2434_s0 + $0xf8] sm:$0xff]  }
   0xe   :  { %1282 = vmatmul.mubr.msk.bf16.vlgmr.msra.gmra.mrb[0].mxu0 %vm266_vm0, %v1358_v6  ;;  %1314 = vmatmul.mubr.msk.bf16.vlgmr.msra.gmra.mrb[0].mxu1 %vm266_vm0, %v1359_v7 }
   0xf   :  { %1285 = vmatprep.mubr.msk.bf16.mxu0 %vm266_vm0, %v1360_v8  ;;  %1317 = vmatprep.mubr.msk.bf16.mxu1 %vm266_vm0, %v1361_v9 }
  0x16   :  { %1286 = vmatmul.mubr.msk.bf16.gmra.mrb[4].mxu0 %vm266_vm0, %v1362_v10  ;;  %1318 = vmatmul.mubr.msk.bf16.gmra.mrb[4].mxu1 %vm266_vm0, %v1363_v11 }
  0x17   :  { %1289 = vmatprep.mubr.msk.bf16.mxu0 %vm266_vm0, %v1364_v12  ;;  %1321 = vmatprep.mubr.msk.bf16.mxu1 %vm266_vm0, %v1365_v13 }
  0x1e   :  { %1290 = vmatmul.mubr.msk.bf16.gmra.mrb[8].mxu0 %vm266_vm0, %v1366_v14  ;;  %1322 = vmatmul.mubr.msk.bf16.gmra.mrb[8].mxu1 %vm266_vm0, %v1367_v15 }
  0x1f   :  { %1293 = vmatprep.mubr.msk.bf16.mxu0 %vm266_vm0, %v1368_v16  ;;  %1325 = vmatprep.mubr.msk.bf16.mxu1 %vm266_vm0, %v1369_v17 }
  0x26   :  { %1294 = vmatmul.mubr.msk.bf16.gmra.mrb[12].mxu0 %vm266_vm0, %v1370_v18  ;;  %1326 = vmatmul.mubr.msk.bf16.gmra.mrb[12].mxu1 %vm266_vm0, %v1371_v19 }
  0x27   :  { %1297 = vmatprep.mubr.msk.bf16.mxu0 %vm266_vm0, %v1372_v20  ;;  %1329 = vmatprep.mubr.msk.bf16.mxu1 %vm266_vm0, %v1373_v21 }
  0x2e   :  { %1298 = vmatmul.mubr.msk.bf16.gmra.mrb[16].mxu0 %vm266_vm0, %v1374_v22  ;;  %1330 = vmatmul.mubr.msk.bf16.gmra.mrb[16].mxu1 %vm266_vm0, %v1375_v23 }
  0x2f   :  { %1301 = vmatprep.mubr.msk.bf16.mxu0 %vm266_vm0, %v1376_v24  ;;  %1333 = vmatprep.mubr.msk.bf16.mxu1 %vm266_vm0, %v1377_v25 }
  0x36   :  { %1302 = vmatmul.mubr.msk.bf16.gmra.mrb[20].mxu0 %vm266_vm0, %v1378_v26  ;;  %1334 = vmatmul.mubr.msk.bf16.gmra.mrb[20].mxu1 %vm266_vm0, %v1379_v27 }
  0x37   :  { %1305 = vmatprep.mubr.msk.bf16.mxu0 %vm266_vm0, %v1380_v28  ;;  %1337 = vmatprep.mubr.msk.bf16.mxu1 %vm266_vm0, %v1381_v29 }
  0x3e   :  { %1306 = vmatmul.mubr.msk.bf16.gmra.mrb[24].mxu0 %vm266_vm0, %v1382_v30  ;;  %1338 = vmatmul.mubr.msk.bf16.gmra.mrb[24].mxu1 %vm266_vm0, %v1383_v31 }
  0x3f   :  { %1309 = vmatprep.mubr.msk.bf16.mxu0 %vm266_vm0, %v1384_v32  ;;  %1341 = vmatprep.mubr.msk.bf16.mxu1 %vm266_vm0, %v1385_v33 }
  0x46   :  { %1310 = vmatmul.mubr.msk.bf16.gmra.mrb[28].mxu0 %vm266_vm0, %v1386_v34  ;;  %1342 = vmatmul.mubr.msk.bf16.gmra.mrb[28].mxu1 %vm266_vm0, %v1387_v35 }
  0xe1   :  { %v1283_v37 = vpop.f32.mrb[0].mxu0  ;;  %v1315_v38 = vpop.f32.mrb[0].mxu1 }
  0xe2   :  { %v1680_v39 = vadd.f32 %v1283_v37, %v1677_v36  ;;  %v1683_v40 = vadd.f32 %v1315_v38, %v1677_v36  ;;  %v401_v41 = vpop.f32.mrb[1].mxu0  ;;  %v529_v42 = vpop.f32.mrb[1].mxu1 }
  0xe3   :  { %v1686_v43 = vadd.f32 %v1677_v36, %v401_v41  ;;  %v1689_v44 = vadd.f32 %v1677_v36, %v529_v42  ;;  %v1284_v45 = vpop.f32.mrb[2].mxu0  ;;  %v1316_v46 = vpop.f32.mrb[2].mxu1 }
  0xe4   :  { %v722_v47 = vmin.f32 %v1680_v39, 0.0  ;;  %v754_v48 = vmin.f32 %v1683_v40, 0.0  ;;  %v404_v49 = vpop.f32.mrb[3].mxu0  ;;  %v532_v50 = vpop.f32.mrb[3].mxu1  ;;  %v1696_v55 = vadd.f32 %v1284_v45, %v1677_v36  ;;  %v1699_v56 = vadd.f32 %v1316_v46, %v1677_v36 }
  0xe5   :  { %v720_v51 = vmin.f32 %v1686_v43, 0.0  ;;  %v752_v52 = vmin.f32 %v1689_v44, 0.0  ;;  %v1702_v59 = vadd.f32 %v1677_v36, %v404_v49  ;;  %v1705_v60 = vadd.f32 %v1677_v36, %v532_v50 }
  0xe6   :  { %v788_v53 = vmul.f32 1.442695, %v722_v47  ;;  %v852_v54 = vmul.f32 1.442695, %v754_v48  ;;  %v723_v61 = vmin.f32 %v1696_v55, 0.0  ;;  %v755_v62 = vmin.f32 %v1699_v56, 0.0 }
  0xe7   :  { %v784_v57 = vmul.f32 1.442695, %v720_v51  ;;  %v848_v58 = vmul.f32 1.442695, %v752_v52  ;;  %v721_v63 = vmin.f32 %v1702_v59, 0.0  ;;  %v753_v3 = vmin.f32 %v1705_v60, 0.0 }
  0xe8   :  { %1388 = vpow2.f32 %v788_v53  ;;  %v790_v2 = vmul.f32 1.442695, %v723_v61  ;;  %v854_v6 = vmul.f32 1.442695, %v755_v62  ;;  %vm658_vm2 = vcmp.gt.f32.partialorder %v1680_v39, 0.0 }
  0xe9   :  { %1390 = vpow2.f32 %v852_v54  ;;  %v1287_v0 = vpop.f32.mrb[4].mxu0  ;;  %v1319_v1 = vpop.f32.mrb[4].mxu1  ;;  %v786_v7 = vmul.f32 1.442695, %v721_v63  ;;  %v850_v11 = vmul.f32 1.442695, %v753_v3 }
  0xea   :  { %1392 = vpow2.f32 %v784_v57  ;;  %v417_v4 = vpop.f32.mrb[5].mxu0  ;;  %v545_v5 = vpop.f32.mrb[5].mxu1  ;;  %v1712_v8 = vadd.f32 %v1287_v0, %v1677_v36  ;;  %v1715_v12 = vadd.f32 %v1319_v1, %v1677_v36  ;;  %vm690_vm3 = vcmp.gt.f32.partialorder %v1683_v40, 0.0 }
  0xeb   :  { %1394 = vpow2.f32 %v848_v58  ;;  %v1288_v9 = vpop.f32.mrb[6].mxu0  ;;  %v1320_v10 = vpop.f32.mrb[6].mxu1  ;;  %v1718_v13 = vadd.f32 %v1677_v36, %v417_v4  ;;  %v1723_v17 = vadd.f32 %v1677_v36, %v545_v5  ;;  %vm656_vm4 = vcmp.gt.f32.partialorder %v1686_v43, 0.0 }
  0xec   :  { %1396 = vpow2.f32 %v790_v2  ;;  %v420_v14 = vpop.f32.mrb[7].mxu0  ;;  %v548_v15 = vpop.f32.mrb[7].mxu1  ;;  %v726_v16 = vmin.f32 %v1712_v8, 0.0  ;;  %v758_v18 = vmin.f32 %v1715_v12, 0.0  ;;  %vm688_vm5 = vcmp.gt.f32.partialorder %v1689_v44, 0.0 }
  0xed   :  { %1398 = vpow2.f32 %v854_v6  ;;  %v724_v20 = vmin.f32 %v1718_v13, 0.0  ;;  %vm659_vm6 = vcmp.gt.f32.partialorder %v1696_v55, 0.0  ;;  %v756_v22 = vmin.f32 %v1723_v17, 0.0 }
  0xee   :  { %1400 = vpow2.f32 %v786_v7  ;;  %v796_v19 = vmul.f32 1.442695, %v726_v16  ;;  %v860_v21 = vmul.f32 1.442695, %v758_v18  ;;  %v1733_v23 = vadd.f32 %v1288_v9, %v1677_v36 }
  0xef   :  { %1402 = vpow2.f32 %v850_v11  ;;  %v1736_v24 = vadd.f32 %v1320_v10, %v1677_v36  ;;  %vm691_vm7 = vcmp.gt.f32.partialorder %v1699_v56, 0.0  ;;  %v792_v25 = vmul.f32 1.442695, %v724_v20 }
  0xf0   :  { %1404 = vpow2.f32 %v796_v19  ;;  %v1740_v26 = vadd.f32 %v1677_v36, %v420_v14  ;;  %vm657_vm8 = vcmp.gt.f32.partialorder %v1702_v59, 0.0  ;;  %v856_v30 = vmul.f32 1.442695, %v756_v22 }
  0xf1   :  { %v1291_v27 = vpop.f32.mrb[8].mxu0  ;;  %v1323_v28 = vpop.f32.mrb[8].mxu1  ;;  %1406 = vpow2.f32 %v860_v21  ;;  %v727_v31 = vmin.f32 %v1733_v23, 0.0  ;;  %vm689_vm9 = vcmp.gt.f32.partialorder %v1705_v60, 0.0  ;;  %v759_v37 = vmin.f32 %v1736_v24, 0.0 }
  0xf2   :  { %v1389_v29 = vpop.eup %1388  ;;  %v1744_v32 = vpop.f32.mrb[9].mxu0  ;;  %1408 = vpow2.f32 %v792_v25  ;;  %v1755_v47 = vadd.f32 %v1677_v36, %v548_v15  ;;  %v725_v54 = vmin.f32 %v1740_v26, 0.0  ;;  %vm662_vm10 = vcmp.gt.f32.partialorder %v1712_v8, 0.0 }
  0xf3   :  { %v1746_v33 = vpop.f32.mrb[9].mxu1  ;;  %v1391_v34 = vpop.eup %1390  ;;  %v1178_v35 = vadd.f32 -1.0, %v1389_v29  ;;  %1410 = vpow2.f32 %v856_v30  ;;  %v798_v46 = vmul.f32 1.442695, %v727_v31  ;;  %v862_v53 = vmul.f32 1.442695, %v759_v37 }
  0xf4   :  { %v1750_v38 = vpop.f32.mrb[10].mxu0  ;;  %v1752_v41 = vpop.f32.mrb[10].mxu1  ;;  %v1210_v45 = vadd.f32 -1.0, %v1391_v34  ;;  %v794_v0 = vmul.f32 1.442695, %v725_v54  ;;  %v757_v3 = vmin.f32 %v1755_v47, 0.0  ;;  %v1786_v4 = vadd.f32 %v1291_v27, %v1677_v36 }
  0xf5   :  { %v1393_v42 = vpop.eup %1392  ;;  %v1757_v48 = vpop.f32.mrb[11].mxu0  ;;  %v978_v51 = vsel %vm658_vm2, %v1680_v39, %v1178_v35  ;;  %1412 = vpow2.f32 %v798_v46  ;;  %v1795_v7 = vadd.f32 %v1323_v28, %v1677_v36  ;;  %vm694_vm11 = vcmp.gt.f32.partialorder %v1715_v12, 0.0 }
  0xf6   :  { %v1759_v49 = vpop.f32.mrb[11].mxu1  ;;  %v1395_v50 = vpop.eup %1394  ;;  %v1176_v52 = vadd.f32 -1.0, %v1393_v42  ;;  %1042 = vst [vmem:[%s2436_s3 + $0x10] sm:$0xff] %v978_v51  ;;  %v1010_v58 = vsel %vm690_vm3, %v1683_v40, %v1210_v45  ;;  %1414 = vpow2.f32 %v862_v53  ;;  %vm660_vm12 = vcmp.gt.f32.partialorder %v1718_v13, 0.0 }
  0xf7   :  { %v1397_v57 = vpop.eup %1396  ;;  %v1208_v61 = vadd.f32 -1.0, %v1395_v50  ;;  %1074 = vst [vmem:[%s2436_s3 + $0x110] sm:$0xff] %v1010_v58  ;;  %1416 = vpow2.f32 %v794_v0  ;;  %v762_v19 = vmin.f32 %v1795_v7, 0.0  ;;  %v1833_v27 = vadd.f32 %v1677_v36, %v1744_v32 }
  0xf8   :  { %v1399_v62 = vpop.eup %1398  ;;  %v976_v39 = vsel %vm656_vm4, %v1686_v43, %v1176_v52  ;;  %v1179_v63 = vadd.f32 -1.0, %v1397_v57  ;;  %vm692_vm13 = vcmp.gt.f32.partialorder %v1723_v17, 0.0  ;;  %vm663_vm14 = vcmp.gt.f32.partialorder %v1733_v23, 0.0 }
  0xf9   :  { %v1401_v1 = vpop.eup %1400  ;;  %1040 = vst [vmem:[%s2436_s3] sm:$0xff] %v976_v39  ;;  %v1008_v40 = vsel %vm688_vm5, %v1689_v44, %v1208_v61  ;;  %v1211_v2 = vadd.f32 -1.0, %v1399_v62  ;;  %v1797_v44 = vpop.f32.mrb[12].mxu0  ;;  %v868_v35 = vmul.f32 1.442695, %v762_v19  ;;  %v728_v45 = vmin.f32 %v1833_v27, 0.0 }
  0xfa   :  { %v1403_v5 = vpop.eup %1402  ;;  %1072 = vst [vmem:[%s2436_s3 + $0x100] sm:$0xff] %v1008_v40  ;;  %v979_v43 = vsel %vm659_vm6, %v1696_v55, %v1179_v63  ;;  %v1177_v6 = vadd.f32 -1.0, %v1401_v1  ;;  %v1799_v9 = vpop.f32.mrb[12].mxu1  ;;  %v858_v55 = vmul.f32 1.442695, %v757_v3  ;;  %v1871_v57 = vadd.f32 %v1750_v38, %v1677_v36 }
  0xfb   :  { %1043 = vst [vmem:[%s2436_s3 + $0x18] sm:$0xff] %v979_v43  ;;  %v1011_v10 = vsel %vm691_vm7, %v1699_v56, %v1211_v2  ;;  %v1209_v11 = vadd.f32 -1.0, %v1403_v5  ;;  %v1808_v14 = vpop.f32.mrb[13].mxu0  ;;  %v1810_v15 = vpop.f32.mrb[13].mxu1  ;;  %v730_v56 = vmin.f32 %v1786_v4, 0.0  ;;  %v1875_v58 = vadd.f32 %v1752_v41, %v1677_v36 }
  0xfc   :  { %v1405_v16 = vpop.eup %1404  ;;  %1075 = vst [vmem:[%s2436_s3 + $0x118] sm:$0xff] %v1011_v10  ;;  %v977_v18 = vsel %vm657_vm8, %v1702_v59, %v1177_v6  ;;  %v1821_v20 = vpop.f32.mrb[14].mxu0  ;;  %1418 = vpow2.f32 %v858_v55  ;;  %v800_v51 = vmul.f32 1.442695, %v728_v45  ;;  %v1886_v39 = vadd.f32 %v1677_v36, %v1757_v48 }
  0xfd   :  { %v1823_v21 = vpop.f32.mrb[14].mxu1  ;;  %v1407_v22 = vpop.eup %1406  ;;  %1041 = vst [vmem:[%s2436_s3 + $0x8] sm:$0xff] %v977_v18  ;;  %v1009_v25 = vsel %vm689_vm9, %v1705_v60, %v1209_v11  ;;  %v1182_v59 = vadd.f32 -1.0, %v1405_v16  ;;  %v804_v34 = vmul.f32 1.442695, %v730_v56  ;;  %v1844_v60 = vadd.f32 %v1677_v36, %v1746_v33 }
  0xfe   :  { %v1835_v28 = vpop.f32.mrb[15].mxu0  ;;  %v1837_v29 = vpop.f32.mrb[15].mxu1  ;;  %1073 = vst [vmem:[%s2436_s3 + $0x108] sm:$0xff] %v1009_v25  ;;  %v1214_v31 = vadd.f32 -1.0, %v1407_v22  ;;  %vm695_vm15 = vcmp.gt.f32.partialorder %v1736_v24, 0.0  ;;  %v731_v1 = vmin.f32 %v1871_v57, 0.0  ;;  %v1922_v18 = vadd.f32 %v1797_v44, %v1677_v36 }
  0xff   :  { %v1409_v30 = vpop.eup %1408  ;;  %v982_v32 = vsel %vm662_vm10, %v1712_v8, %v1182_v59  ;;  %1420 = vpow2.f32 %v804_v34  ;;  %v760_v52 = vmin.f32 %v1844_v60, 0.0  ;;  %v763_v5 = vmin.f32 %v1875_v58, 0.0 }
 0x100   :  { %v1411_v37 = vpop.eup %1410  ;;  %v1180_v42 = vadd.f32 -1.0, %v1409_v30  ;;  %1046 = vst [vmem:[%s2436_s3 + $0x30] sm:$0xff] %v982_v32  ;;  %v1014_v46 = vsel %vm694_vm11, %v1715_v12, %v1214_v31  ;;  %1422 = vpow2.f32 %v868_v35  ;;  %vm661_vm0 = vcmp.gt.f32.partialorder %v1740_v26, 0.0 }
 0x101   :  { %v1212_v33 = vadd.f32 -1.0, %v1411_v37  ;;  %v1413_v50 = vpop.eup %1412  ;;  %1078 = vst [vmem:[%s2436_s3 + $0x130] sm:$0xff] %v1014_v46  ;;  %v1879_v61 = vpop.f32.mrb[16].mxu1  ;;  %1424 = vpow2.f32 %v800_v51  ;;  %v806_v6 = vmul.f32 1.442695, %v731_v1  ;;  %v729_v10 = vmin.f32 %v1886_v39, 0.0 }
 0x102   :  { %v980_v8 = vsel %vm660_vm12, %v1718_v13, %v1180_v42  ;;  %v1415_v53 = vpop.eup %1414  ;;  %v1183_v54 = vadd.f32 -1.0, %v1413_v50  ;;  %v1877_v13 = vpop.f32.mrb[16].mxu0  ;;  %v870_v16 = vmul.f32 1.442695, %v763_v5  ;;  %v1926_v56 = vadd.f32 %v1799_v9, %v1677_v36 }
 0x103   :  { %1044 = vst [vmem:[%s2436_s3 + $0x20] sm:$0xff] %v980_v8  ;;  %v1012_v12 = vsel %vm692_vm13, %v1723_v17, %v1212_v33  ;;  %v1215_v62 = vadd.f32 -1.0, %v1415_v53  ;;  %v864_v17 = vmul.f32 1.442695, %v760_v52  ;;  %v1888_v38 = vpop.f32.mrb[17].mxu0  ;;  %v1890_v63 = vpop.f32.mrb[17].mxu1  ;;  %v1952_v46 = vadd.f32 %v1677_v36, %v1810_v15 }
 0x104   :  { %1076 = vst [vmem:[%s2436_s3 + $0x120] sm:$0xff] %v1012_v12  ;;  %v1417_v41 = vpop.eup %1416  ;;  %v983_v0 = vsel %vm663_vm14, %v1733_v23, %v1183_v54  ;;  %v1897_v40 = vpop.f32.mrb[18].mxu0  ;;  %vm693_vm1 = vcmp.gt.f32.partialorder %v1755_v47, 0.0  ;;  %v734_v22 = vmin.f32 %v1922_v18, 0.0  ;;  %vm666_vm2 = vcmp.gt.f32.partialorder %v1786_v4, 0.0 }
 0x105   :  { %v1899_v2 = vpop.f32.mrb[18].mxu1  ;;  %1047 = vst [vmem:[%s2436_s3 + $0x38] sm:$0xff] %v983_v0  ;;  %v1015_v48 = vsel %vm695_vm15, %v1736_v24, %v1215_v62  ;;  %v1181_v3 = vadd.f32 -1.0, %v1417_v41  ;;  %1426 = vpow2.f32 %v864_v17  ;;  %v1906_v43 = vpop.f32.mrb[19].mxu0  ;;  %v1917_v24 = vadd.f32 %v1677_v36, %v1759_v49 }
 0x106   :  { %v1908_v23 = vpop.f32.mrb[19].mxu1  ;;  %1079 = vst [vmem:[%s2436_s3 + $0x138] sm:$0xff] %v1015_v48  ;;  %v1419_v11 = vpop.eup %1418  ;;  %1428 = vpow2.f32 %v806_v6  ;;  %v802_v49 = vmul.f32 1.442695, %v729_v10  ;;  %v766_v9 = vmin.f32 %v1926_v56, 0.0  ;;  %v1956_v33 = vadd.f32 %v1821_v20, %v1677_v36 }
 0x107   :  { %v981_v55 = vsel %vm661_vm0, %v1740_v26, %v1181_v3  ;;  %v1213_v19 = vadd.f32 -1.0, %v1419_v11  ;;  %1430 = vpow2.f32 %v870_v16  ;;  %v761_v26 = vmin.f32 %v1917_v24, 0.0 }
 0x108   :  { %1045 = vst [vmem:[%s2436_s3 + $0x28] sm:$0xff] %v981_v55  ;;  %1432 = vpow2.f32 %v802_v49  ;;  %v812_v37 = vmul.f32 1.442695, %v734_v22  ;;  %v876_v45 = vmul.f32 1.442695, %v766_v9  ;;  %vm698_vm3 = vcmp.gt.f32.partialorder %v1795_v7, 0.0 }
 0x109   :  { %v1421_v44 = vpop.eup %1420  ;;  %v1013_v25 = vsel %vm693_vm1, %v1755_v47, %v1213_v19  ;;  %v1937_v59 = vpop.f32.mrb[20].mxu0  ;;  %v866_v35 = vmul.f32 1.442695, %v761_v26  ;;  %v1946_v47 = vadd.f32 %v1677_v36, %v1808_v14  ;;  %vm664_vm4 = vcmp.gt.f32.partialorder %v1833_v27, 0.0 }
 0x10a   :  { %v1939_v30 = vpop.f32.mrb[20].mxu1  ;;  %v1423_v31 = vpop.eup %1422  ;;  %1077 = vst [vmem:[%s2436_s3 + $0x128] sm:$0xff] %v1013_v25  ;;  %v1186_v34 = vadd.f32 -1.0, %v1421_v44  ;;  %vm696_vm5 = vcmp.gt.f32.partialorder %v1844_v60, 0.0  ;;  %v764_v17 = vmin.f32 %v1952_v46, 0.0  ;;  %v735_v0 = vmin.f32 %v1956_v33, 0.0 }
 0x10b   :  { %v1948_v32 = vpop.f32.mrb[21].mxu0  ;;  %v1218_v42 = vadd.f32 -1.0, %v1423_v31  ;;  %v1958_v50 = vpop.f32.mrb[21].mxu1  ;;  %1434 = vpow2.f32 %v866_v35  ;;  %v732_v52 = vmin.f32 %v1946_v47, 0.0  ;;  %v1987_v1 = vadd.f32 %v1823_v21, %v1677_v36 }
 0x10c   :  { %v1960_v8 = vpop.f32.mrb[22].mxu0  ;;  %v1425_v51 = vpop.eup %1424  ;;  %v986_v14 = vsel %vm666_vm2, %v1786_v4, %v1186_v34  ;;  %1436 = vpow2.f32 %v812_v37  ;;  %v872_v48 = vmul.f32 1.442695, %v764_v17  ;;  %v1994_v3 = vadd.f32 %v1677_v36, %v1835_v28 }
 0x10d   :  { %v1967_v15 = vpop.f32.mrb[22].mxu1  ;;  %v1969_v53 = vpop.f32.mrb[23].mxu0  ;;  %1050 = vst [vmem:[%s2436_s3 + $0x50] sm:$0xff] %v986_v14  ;;  %v1018_v20 = vsel %vm698_vm3, %v1795_v7, %v1218_v42  ;;  %v1184_v12 = vadd.f32 -1.0, %v1425_v51  ;;  %1438 = vpow2.f32 %v876_v45  ;;  %v808_v62 = vmul.f32 1.442695, %v732_v52 }
 0x10e   :  { %v1976_v4 = vpop.f32.mrb[23].mxu1  ;;  %1082 = vst [vmem:[%s2436_s3 + $0x150] sm:$0xff] %v1018_v20  ;;  %vm667_vm6 = vcmp.gt.f32.partialorder %v1871_v57, 0.0  ;;  %v814_v21 = vmul.f32 1.442695, %v735_v0  ;;  %v767_v10 = vmin.f32 %v1987_v1, 0.0  ;;  %v2041_v51 = vadd.f32 %v1879_v61, %v1677_v36 }
 0x10f   :  { %v1427_v54 = vpop.eup %1426  ;;  %v984_v41 = vsel %vm664_vm4, %v1833_v27, %v1184_v12  ;;  %1440 = vpow2.f32 %v808_v62  ;;  %v1998_v27 = vadd.f32 %v1677_v36, %v1837_v29  ;;  %vm699_vm7 = vcmp.gt.f32.partialorder %v1875_v58, 0.0 }
 0x110   :  { %v1216_v7 = vadd.f32 -1.0, %v1427_v54  ;;  %1048 = vst [vmem:[%s2436_s3 + $0x40] sm:$0xff] %v984_v41  ;;  %v1429_v5 = vpop.eup %1428  ;;  %1442 = vpow2.f32 %v872_v48  ;;  %v733_v29 = vmin.f32 %v1994_v3, 0.0  ;;  %vm665_vm8 = vcmp.gt.f32.partialorder %v1886_v39, 0.0 }
 0x111   :  { %v2003_v11 = vpop.f32.mrb[24].mxu0  ;;  %v2005_v55 = vpop.f32.mrb[24].mxu1  ;;  %v1187_v28 = vadd.f32 -1.0, %v1429_v5  ;;  %1444 = vpow2.f32 %v814_v21  ;;  %v878_v22 = vmul.f32 1.442695, %v767_v10  ;;  %v765_v35 = vmin.f32 %v1998_v27, 0.0 }
 0x112   :  { %v1016_v6 = vsel %vm696_vm5, %v1844_v60, %v1216_v7  ;;  %v1431_v16 = vpop.eup %1430  ;;  %v2012_v60 = vpop.f32.mrb[25].mxu0  ;;  %v810_v34 = vmul.f32 1.442695, %v733_v29  ;;  %v2051_v20 = vadd.f32 %v1677_v36, %v1888_v38  ;;  %vm697_vm9 = vcmp.gt.f32.partialorder %v1917_v24, 0.0 }
 0x113   :  { %1080 = vst [vmem:[%s2436_s3 + $0x140] sm:$0xff] %v1016_v6  ;;  %v2014_v19 = vpop.f32.mrb[25].mxu1  ;;  %v1433_v49 = vpop.eup %1432  ;;  %v1219_v26 = vadd.f32 -1.0, %v1431_v16  ;;  %v987_v9 = vsel %vm667_vm6, %v1871_v57, %v1187_v28  ;;  %1446 = vpow2.f32 %v878_v22  ;;  %v2037_v57 = vadd.f32 %v1877_v13, %v1677_v36 }
 0x114   :  { %v2017_v44 = vpop.f32.mrb[26].mxu0  ;;  %v2019_v25 = vpop.f32.mrb[26].mxu1  ;;  %v1185_v31 = vadd.f32 -1.0, %v1433_v49  ;;  %1051 = vst [vmem:[%s2436_s3 + $0x58] sm:$0xff] %v987_v9  ;;  %1448 = vpow2.f32 %v810_v34  ;;  %vm670_vm10 = vcmp.gt.f32.partialorder %v1922_v18, 0.0  ;;  %vm702_vm11 = vcmp.gt.f32.partialorder %v1926_v56, 0.0 }
 0x115   :  { %v2025_v37 = vpop.f32.mrb[27].mxu0  ;;  %v2027_v42 = vpop.f32.mrb[27].mxu1  ;;  %v1019_v45 = vsel %vm699_vm7, %v1875_v58, %v1219_v26  ;;  %v874_v58 = vmul.f32 1.442695, %v765_v35  ;;  %v738_v12 = vmin.f32 %v2037_v57, 0.0  ;;  %v770_v38 = vmin.f32 %v2041_v51, 0.0 }
 0x116   :  { %v1435_v14 = vpop.eup %1434  ;;  %1083 = vst [vmem:[%s2436_s3 + $0x158] sm:$0xff] %v1019_v45  ;;  %v985_v52 = vsel %vm665_vm8, %v1886_v39, %v1185_v31  ;;  %v736_v7 = vmin.f32 %v2051_v20, 0.0  ;;  %v2073_v10 = vadd.f32 %v1677_v36, %v1890_v63  ;;  %vm668_vm12 = vcmp.gt.f32.partialorder %v1946_v47, 0.0 }
 0x117   :  { %v1437_v13 = vpop.eup %1436  ;;  %1049 = vst [vmem:[%s2436_s3 + $0x48] sm:$0xff] %v985_v52  ;;  %v1217_v61 = vadd.f32 -1.0, %v1435_v14  ;;  %1450 = vpow2.f32 %v874_v58  ;;  %v820_v41 = vmul.f32 1.442695, %v738_v12  ;;  %v884_v21 = vmul.f32 1.442695, %v770_v38 }
 0x118   :  { %v1439_v54 = vpop.eup %1438  ;;  %v1190_v39 = vadd.f32 -1.0, %v1437_v13  ;;  %v816_v63 = vmul.f32 1.442695, %v736_v7  ;;  %vm700_vm13 = vcmp.gt.f32.partialorder %v1952_v46, 0.0  ;;  %v768_v22 = vmin.f32 %v2073_v10, 0.0 }
 0x119   :  { %v1017_v62 = vsel %vm697_vm9, %v1917_v24, %v1217_v61  ;;  %v1222_v17 = vadd.f32 -1.0, %v1439_v54  ;;  %v2063_v0 = vpop.f32.mrb[28].mxu0  ;;  %v2065_v48 = vpop.f32.mrb[28].mxu1  ;;  %v2077_v24 = vadd.f32 %v1897_v40, %v1677_v36  ;;  %1452 = vpow2.f32 %v820_v41 }
 0x11a   :  { %v1441_v5 = vpop.eup %1440  ;;  %1081 = vst [vmem:[%s2436_s3 + $0x148] sm:$0xff] %v1017_v62  ;;  %v990_v6 = vsel %vm670_vm10, %v1922_v18, %v1190_v39  ;;  %v2079_v16 = vpop.f32.mrb[29].mxu0  ;;  %1454 = vpow2.f32 %v884_v21  ;;  %v880_v52 = vmul.f32 1.442695, %v768_v22  ;;  %v2110_v58 = vadd.f32 %v1899_v2, %v1677_v36 }
 0x11b   :  { %v2081_v28 = vpop.f32.mrb[29].mxu1  ;;  %1054 = vst [vmem:[%s2436_s3 + $0x70] sm:$0xff] %v990_v6  ;;  %v1022_v18 = vsel %vm702_vm11, %v1926_v56, %v1222_v17  ;;  %v1188_v29 = vadd.f32 -1.0, %v1441_v5  ;;  %v2089_v49 = vpop.f32.mrb[30].mxu0  ;;  %1456 = vpow2.f32 %v816_v63  ;;  %v739_v45 = vmin.f32 %v2077_v24, 0.0 }
 0x11c   :  { %v2091_v26 = vpop.f32.mrb[30].mxu1  ;;  %v1443_v40 = vpop.eup %1442  ;;  %1086 = vst [vmem:[%s2436_s3 + $0x170] sm:$0xff] %v1022_v18  ;;  %v2114_v13 = vadd.f32 %v1677_v36, %v1906_v43  ;;  %vm671_vm14 = vcmp.gt.f32.partialorder %v1956_v33, 0.0  ;;  %v2122_v54 = vadd.f32 %v1677_v36, %v1908_v23  ;;  %1458 = vpow2.f32 %v880_v52 }
 0x11d   :  { %v2099_v56 = vpop.f32.mrb[31].mxu0  ;;  %v2101_v9 = vpop.f32.mrb[31].mxu1  ;;  %v988_v34 = vsel %vm668_vm12, %v1946_v47, %v1188_v29  ;;  %v1220_v35 = vadd.f32 -1.0, %v1443_v40  ;;  %v822_v12 = vmul.f32 1.442695, %v739_v45  ;;  %v2130_v38 = vadd.f32 %v1937_v59, %v1677_v36 }
 0x11e   :  { %v1445_v31 = vpop.eup %1444  ;;  %1052 = vst [vmem:[%s2436_s3 + $0x60] sm:$0xff] %v988_v34  ;;  %vm703_vm15 = vcmp.gt.f32.partialorder %v1987_v1, 0.0  ;;  %vm669_vm0 = vcmp.gt.f32.partialorder %v1994_v3, 0.0  ;;  %v769_v59 = vmin.f32 %v2122_v54, 0.0  ;;  %vm701_vm1 = vcmp.gt.f32.partialorder %v1998_v27, 0.0 }
 0x11f   :  { %v1191_v14 = vadd.f32 -1.0, %v1445_v31  ;;  %v1447_v61 = vpop.eup %1446  ;;  %v1020_v47 = vsel %vm700_vm13, %v1952_v46, %v1220_v35  ;;  %1460 = vpow2.f32 %v822_v12  ;;  %v771_v46 = vmin.f32 %v2110_v58, 0.0 }
 0x120   :  { %v1449_v39 = vpop.eup %1448  ;;  %1084 = vst [vmem:[%s2436_s3 + $0x160] sm:$0xff] %v1020_v47  ;;  %v1223_v43 = vadd.f32 -1.0, %v1447_v61  ;;  %v882_v6 = vmul.f32 1.442695, %v769_v59  ;;  %v742_v21 = vmin.f32 %v2130_v38, 0.0  ;;  %v2152_v18 = vadd.f32 %v1939_v30, %v1677_v36 }
 0x121   :  { %v991_v2 = vsel %vm671_vm14, %v1956_v33, %v1191_v14  ;;  %v1189_v23 = vadd.f32 -1.0, %v1449_v39  ;;  %v1451_v62 = vpop.eup %1450  ;;  %v737_v33 = vmin.f32 %v2114_v13, 0.0  ;;  %v886_v5 = vmul.f32 1.442695, %v771_v46 }
 0x122   :  { %1055 = vst [vmem:[%s2436_s3 + $0x78] sm:$0xff] %v991_v2  ;;  %v1023_v17 = vsel %vm703_vm15, %v1987_v1, %v1223_v43  ;;  %v1221_v7 = vadd.f32 -1.0, %v1451_v62  ;;  %v2161_v40 = vadd.f32 %v1677_v36, %v1958_v50  ;;  %vm674_vm2 = vcmp.gt.f32.partialorder %v2037_v57, 0.0 }
 0x123   :  { %1087 = vst [vmem:[%s2436_s3 + $0x178] sm:$0xff] %v1023_v17  ;;  %v989_v41 = vsel %vm669_vm0, %v1994_v3, %v1189_v23  ;;  %v818_v1 = vmul.f32 1.442695, %v737_v33  ;;  %v1453_v29 = vpop.eup %1452  ;;  %1462 = vpow2.f32 %v886_v5  ;;  %v2157_v3 = vadd.f32 %v1677_v36, %v1948_v32 }
 0x124   :  { %1053 = vst [vmem:[%s2436_s3 + $0x68] sm:$0xff] %v989_v41  ;;  %v1021_v63 = vsel %vm701_vm1, %v1998_v27, %v1221_v7  ;;  %v1455_v22 = vpop.eup %1454  ;;  %v1194_v30 = vadd.f32 -1.0, %v1453_v29  ;;  %v828_v31 = vmul.f32 1.442695, %v742_v21  ;;  %vm706_vm3 = vcmp.gt.f32.partialorder %v2041_v51, 0.0 }
 0x125   :  { %1085 = vst [vmem:[%s2436_s3 + $0x168] sm:$0xff] %v1021_v63  ;;  %1464 = vpow2.f32 %v818_v1  ;;  %v1457_v27 = vpop.eup %1456  ;;  %v1226_v34 = vadd.f32 -1.0, %v1455_v22  ;;  %v774_v32 = vmin.f32 %v2152_v18, 0.0  ;;  %v740_v45 = vmin.f32 %v2157_v3, 0.0 }
 0x126   :  { %1466 = vpow2.f32 %v882_v6  ;;  %v994_v50 = vsel %vm674_vm2, %v2037_v57, %v1194_v30  ;;  %v1192_v35 = vadd.f32 -1.0, %v1457_v27  ;;  %vm672_vm4 = vcmp.gt.f32.partialorder %v2051_v20, 0.0  ;;  %v1459_v47 = vpop.eup %1458 }
 0x127   :  { %1468 = vpow2.f32 %v828_v31  ;;  %1058 = vst [vmem:[%s2436_s3 + $0x90] sm:$0xff] %v994_v50  ;;  %v1026_v14 = vsel %vm706_vm3, %v2041_v51, %v1226_v34  ;;  %v892_v52 = vmul.f32 1.442695, %v774_v32  ;;  %v772_v61 = vmin.f32 %v2161_v40, 0.0 }
 0x128   :  { %1090 = vst [vmem:[%s2436_s3 + $0x190] sm:$0xff] %v1026_v14  ;;  %v992_v57 = vsel %vm672_vm4, %v2051_v20, %v1192_v35  ;;  %v824_v12 = vmul.f32 1.442695, %v740_v45  ;;  %v2183_v39 = vadd.f32 %v1960_v8, %v1677_v36  ;;  %v2187_v51 = vadd.f32 %v1967_v15, %v1677_v36 }
 0x129   :  { %v1461_v2 = vpop.eup %1460  ;;  %1056 = vst [vmem:[%s2436_s3 + $0x80] sm:$0xff] %v992_v57  ;;  %v1224_v43 = vadd.f32 -1.0, %v1459_v47  ;;  %1470 = vpow2.f32 %v892_v52  ;;  %v888_v23 = vmul.f32 1.442695, %v772_v61  ;;  %v2194_v20 = vadd.f32 %v1677_v36, %v1969_v53 }
 0x12a   :  { %vm704_vm5 = vcmp.gt.f32.partialorder %v2073_v10, 0.0  ;;  %v1195_v8 = vadd.f32 -1.0, %v1461_v2  ;;  %1472 = vpow2.f32 %v824_v12  ;;  %v743_v46 = vmin.f32 %v2183_v39, 0.0 }
 0x12b   :  { %v1024_v15 = vsel %vm704_vm5, %v2073_v10, %v1224_v43  ;;  %vm675_vm6 = vcmp.gt.f32.partialorder %v2077_v24, 0.0  ;;  %1474 = vpow2.f32 %v888_v23  ;;  %v775_v62 = vmin.f32 %v2187_v51, 0.0 }
 0x12c   :  { %1088 = vst [vmem:[%s2436_s3 + $0x180] sm:$0xff] %v1024_v15  ;;  %v995_v53 = vsel %vm675_vm6, %v2077_v24, %v1195_v8  ;;  %vm707_vm7 = vcmp.gt.f32.partialorder %v2110_v58, 0.0  ;;  %v830_v17 = vmul.f32 1.442695, %v743_v46  ;;  %v741_v33 = vmin.f32 %v2194_v20, 0.0 }
 0x12d   :  { %v1463_v59 = vpop.eup %1462  ;;  %1059 = vst [vmem:[%s2436_s3 + $0x98] sm:$0xff] %v995_v53  ;;  %vm673_vm8 = vcmp.gt.f32.partialorder %v2114_v13, 0.0  ;;  %v894_v10 = vmul.f32 1.442695, %v775_v62  ;;  %v2213_v41 = vadd.f32 %v1677_v36, %v1976_v4  ;;  %v2217_v24 = vadd.f32 %v2003_v11, %v1677_v36 }
 0x12e   :  { %v1227_v5 = vadd.f32 -1.0, %v1463_v59  ;;  %1476 = vpow2.f32 %v830_v17  ;;  %v826_v1 = vmul.f32 1.442695, %v741_v33  ;;  %v2221_v6 = vadd.f32 %v2005_v55, %v1677_v36 }
 0x12f   :  { %v1465_v7 = vpop.eup %1464  ;;  %1478 = vpow2.f32 %v894_v10  ;;  %v773_v63 = vmin.f32 %v2213_v41, 0.0  ;;  %v2226_v4 = vadd.f32 %v1677_v36, %v2012_v60  ;;  %vm705_vm9 = vcmp.gt.f32.partialorder %v2122_v54, 0.0 }
 0x130   :  { %v1467_v21 = vpop.eup %1466  ;;  %v1193_v29 = vadd.f32 -1.0, %v1465_v7  ;;  %v1027_v11 = vsel %vm707_vm7, %v2110_v58, %v1227_v5  ;;  %1480 = vpow2.f32 %v826_v1  ;;  %v746_v27 = vmin.f32 %v2217_v24, 0.0 }
 0x131   :  { %v1469_v22 = vpop.eup %1468  ;;  %v1225_v30 = vadd.f32 -1.0, %v1467_v21  ;;  %1091 = vst [vmem:[%s2436_s3 + $0x198] sm:$0xff] %v1027_v11  ;;  %v890_v60 = vmul.f32 1.442695, %v773_v63  ;;  %vm678_vm10 = vcmp.gt.f32.partialorder %v2130_v38, 0.0  ;;  %vm710_vm11 = vcmp.gt.f32.partialorder %v2152_v18, 0.0 }
 0x132   :  { %v993_v55 = vsel %vm673_vm8, %v2114_v13, %v1193_v29  ;;  %v1198_v31 = vadd.f32 -1.0, %v1469_v22  ;;  %v778_v34 = vmin.f32 %v2221_v6, 0.0  ;;  %v836_v50 = vmul.f32 1.442695, %v746_v27  ;;  %v1516_v29 = vld [vmem:[%s2435_s2] ss:$0 sm:$0xff] }
 0x133   :  { %1057 = vst [vmem:[%s2436_s3 + $0x88] sm:$0xff] %v993_v55  ;;  %v1025_v58 = vsel %vm705_vm9, %v2122_v54, %v1225_v30  ;;  %v1471_v32 = vpop.eup %1470  ;;  %1482 = vpow2.f32 %v890_v60  ;;  %v744_v35 = vmin.f32 %v2226_v4, 0.0  ;;  %v2256_v52 = vadd.f32 %v1677_v36, %v2014_v19 }
 0x134   :  { %1089 = vst [vmem:[%s2436_s3 + $0x188] sm:$0xff] %v1025_v58  ;;  %v998_v13 = vsel %vm678_vm10, %v2130_v38, %v1198_v31  ;;  %v1473_v45 = vpop.eup %1472  ;;  %v1230_v54 = vadd.f32 -1.0, %v1471_v32  ;;  %v900_v14 = vmul.f32 1.442695, %v778_v34  ;;  %v2260_v61 = vadd.f32 %v2017_v44, %v1677_v36 }
 0x135   :  { %1062 = vst [vmem:[%s2436_s3 + $0xb0] sm:$0xff] %v998_v13  ;;  %v1475_v38 = vpop.eup %1474  ;;  %v1196_v47 = vadd.f32 -1.0, %v1473_v45  ;;  %1484 = vpow2.f32 %v836_v50  ;;  %v832_v57 = vmul.f32 1.442695, %v744_v35  ;;  %v2264_v12 = vadd.f32 %v2019_v25, %v1677_v36 }
 0x136   :  { %v1030_v2 = vsel %vm710_vm11, %v2152_v18, %v1230_v54  ;;  %vm676_vm12 = vcmp.gt.f32.partialorder %v2157_v3, 0.0  ;;  %v1228_v19 = vadd.f32 -1.0, %v1475_v38  ;;  %1486 = vpow2.f32 %v900_v14 }
 0x137   :  { %1094 = vst [vmem:[%s2436_s3 + $0x1b0] sm:$0xff] %v1030_v2  ;;  %v996_v44 = vsel %vm676_vm12, %v2157_v3, %v1196_v47  ;;  %vm708_vm13 = vcmp.gt.f32.partialorder %v2161_v40, 0.0  ;;  %1488 = vpow2.f32 %v832_v57  ;;  %v776_v25 = vmin.f32 %v2256_v52, 0.0 }
 0x138   :  { %v1477_v43 = vpop.eup %1476  ;;  %1060 = vst [vmem:[%s2436_s3 + $0xa0] sm:$0xff] %v996_v44  ;;  %v1028_v18 = vsel %vm708_vm13, %v2161_v40, %v1228_v19  ;;  %vm679_vm14 = vcmp.gt.f32.partialorder %v2183_v39, 0.0  ;;  %v747_v23 = vmin.f32 %v2260_v61, 0.0  ;;  %v779_v8 = vmin.f32 %v2264_v12, 0.0 }
 0x139   :  { %v1479_v46 = vpop.eup %1478  ;;  %1092 = vst [vmem:[%s2436_s3 + $0x1a0] sm:$0xff] %v1028_v18  ;;  %v1199_v3 = vadd.f32 -1.0, %v1477_v43  ;;  %v896_v15 = vmul.f32 1.442695, %v776_v25  ;;  %v2288_v62 = vadd.f32 %v1677_v36, %v2025_v37  ;;  %v2292_v40 = vadd.f32 %v1677_v36, %v2027_v42 }
 0x13a   :  { %v1481_v53 = vpop.eup %1480  ;;  %v1231_v17 = vadd.f32 -1.0, %v1479_v46  ;;  %v838_v33 = vmul.f32 1.442695, %v747_v23  ;;  %v902_v59 = vmul.f32 1.442695, %v779_v8  ;;  %v2296_v10 = vadd.f32 %v2063_v0, %v1677_v36 }
 0x13b   :  { %v999_v7 = vsel %vm679_vm14, %v2183_v39, %v1199_v3  ;;  %vm711_vm15 = vcmp.gt.f32.partialorder %v2187_v51, 0.0  ;;  %v1197_v5 = vadd.f32 -1.0, %v1481_v53  ;;  %1490 = vpow2.f32 %v896_v15 }
 0x13c   :  { %1063 = vst [vmem:[%s2436_s3 + $0xb8] sm:$0xff] %v999_v7  ;;  %v1031_v37 = vsel %vm711_vm15, %v2187_v51, %v1231_v17  ;;  %vm677_vm0 = vcmp.gt.f32.partialorder %v2194_v20, 0.0  ;;  %1492 = vpow2.f32 %v838_v33  ;;  %v745_v42 = vmin.f32 %v2288_v62, 0.0 }
 0x13d   :  { %v1483_v1 = vpop.eup %1482  ;;  %1095 = vst [vmem:[%s2436_s3 + $0x1b8] sm:$0xff] %v1031_v37  ;;  %v997_v36 = vsel %vm677_vm0, %v2194_v20, %v1197_v5  ;;  %vm709_vm1 = vcmp.gt.f32.partialorder %v2213_v41, 0.0  ;;  %1494 = vpow2.f32 %v902_v59  ;;  %v777_v0 = vmin.f32 %v2292_v40, 0.0 }
 0x13e   :  { %1061 = vst [vmem:[%s2436_s3 + $0xa8] sm:$0xff] %v997_v36  ;;  %v1229_v39 = vadd.f32 -1.0, %v1483_v1  ;;  %v834_v51 = vmul.f32 1.442695, %v745_v42  ;;  %v750_v21 = vmin.f32 %v2296_v10, 0.0  ;;  %v2320_v63 = vadd.f32 %v1516_v29, %v2065_v48 }
 0x13f   :  { %v1485_v20 = vpop.eup %1484  ;;  %v898_v22 = vmul.f32 1.442695, %v777_v0  ;;  %v2323_v11 = vadd.f32 %v1516_v29, %v2079_v16  ;;  %v2326_v30 = vadd.f32 %v1516_v29, %v2081_v28  ;;  %v2329_v55 = vadd.f32 %v1516_v29, %v2089_v49 }
 0x140   :  { %v1487_v31 = vpop.eup %1486  ;;  %v1029_v60 = vsel %vm709_vm1, %v2213_v41, %v1229_v39  ;;  %v1202_v27 = vadd.f32 -1.0, %v1485_v20  ;;  %1496 = vpow2.f32 %v834_v51  ;;  %v844_v58 = vmul.f32 1.442695, %v750_v21 }
 0x141   :  { %v1489_v34 = vpop.eup %1488  ;;  %1093 = vst [vmem:[%s2436_s3 + $0x1a8] sm:$0xff] %v1029_v60  ;;  %vm682_vm2 = vcmp.gt.f32.partialorder %v2217_v24, 0.0  ;;  %v1234_v48 = vadd.f32 -1.0, %v1487_v31  ;;  %1498 = vpow2.f32 %v898_v22  ;;  %v782_v16 = vmin.f32 %v2320_v63, 0.0 }
 0x142   :  { %v1002_v28 = vsel %vm682_vm2, %v2217_v24, %v1202_v27  ;;  %vm714_vm3 = vcmp.gt.f32.partialorder %v2221_v6, 0.0  ;;  %v1200_v49 = vadd.f32 -1.0, %v1489_v34  ;;  %1500 = vpow2.f32 %v844_v58 }
 0x143   :  { %1066 = vst [vmem:[%s2436_s3 + $0xd0] sm:$0xff] %v1002_v28  ;;  %v1034_v41 = vsel %vm714_vm3, %v2221_v6, %v1234_v48  ;;  %vm680_vm4 = vcmp.gt.f32.partialorder %v2226_v4, 0.0  ;;  %v908_v32 = vmul.f32 1.442695, %v782_v16  ;;  %v748_v13 = vmin.f32 %v2323_v11, 0.0 }
 0x144   :  { %1098 = vst [vmem:[%s2436_s3 + $0x1d0] sm:$0xff] %v1034_v41  ;;  %v1000_v24 = vsel %vm680_vm4, %v2226_v4, %v1200_v49  ;;  %vm712_vm5 = vcmp.gt.f32.partialorder %v2256_v52, 0.0  ;;  %v780_v50 = vmin.f32 %v2326_v30, 0.0  ;;  %v751_v35 = vmin.f32 %v2329_v55, 0.0 }
 0x145   :  { %v1491_v45 = vpop.eup %1490  ;;  %1064 = vst [vmem:[%s2436_s3 + $0xc0] sm:$0xff] %v1000_v24  ;;  %1502 = vpow2.f32 %v908_v32  ;;  %v840_v6 = vmul.f32 1.442695, %v748_v13  ;;  %v2356_v54 = vadd.f32 %v1516_v29, %v2091_v26  ;;  %v2359_v14 = vadd.f32 %v1516_v29, %v2099_v56 }
 0x146   :  { %v1493_v4 = vpop.eup %1492  ;;  %v1232_v38 = vadd.f32 -1.0, %v1491_v45  ;;  %v904_v47 = vmul.f32 1.442695, %v780_v50  ;;  %v846_v57 = vmul.f32 1.442695, %v751_v35  ;;  %v2362_v2 = vadd.f32 %v1516_v29, %v2101_v9 }
 0x147   :  { %v1495_v19 = vpop.eup %1494  ;;  %vm683_vm6 = vcmp.gt.f32.partialorder %v2260_v61, 0.0  ;;  %v1203_v44 = vadd.f32 -1.0, %v1493_v4  ;;  %1504 = vpow2.f32 %v840_v6  ;;  %v783_v25 = vmin.f32 %v2356_v54, 0.0 }
 0x148   :  { %v1032_v26 = vsel %vm712_vm5, %v2256_v52, %v1232_v38  ;;  %vm715_vm7 = vcmp.gt.f32.partialorder %v2264_v12, 0.0  ;;  %v1235_v56 = vadd.f32 -1.0, %v1495_v19  ;;  %1506 = vpow2.f32 %v904_v47 }
 0x149   :  { %1096 = vst [vmem:[%s2436_s3 + $0x1c0] sm:$0xff] %v1032_v26  ;;  %v1003_v9 = vsel %vm683_vm6, %v2260_v61, %v1203_v44  ;;  %1508 = vpow2.f32 %v846_v57  ;;  %v910_v43 = vmul.f32 1.442695, %v783_v25  ;;  %v749_v18 = vmin.f32 %v2359_v14, 0.0 }
 0x14a   :  { %v1497_v23 = vpop.eup %1496  ;;  %1067 = vst [vmem:[%s2436_s3 + $0xd8] sm:$0xff] %v1003_v9  ;;  %v1035_v52 = vsel %vm715_vm7, %v2264_v12, %v1235_v56  ;;  %v781_v8 = vmin.f32 %v2362_v2, 0.0  ;;  %vm681_vm8 = vcmp.gt.f32.partialorder %v2288_v62, 0.0  ;;  %vm713_vm9 = vcmp.gt.f32.partialorder %v2292_v40, 0.0 }
 0x14b   :  { %v1499_v46 = vpop.eup %1498  ;;  %1099 = vst [vmem:[%s2436_s3 + $0x1d8] sm:$0xff] %v1035_v52  ;;  %v1201_v3 = vadd.f32 -1.0, %v1497_v23  ;;  %1510 = vpow2.f32 %v910_v43  ;;  %v842_v61 = vmul.f32 1.442695, %v749_v18  ;;  %vm686_vm10 = vcmp.gt.f32.partialorder %v2296_v10, 0.0 }
 0x14c   :  { %v1501_v15 = vpop.eup %1500  ;;  %v1233_v53 = vadd.f32 -1.0, %v1499_v46  ;;  %v906_v17 = vmul.f32 1.442695, %v781_v8  ;;  %vm718_vm11 = vcmp.gt.f32.partialorder %v2320_v63, 0.0  ;;  %vm684_vm12 = vcmp.gt.f32.partialorder %v2323_v11, 0.0 }
 0x14d   :  { %v1001_v33 = vsel %vm681_vm8, %v2288_v62, %v1201_v3  ;;  %v1206_v12 = vadd.f32 -1.0, %v1501_v15  ;;  %1512 = vpow2.f32 %v842_v61  ;;  %vm716_vm13 = vcmp.gt.f32.partialorder %v2326_v30, 0.0 }
 0x14e   :  { %1065 = vst [vmem:[%s2436_s3 + $0xc8] sm:$0xff] %v1001_v33  ;;  %v1033_v59 = vsel %vm713_vm9, %v2292_v40, %v1233_v53  ;;  %1514 = vpow2.f32 %v906_v17  ;;  %vm687_vm14 = vcmp.gt.f32.partialorder %v2329_v55, 0.0  ;;  %vm719_vm15 = vcmp.gt.f32.partialorder %v2356_v54, 0.0 }
 0x14f   :  { %v1503_v7 = vpop.eup %1502  ;;  %1097 = vst [vmem:[%s2436_s3 + $0x1c8] sm:$0xff] %v1033_v59  ;;  %v1006_v62 = vsel %vm686_vm10, %v2296_v10, %v1206_v12  ;;  %vm685_vm0 = vcmp.gt.f32.partialorder %v2359_v14, 0.0  ;;  %vm717_vm1 = vcmp.gt.f32.partialorder %v2362_v2, 0.0 }
 0x150   :  { %1070 = vst [vmem:[%s2436_s3 + $0xf0] sm:$0xff] %v1006_v62  ;;  %v1238_v5 = vadd.f32 -1.0, %v1503_v7 }
 0x151   :  { %v1505_v37 = vpop.eup %1504 }
 0x152   :  { %v1507_v42 = vpop.eup %1506  ;;  %v1038_v40 = vsel %vm718_vm11, %v2320_v63, %v1238_v5  ;;  %v1204_v1 = vadd.f32 -1.0, %v1505_v37 }
 0x153   :  { %v1509_v36 = vpop.eup %1508  ;;  %1102 = vst [vmem:[%s2436_s3 + $0x1f0] sm:$0xff] %v1038_v40  ;;  %v1236_v10 = vadd.f32 -1.0, %v1507_v42 }
 0x154   :  { %v1004_v0 = vsel %vm684_vm12, %v2323_v11, %v1204_v1  ;;  %v1207_v39 = vadd.f32 -1.0, %v1509_v36 }
 0x155   :  { %v1511_v51 = vpop.eup %1510  ;;  %1068 = vst [vmem:[%s2436_s3 + $0xe0] sm:$0xff] %v1004_v0  ;;  %v1036_v21 = vsel %vm716_vm13, %v2326_v30, %v1236_v10 }
 0x156   :  { %1100 = vst [vmem:[%s2436_s3 + $0x1e0] sm:$0xff] %v1036_v21  ;;  %v1007_v29 = vsel %vm687_vm14, %v2329_v55, %v1207_v39  ;;  %v1239_v63 = vadd.f32 -1.0, %v1511_v51 }
 0x157   :  { %v1513_v20 = vpop.eup %1512  ;;  %1071 = vst [vmem:[%s2436_s3 + $0xf8] sm:$0xff] %v1007_v29 }
 0x158   :  { %v1515_v22 = vpop.eup %1514  ;;  %v1039_v11 = vsel %vm719_vm15, %v2356_v54, %v1239_v63  ;;  %v1205_v30 = vadd.f32 -1.0, %v1513_v20 }
 0x159   :  { %1103 = vst [vmem:[%s2436_s3 + $0x1f8] sm:$0xff] %v1039_v11  ;;  %v1237_v31 = vadd.f32 -1.0, %v1515_v22 }
 0x15a   :  { %v1005_v55 = vsel %vm685_vm0, %v2359_v14, %v1205_v30 }
 0x15b   :  { %1069 = vst [vmem:[%s2436_s3 + $0xe8] sm:$0xff] %v1005_v55  ;;  %v1037_v60 = vsel %vm717_vm1, %v2362_v2, %v1237_v31 }
 0x15c   :  { %1101 = vst [vmem:[%s2436_s3 + $0x1e8] sm:$0xff] %v1037_v60 }

// kernel: dilation_block_forward.5
= control target key start
LH: loop header
LB: loop body
LE: loop exit
PB: predicated region body
PF: predicated region fallthrough
CT: control target
= control target key end

     0   :  { %v2522_v0 = vmov 0   ;;  %vm774_vm0 = vcmask 261120   ;;  %s3737_s1 = inlined_call_operand.vmem [shape: bf16[288,128], index: 1, kind: input, shape index: {}]   ;;  %s3738_s0 = inlined_call_operand.vmem [shape: bf16[512,288], index: 0, kind: input, shape index: {}]   ;;  %s3739_s2 = inlined_call_operand.vmem [shape: f32[1,128], index: 2, kind: input, shape index: {}]   ;;  %s3740_s3 = inlined_call_operand.vmem [shape: f32[512,128], index: 3, kind: output, shape index: {}]  }
   0x1   :  { %871 = vmatprep.subr.bf16.mxu0 %v2522_v0  ;;  %2214 = vmatprep.subr.bf16.mxu1 %v2522_v0  ;;  %v2247_v1 = vld [vmem:[%s3737_s1] sm:$0xff]   ;;  %v2248_v2 = vld [vmem:[%s3737_s1 + $0x8] sm:$0xff]   ;;  %v2249_v3 = vld [vmem:[%s3737_s1 + $0x10] sm:$0xff]  }
   0x2   :  { %872 = vmatpush1.bf16.msra.mxu0 %v2247_v1  ;;  %2230 = vmatpush1.bf16.msra.mxu1 %v2247_v1  ;;  %v2250_v4 = vld [vmem:[%s3737_s1 + $0x18] sm:$0xff]   ;;  %v2251_v5 = vld [vmem:[%s3737_s1 + $0x20] sm:$0xff]   ;;  %v2252_v7 = vld [vmem:[%s3737_s1 + $0x28] sm:$0xff]  }
   0x3   :  { %873 = vmatprep.subr.bf16.mxu0 %v2522_v0  ;;  %2215 = vmatprep.subr.bf16.mxu1 %v2522_v0  ;;  %v2265_v6 = vld [vmem:[%s3738_s0 + $0x4] ss:$12 sps:$4 sm:$0xff]   ;;  %v2254_v10 = vld [vmem:[%s3737_s1 + $0x38] sm:$0xff]   ;;  %v2256_v12 = vld [vmem:[%s3737_s1 + $0x48] sm:$0xff]  }
   0x4   :  { %v2268_v8 = vld [vmem:[%s3738_s0 + $0x244] ss:$12 sps:$4 sm:$0xff]   ;;  %903 = vmatprep.mubr.bf16.mxu0 %v2265_v6  ;;  %v2258_v14 = vld [vmem:[%s3737_s1 + $0x58] sm:$0xff]   ;;  %v2260_v16 = vld [vmem:[%s3737_s1 + $0x68] sm:$0xff]  }
   0x5   :  { %1095 = vmatprep.mubr.bf16.mxu1 %v2268_v8  ;;  %v2253_v9 = vld [vmem:[%s3737_s1 + $0x30] sm:$0xff]   ;;  %v2255_v11 = vld [vmem:[%s3737_s1 + $0x40] sm:$0xff]   ;;  %v2262_v18 = vld [vmem:[%s3737_s1 + $0x78] sm:$0xff]  }
   0x6   :  { %874 = vmatpush1.bf16.msra.mxu0 %v2248_v2  ;;  %2231 = vmatpush1.bf16.msra.mxu1 %v2248_v2  ;;  %v2257_v13 = vld [vmem:[%s3737_s1 + $0x50] sm:$0xff]   ;;  %v2259_v15 = vld [vmem:[%s3737_s1 + $0x60] sm:$0xff]   ;;  %v2270_v22 = vld [vmem:[%s3738_s0 + $0x1c] ss:$12 sps:$4 sm:$0xff]  }
   0x7   :  { %875 = vmatprep.subr.bf16.mxu0 %v2522_v0  ;;  %2216 = vmatprep.subr.bf16.mxu1 %v2522_v0  ;;  %v2261_v17 = vld [vmem:[%s3737_s1 + $0x70] sm:$0xff]   ;;  %v2269_v19 = vld [vmem:[%s3737_s1 + $0x80] sm:$0xff]   ;;  %v2272_v23 = vld [vmem:[%s3738_s0 + $0x25c] ss:$12 sps:$4 sm:$0xff]  }
   0x8   :  { %v2263_v20 = vld [vmem:[%s3738_s0] ss:$12 sps:$4 sm:$0xff]   ;;  %v2274_v25 = vld [vmem:[%s3738_s0 + $0x18] ss:$12 sps:$4 sm:$0xff]   ;;  %v2280_v29 = vld [vmem:[%s3738_s0 + $0x30] ss:$12 sps:$4 sm:$0xff]  }
   0x9   :  { %v2266_v21 = vld [vmem:[%s3738_s0 + $0x240] ss:$12 sps:$4 sm:$0xff]   ;;  %v2275_v26 = vld [vmem:[%s3738_s0 + $0x258] ss:$12 sps:$4 sm:$0xff]   ;;  %v2281_v30 = vld [vmem:[%s3738_s0 + $0x270] ss:$12 sps:$4 sm:$0xff]  }
   0xa   :  { %876 = vmatpush1.bf16.msra.mxu0 %v2249_v3  ;;  %2232 = vmatpush1.bf16.msra.mxu1 %v2249_v3  ;;  %v2294_v24 = vld [vmem:[%s3737_s1 + $0x88] sm:$0xff]   ;;  %v2276_v27 = vld [vmem:[%s3738_s0 + $0x34] ss:$12 sps:$4 sm:$0xff]   ;;  %v2288_v35 = vld [vmem:[%s3738_s0 + $0x64] ss:$12 sps:$4 sm:$0xff]  }
   0xb   :  { %877 = vmatprep.subr.bf16.mxu0 %v2522_v0  ;;  %2217 = vmatprep.subr.bf16.mxu1 %v2522_v0  ;;  %v2278_v28 = vld [vmem:[%s3738_s0 + $0x274] ss:$12 sps:$4 sm:$0xff]   ;;  %v2282_v31 = vld [vmem:[%s3738_s0 + $0x4c] ss:$12 sps:$4 sm:$0xff]   ;;  %v2290_v36 = vld [vmem:[%s3738_s0 + $0x2a4] ss:$12 sps:$4 sm:$0xff]  }
   0xc   :  { %v2284_v32 = vld [vmem:[%s3738_s0 + $0x28c] ss:$12 sps:$4 sm:$0xff]   ;;  %v2286_v33 = vld [vmem:[%s3738_s0 + $0x48] ss:$12 sps:$4 sm:$0xff]   ;;  %v2305_v45 = vld [vmem:[%s3738_s0 + $0x90] ss:$12 sps:$4 sm:$0xff]  }
   0xd   :  { %v2287_v34 = vld [vmem:[%s3738_s0 + $0x288] ss:$12 sps:$4 sm:$0xff]   ;;  %v2292_v37 = vld [vmem:[%s3738_s0 + $0x60] ss:$12 sps:$4 sm:$0xff]   ;;  %v2299_v41 = vld [vmem:[%s3738_s0 + $0x78] ss:$12 sps:$4 sm:$0xff]  }
   0xe   :  { %878 = vmatpush1.bf16.msra.mxu0 %v2250_v4  ;;  %2233 = vmatpush1.bf16.msra.mxu1 %v2250_v4  ;;  %v2293_v38 = vld [vmem:[%s3738_s0 + $0x2a0] ss:$12 sps:$4 sm:$0xff]   ;;  %v2295_v39 = vld [vmem:[%s3738_s0 + $0x7c] ss:$12 sps:$4 sm:$0xff]   ;;  %v2300_v42 = vld [vmem:[%s3738_s0 + $0x2b8] ss:$12 sps:$4 sm:$0xff]  }
   0xf   :  { %879 = vmatprep.subr.bf16.mxu0 %v2522_v0  ;;  %2218 = vmatprep.subr.bf16.mxu1 %v2522_v0  ;;  %v2297_v40 = vld [vmem:[%s3738_s0 + $0x2bc] ss:$12 sps:$4 sm:$0xff]   ;;  %v2301_v43 = vld [vmem:[%s3738_s0 + $0x94] ss:$12 sps:$4 sm:$0xff]   ;;  %v2307_v47 = vld [vmem:[%s3738_s0 + $0xac] ss:$12 sps:$4 sm:$0xff]  }
  0x10   :  { %v2303_v44 = vld [vmem:[%s3738_s0 + $0x2d4] ss:$12 sps:$4 sm:$0xff]   ;;  %v2306_v46 = vld [vmem:[%s3738_s0 + $0x2d0] ss:$12 sps:$4 sm:$0xff]   ;;  %v2309_v48 = vld [vmem:[%s3738_s0 + $0x2ec] ss:$12 sps:$4 sm:$0xff]  }
  0x11   :  { %v2311_v49 = vld [vmem:[%s3738_s0 + $0xa8] ss:$12 sps:$4 sm:$0xff]   ;;  %v2313_v51 = vld [vmem:[%s3738_s0 + $0xc4] ss:$12 sps:$4 sm:$0xff]   ;;  %v2316_v53 = vld [vmem:[%s3738_s0 + $0xc0] ss:$12 sps:$4 sm:$0xff]  }
  0x12   :  { %880 = vmatpush1.bf16.msra.mxu0 %v2251_v5  ;;  %2234 = vmatpush1.bf16.msra.mxu1 %v2251_v5  ;;  %v2312_v50 = vld [vmem:[%s3738_s0 + $0x2e8] ss:$12 sps:$4 sm:$0xff]   ;;  %v2317_v54 = vld [vmem:[%s3738_s0 + $0x20] ss:$12 sps:$4 sm:$0xff]   ;;  %v2320_v56 = vld [vmem:[%s3738_s0 + $0x38] ss:$12 sps:$4 sm:$0xff]  }
  0x13   :  { %881 = vmatprep.subr.bf16.mxu0 %v2522_v0  ;;  %2219 = vmatprep.subr.bf16.mxu1 %v2522_v0  ;;  %v2315_v52 = vld [vmem:[%s3738_s0 + $0x8] ss:$12 sps:$4 sm:$0xff]   ;;  %v2321_v57 = vld [vmem:[%s3738_s0 + $0xd8] ss:$12 sps:$4 sm:$0xff]   ;;  %v2322_v58 = vld [vmem:[%s3738_s0 + $0x50] ss:$12 sps:$4 sm:$0xff]  }
  0x14   :  { %v2318_v55 = vld [vmem:[%s3738_s0 + $0xdc] ss:$12 sps:$4 sm:$0xff]   ;;  %v2323_v59 = vld [vmem:[%s3738_s0 + $0xf4] ss:$12 sps:$4 sm:$0xff]   ;;  %v2328_v63 = vld [vmem:[%s3738_s0 + $0x10c] ss:$12 sps:$4 sm:$0xff]  }
  0x15   :  { %v2325_v60 = vld [vmem:[%s3738_s0 + $0x68] ss:$12 sps:$4 sm:$0xff]   ;;  %v2326_v61 = vld [vmem:[%s3738_s0 + $0xf0] ss:$12 sps:$4 sm:$0xff]   ;;  %v2327_v62 = vld [vmem:[%s3738_s0 + $0x80] ss:$12 sps:$4 sm:$0xff]  }
  0x16   :  { %882 = vmatpush1.bf16.msra.mxu0 %v2252_v7  ;;  %2235 = vmatpush1.bf16.msra.mxu1 %v2252_v7  ;;  %v2331_v1 = vld [vmem:[%s3738_s0 + $0x108] ss:$12 sps:$4 sm:$0xff]   ;;  %v2332_v2 = vld [vmem:[%s3738_s0 + $0xb0] ss:$12 sps:$4 sm:$0xff]   ;;  %v2336_v5 = vld [vmem:[%s3738_s0 + $0x120] ss:$12 sps:$4 sm:$0xff]  }
  0x17   :  { %883 = vmatprep.subr.bf16.mxu0 %v2522_v0  ;;  %2220 = vmatprep.subr.bf16.mxu1 %v2522_v0  ;;  %v2333_v3 = vld [vmem:[%s3738_s0 + $0x124] ss:$12 sps:$4 sm:$0xff]   ;;  %v2335_v4 = vld [vmem:[%s3738_s0 + $0xc8] ss:$12 sps:$4 sm:$0xff]   ;;  %v2337_v6 = vld [vmem:[%s3738_s0 + $0xe0] ss:$12 sps:$4 sm:$0xff]  }
  0x18   :  { %v2338_v7 = vld [vmem:[%s3738_s0 + $0x13c] ss:$12 sps:$4 sm:$0xff]   ;;  %v2340_v8 = vld [vmem:[%s3738_s0 + $0xf8] ss:$12 sps:$4 sm:$0xff]  }
  0x1a   :  { %884 = vmatpush1.bf16.msra.mxu0 %v2253_v9  ;;  %2236 = vmatpush1.bf16.msra.mxu1 %v2253_v9  ;;  %v2341_v9 = vld [vmem:[%s3738_s0 + $0x138] ss:$12 sps:$4 sm:$0xff]  }
  0x1b   :  { %885 = vmatprep.subr.bf16.mxu0 %v2522_v0  ;;  %2221 = vmatprep.subr.bf16.mxu1 %v2522_v0 }
  0x1e   :  { %886 = vmatpush1.bf16.msra.mxu0 %v2254_v10  ;;  %2237 = vmatpush1.bf16.msra.mxu1 %v2254_v10  ;;  %v2342_v10 = vld [vmem:[%s3738_s0 + $0x110] ss:$12 sps:$4 sm:$0xff]  }
  0x1f   :  { %887 = vmatprep.subr.bf16.mxu0 %v2522_v0  ;;  %2222 = vmatprep.subr.bf16.mxu1 %v2522_v0 }
  0x22   :  { %888 = vmatpush1.bf16.msra.mxu0 %v2255_v11  ;;  %2238 = vmatpush1.bf16.msra.mxu1 %v2255_v11  ;;  %v2343_v11 = vld [vmem:[%s3738_s0 + $0x154] ss:$12 sps:$4 sm:$0xff]  }
  0x23   :  { %889 = vmatprep.subr.bf16.mxu0 %v2522_v0  ;;  %2223 = vmatprep.subr.bf16.mxu1 %v2522_v0 }
  0x26   :  { %890 = vmatpush1.bf16.msra.mxu0 %v2256_v12  ;;  %2239 = vmatpush1.bf16.msra.mxu1 %v2256_v12  ;;  %v2345_v12 = vld [vmem:[%s3738_s0 + $0x128] ss:$12 sps:$4 sm:$0xff]  }
  0x27   :  { %891 = vmatprep.subr.bf16.mxu0 %v2522_v0  ;;  %2224 = vmatprep.subr.bf16.mxu1 %v2522_v0 }
  0x2a   :  { %892 = vmatpush1.bf16.msra.mxu0 %v2257_v13  ;;  %2240 = vmatpush1.bf16.msra.mxu1 %v2257_v13  ;;  %v2346_v13 = vld [vmem:[%s3738_s0 + $0x150] ss:$12 sps:$4 sm:$0xff]  }
  0x2b   :  { %893 = vmatprep.subr.bf16.mxu0 %v2522_v0  ;;  %2225 = vmatprep.subr.bf16.mxu1 %v2522_v0 }
  0x2e   :  { %894 = vmatpush1.bf16.msra.mxu0 %v2258_v14  ;;  %2241 = vmatpush1.bf16.msra.mxu1 %v2258_v14  ;;  %v2347_v14 = vld [vmem:[%s3738_s0 + $0x140] ss:$12 sps:$4 sm:$0xff]  }
  0x2f   :  { %895 = vmatprep.subr.bf16.mxu0 %v2522_v0  ;;  %2226 = vmatprep.subr.bf16.mxu1 %v2522_v0 }
  0x32   :  { %896 = vmatpush1.bf16.msra.mxu0 %v2259_v15  ;;  %2242 = vmatpush1.bf16.msra.mxu1 %v2259_v15  ;;  %v2348_v15 = vld [vmem:[%s3738_s0 + $0x16c] ss:$12 sps:$4 sm:$0xff]  }
  0x33   :  { %897 = vmatprep.subr.bf16.mxu0 %v2522_v0  ;;  %2227 = vmatprep.subr.bf16.mxu1 %v2522_v0 }
  0x36   :  { %898 = vmatpush1.bf16.msra.mxu0 %v2260_v16  ;;  %2243 = vmatpush1.bf16.msra.mxu1 %v2260_v16  ;;  %v2350_v16 = vld [vmem:[%s3738_s0 + $0x158] ss:$12 sps:$4 sm:$0xff]  }
  0x37   :  { %899 = vmatprep.subr.bf16.mxu0 %v2522_v0  ;;  %2228 = vmatprep.subr.bf16.mxu1 %v2522_v0 }
  0x3a   :  { %900 = vmatpush1.bf16.msra.mxu0 %v2261_v17  ;;  %2244 = vmatpush1.bf16.msra.mxu1 %v2261_v17  ;;  %v2351_v17 = vld [vmem:[%s3738_s0 + $0x168] ss:$12 sps:$4 sm:$0xff]  }
  0x3b   :  { %901 = vmatprep.subr.bf16.mxu0 %v2522_v0  ;;  %2229 = vmatprep.subr.bf16.mxu1 %v2522_v0  ;;  %v2330_v0 = vld [vmem:[%s3738_s0 + $0x98] ss:$12 sps:$4 sm:$0xff]  }
  0x3e   :  { %902 = vmatpush1.bf16.msra.mxu0 %v2262_v18  ;;  %2245 = vmatpush1.bf16.msra.mxu1 %v2262_v18  ;;  %v2352_v18 = vld [vmem:[%s3738_s0 + $0x170] ss:$12 sps:$4 sm:$0xff]  }
  0x3f   :  { %2146 = vmatprep.subr.bf16.mxu1 %v2269_v19 }
  0x41   :  { %904 = vmatmul.mubr.bf16.vlgmr.msra.gmra.mrb[0].mxu0 %v2263_v20  ;;  %1096 = vmatmul.mubr.bf16.vlgmr.msra.gmra.mrb[0].mxu1 %v2266_v21  ;;  %v2355_v20 = vld [vmem:[%s3738_s0 + $0x188] ss:$12 sps:$4 sm:$0xff]   ;;  %v2356_v21 = vld [vmem:[%s3738_s0 + $0x180] ss:$12 sps:$4 sm:$0xff]  }
  0x42   :  { %2147 = vmatpush3.bf16.msra.mxu1 %v2269_v19  ;;  %911 = vmatprep.mubr.bf16.mxu0 %v2270_v22  ;;  %v2353_v19 = vld [vmem:[%s3738_s0 + $0x184] ss:$12 sps:$4 sm:$0xff]   ;;  %v2357_v22 = vld [vmem:[%s3738_s0 + $0x1a0] ss:$12 sps:$4 sm:$0xff]  }
  0x43   :  { %1103 = vmatprep.mubr.bf16.mxu1 %v2272_v23  ;;  %2148 = vmatprep.subr.bf16.mxu1 %v2294_v24  ;;  %v2358_v23 = vld [vmem:[%s3738_s0 + $0x19c] ss:$12 sps:$4 sm:$0xff]  }
  0x46   :  { %2149 = vmatpush3.bf16.msra.mxu1 %v2294_v24  ;;  %v2360_v24 = vld [vmem:[%s3738_s0 + $0x1b8] ss:$12 sps:$4 sm:$0xff]  }
  0x49   :  { %912 = vmatmul.mubr.bf16.gmra.mrb[4].mxu0 %v2274_v25  ;;  %1104 = vmatmul.mubr.bf16.gmra.mrb[4].mxu1 %v2275_v26  ;;  %v2361_v25 = vld [vmem:[%s3738_s0 + $0x198] ss:$12 sps:$4 sm:$0xff]   ;;  %v2362_v26 = vld [vmem:[%s3738_s0 + $0x1d0] ss:$12 sps:$4 sm:$0xff]  }
  0x4a   :  { %919 = vmatprep.mubr.bf16.mxu0 %v2276_v27  ;;  %1111 = vmatprep.mubr.bf16.mxu1 %v2278_v28  ;;  %v2363_v27 = vld [vmem:[%s3738_s0 + $0x1b4] ss:$12 sps:$4 sm:$0xff]  }
  0x4b   :  { %v2365_v28 = vld [vmem:[%s3738_s0 + $0x1e8] ss:$12 sps:$4 sm:$0xff]  }
  0x51   :  { %920 = vmatmul.mubr.bf16.gmra.mrb[8].mxu0 %v2280_v29  ;;  %1112 = vmatmul.mubr.bf16.gmra.mrb[8].mxu1 %v2281_v30  ;;  %v2366_v29 = vld [vmem:[%s3738_s0 + $0x1b0] ss:$12 sps:$4 sm:$0xff]   ;;  %v2367_v30 = vld [vmem:[%s3738_s0 + $0x200] ss:$12 sps:$4 sm:$0xff]  }
  0x52   :  { %927 = vmatprep.mubr.bf16.mxu0 %v2282_v31  ;;  %1119 = vmatprep.mubr.bf16.mxu1 %v2284_v32  ;;  %v2368_v31 = vld [vmem:[%s3738_s0 + $0x1cc] ss:$12 sps:$4 sm:$0xff]  }
  0x53   :  { %v2370_v32 = vld [vmem:[%s3738_s0 + $0x218] ss:$12 sps:$4 sm:$0xff]  }
  0x59   :  { %928 = vmatmul.mubr.bf16.gmra.mrb[12].mxu0 %v2286_v33  ;;  %1120 = vmatmul.mubr.bf16.gmra.mrb[12].mxu1 %v2287_v34  ;;  %v2371_v33 = vld [vmem:[%s3738_s0 + $0x1c8] ss:$12 sps:$4 sm:$0xff]   ;;  %v2372_v34 = vld [vmem:[%s3738_s0 + $0x230] ss:$12 sps:$4 sm:$0xff]  }
  0x5a   :  { %935 = vmatprep.mubr.bf16.mxu0 %v2288_v35  ;;  %1127 = vmatprep.mubr.bf16.mxu1 %v2290_v36  ;;  %v2373_v35 = vld [vmem:[%s3738_s0 + $0x1e4] ss:$12 sps:$4 sm:$0xff]   ;;  %v2375_v36 = vld [vmem:[%s3738_s0 + $0x248] ss:$12 sps:$4 sm:$0xff]  }
  0x61   :  { %936 = vmatmul.mubr.bf16.gmra.mrb[16].mxu0 %v2292_v37  ;;  %1128 = vmatmul.mubr.bf16.gmra.mrb[16].mxu1 %v2293_v38  ;;  %v2376_v37 = vld [vmem:[%s3738_s0 + $0x1e0] ss:$12 sps:$4 sm:$0xff]  }
  0x62   :  { %943 = vmatprep.mubr.bf16.mxu0 %v2295_v39  ;;  %1135 = vmatprep.mubr.bf16.mxu1 %v2297_v40  ;;  %v2377_v38 = vld [vmem:[%s3738_s0 + $0x260] ss:$12 sps:$4 sm:$0xff]   ;;  %v2378_v39 = vld [vmem:[%s3738_s0 + $0x1fc] ss:$12 sps:$4 sm:$0xff]   ;;  %v2380_v40 = vld [vmem:[%s3738_s0 + $0x278] ss:$12 sps:$4 sm:$0xff]  }
  0x69   :  { %944 = vmatmul.mubr.bf16.gmra.mrb[20].mxu0 %v2299_v41  ;;  %1136 = vmatmul.mubr.bf16.gmra.mrb[20].mxu1 %v2300_v42  ;;  %v2381_v41 = vld [vmem:[%s3738_s0 + $0x1f8] ss:$12 sps:$4 sm:$0xff]   ;;  %v2382_v42 = vld [vmem:[%s3738_s0 + $0x290] ss:$12 sps:$4 sm:$0xff]  }
  0x6a   :  { %951 = vmatprep.mubr.bf16.mxu0 %v2301_v43  ;;  %1143 = vmatprep.mubr.bf16.mxu1 %v2303_v44  ;;  %v2383_v43 = vld [vmem:[%s3738_s0 + $0x214] ss:$12 sps:$4 sm:$0xff]  }
  0x6b   :  { %v2385_v44 = vld [vmem:[%s3738_s0 + $0x2a8] ss:$12 sps:$4 sm:$0xff]  }
  0x71   :  { %952 = vmatmul.mubr.bf16.gmra.mrb[24].mxu0 %v2305_v45  ;;  %1144 = vmatmul.mubr.bf16.gmra.mrb[24].mxu1 %v2306_v46  ;;  %v2386_v45 = vld [vmem:[%s3738_s0 + $0x210] ss:$12 sps:$4 sm:$0xff]   ;;  %v2387_v46 = vld [vmem:[%s3738_s0 + $0x2c0] ss:$12 sps:$4 sm:$0xff]  }
  0x72   :  { %959 = vmatprep.mubr.bf16.mxu0 %v2307_v47  ;;  %1151 = vmatprep.mubr.bf16.mxu1 %v2309_v48  ;;  %v2388_v47 = vld [vmem:[%s3738_s0 + $0x22c] ss:$12 sps:$4 sm:$0xff]  }
  0x73   :  { %v2390_v48 = vld [vmem:[%s3738_s0 + $0x2d8] ss:$12 sps:$4 sm:$0xff]  }
  0x79   :  { %960 = vmatmul.mubr.bf16.gmra.mrb[28].mxu0 %v2311_v49  ;;  %1152 = vmatmul.mubr.bf16.gmra.mrb[28].mxu1 %v2312_v50  ;;  %v2391_v49 = vld [vmem:[%s3738_s0 + $0x228] ss:$12 sps:$4 sm:$0xff]   ;;  %v2392_v50 = vld [vmem:[%s3738_s0 + $0x2f0] ss:$12 sps:$4 sm:$0xff]  }
  0x7a   :  { %967 = vmatprep.mubr.bf16.mxu0 %v2313_v51  ;;  %2150 = vmatprep.mubr.msk.bf16.mxu1 %vm774_vm0, %v2315_v52 }
  0x81   :  { %968 = vmatmul.mubr.bf16.gmra.mrb[32].mxu0 %v2316_v53  ;;  %2151 = vmatmul.mubr.msk.bf16.vlgmr.msra.gmra.mrb[32].mxu1 %vm774_vm0, %v2317_v54 }
  0x82   :  { %975 = vmatprep.mubr.bf16.mxu0 %v2318_v55  ;;  %2154 = vmatprep.mubr.msk.bf16.mxu1 %vm774_vm0, %v2320_v56 }
  0x89   :  { %976 = vmatmul.mubr.bf16.gmra.mrb[36].mxu0 %v2321_v57  ;;  %2155 = vmatmul.mubr.msk.bf16.gmra.mrb[36].mxu1 %vm774_vm0, %v2322_v58 }
  0x8a   :  { %983 = vmatprep.mubr.bf16.mxu0 %v2323_v59  ;;  %2158 = vmatprep.mubr.msk.bf16.mxu1 %vm774_vm0, %v2325_v60 }
  0x91   :  { %984 = vmatmul.mubr.bf16.gmra.mrb[40].mxu0 %v2326_v61  ;;  %2159 = vmatmul.mubr.msk.bf16.gmra.mrb[40].mxu1 %vm774_vm0, %v2327_v62 }
  0x92   :  { %991 = vmatprep.mubr.bf16.mxu0 %v2328_v63  ;;  %2162 = vmatprep.mubr.msk.bf16.mxu1 %vm774_vm0, %v2330_v0 }
  0x99   :  { %992 = vmatmul.mubr.bf16.gmra.mrb[44].mxu0 %v2331_v1  ;;  %2163 = vmatmul.mubr.msk.bf16.gmra.mrb[44].mxu1 %vm774_vm0, %v2332_v2 }
  0x9a   :  { %999 = vmatprep.mubr.bf16.mxu0 %v2333_v3  ;;  %2166 = vmatprep.mubr.msk.bf16.mxu1 %vm774_vm0, %v2335_v4 }
  0xa1   :  { %1000 = vmatmul.mubr.bf16.gmra.mrb[48].mxu0 %v2336_v5  ;;  %2167 = vmatmul.mubr.msk.bf16.gmra.mrb[48].mxu1 %vm774_vm0, %v2337_v6 }
  0xa2   :  { %1007 = vmatprep.mubr.bf16.mxu0 %v2338_v7  ;;  %2170 = vmatprep.mubr.msk.bf16.mxu1 %vm774_vm0, %v2340_v8 }
  0xa9   :  { %1008 = vmatmul.mubr.bf16.gmra.mrb[52].mxu0 %v2341_v9  ;;  %2171 = vmatmul.mubr.msk.bf16.gmra.mrb[52].mxu1 %vm774_vm0, %v2342_v10 }
  0xaa   :  { %1015 = vmatprep.mubr.bf16.mxu0 %v2343_v11  ;;  %2174 = vmatprep.mubr.msk.bf16.mxu1 %vm774_vm0, %v2345_v12 }
  0xb1   :  { %1016 = vmatmul.mubr.bf16.gmra.mrb[56].mxu0 %v2346_v13  ;;  %2175 = vmatmul.mubr.msk.bf16.gmra.mrb[56].mxu1 %vm774_vm0, %v2347_v14 }
  0xb2   :  { %1023 = vmatprep.mubr.bf16.mxu0 %v2348_v15  ;;  %2178 = vmatprep.mubr.msk.bf16.mxu1 %vm774_vm0, %v2350_v16 }
  0xb9   :  { %1024 = vmatmul.mubr.bf16.gmra.mrb[60].mxu0 %v2351_v17  ;;  %2179 = vmatmul.mubr.msk.bf16.gmra.mrb[60].mxu1 %vm774_vm0, %v2352_v18 }
  0xba   :  { %1031 = vmatprep.mubr.bf16.mxu0 %v2353_v19  ;;  %2182 = vmatprep.mubr.msk.bf16.mxu1 %vm774_vm0, %v2355_v20 }
  0xc1   :  { %1032 = vmatmul.mubr.bf16.gmra.mrb[64].mxu0 %v2356_v21  ;;  %2183 = vmatmul.mubr.msk.bf16.gmra.mrb[64].mxu1 %vm774_vm0, %v2357_v22 }
  0xc2   :  { %1039 = vmatprep.mubr.bf16.mxu0 %v2358_v23  ;;  %2186 = vmatprep.mubr.msk.bf16.mxu1 %vm774_vm0, %v2360_v24 }
  0xc9   :  { %1040 = vmatmul.mubr.bf16.gmra.mrb[68].mxu0 %v2361_v25  ;;  %2187 = vmatmul.mubr.msk.bf16.gmra.mrb[68].mxu1 %vm774_vm0, %v2362_v26 }
  0xca   :  { %1047 = vmatprep.mubr.bf16.mxu0 %v2363_v27  ;;  %2190 = vmatprep.mubr.msk.bf16.mxu1 %vm774_vm0, %v2365_v28 }
  0xd1   :  { %1048 = vmatmul.mubr.bf16.gmra.mrb[72].mxu0 %v2366_v29  ;;  %2191 = vmatmul.mubr.msk.bf16.gmra.mrb[72].mxu1 %vm774_vm0, %v2367_v30 }
  0xd2   :  { %1055 = vmatprep.mubr.bf16.mxu0 %v2368_v31  ;;  %2194 = vmatprep.mubr.msk.bf16.mxu1 %vm774_vm0, %v2370_v32 }
  0xd9   :  { %1056 = vmatmul.mubr.bf16.gmra.mrb[76].mxu0 %v2371_v33  ;;  %2195 = vmatmul.mubr.msk.bf16.gmra.mrb[76].mxu1 %vm774_vm0, %v2372_v34 }
  0xda   :  { %1063 = vmatprep.mubr.bf16.mxu0 %v2373_v35  ;;  %2198 = vmatprep.mubr.msk.bf16.mxu1 %vm774_vm0, %v2375_v36 }
  0xe1   :  { %1064 = vmatmul.mubr.bf16.gmra.mrb[80].mxu0 %v2376_v37  ;;  %2199 = vmatmul.mubr.msk.bf16.gmra.mrb[80].mxu1 %vm774_vm0, %v2377_v38 }
  0xe2   :  { %1071 = vmatprep.mubr.bf16.mxu0 %v2378_v39  ;;  %2202 = vmatprep.mubr.msk.bf16.mxu1 %vm774_vm0, %v2380_v40 }
  0xe9   :  { %1072 = vmatmul.mubr.bf16.gmra.mrb[84].mxu0 %v2381_v41  ;;  %2203 = vmatmul.mubr.msk.bf16.gmra.mrb[84].mxu1 %vm774_vm0, %v2382_v42 }
  0xea   :  { %1079 = vmatprep.mubr.bf16.mxu0 %v2383_v43  ;;  %2206 = vmatprep.mubr.msk.bf16.mxu1 %vm774_vm0, %v2385_v44 }
  0xf1   :  { %1080 = vmatmul.mubr.bf16.gmra.mrb[88].mxu0 %v2386_v45  ;;  %2207 = vmatmul.mubr.msk.bf16.gmra.mrb[88].mxu1 %vm774_vm0, %v2387_v46 }
  0xf2   :  { %1087 = vmatprep.mubr.bf16.mxu0 %v2388_v47  ;;  %2210 = vmatprep.mubr.msk.bf16.mxu1 %vm774_vm0, %v2390_v48 }
  0xf9   :  { %1088 = vmatmul.mubr.bf16.gmra.mrb[92].mxu0 %v2391_v49  ;;  %2211 = vmatmul.mubr.msk.bf16.gmra.mrb[92].mxu1 %vm774_vm0, %v2392_v50 }
 0x114   :  { %v2949_v51 = vpop.f32.mrb[0].mxu0  ;;  %v2951_v52 = vpop.f32.mrb[0].mxu1 }
 0x115   :  { %v907_v53 = vpop.f32.mrb[1].mxu0  ;;  %v1099_v54 = vpop.f32.mrb[1].mxu1 }
 0x116   :  { %v2953_v55 = vpop.f32.mrb[2].mxu0  ;;  %v2955_v56 = vpop.f32.mrb[2].mxu1  ;;  %v3012_v53 = vld [vmem:[%s3739_s2] ss:$0 sm:$0xff] }
 0x117   :  { %v910_v57 = vpop.f32.mrb[3].mxu0  ;;  %v1102_v58 = vpop.f32.mrb[3].mxu1 }
 0x118   :  { %v906_v57 = vadd.f32 %v3012_v53, %v2949_v51 }
 0x11c   :  { %v913_v59 = vpop.f32.mrb[4].mxu0  ;;  %v2957_v60 = vpop.f32.mrb[4].mxu1 }
 0x11d   :  { %v915_v61 = vpop.f32.mrb[5].mxu0  ;;  %v1107_v62 = vpop.f32.mrb[5].mxu1  ;;  %v914_v54 = vadd.f32 %v3012_v53, %v913_v59 }
 0x11e   :  { %v916_v63 = vpop.f32.mrb[6].mxu0  ;;  %v2959_v0 = vpop.f32.mrb[6].mxu1 }
 0x11f   :  { %v918_v1 = vpop.f32.mrb[7].mxu0  ;;  %v1110_v2 = vpop.f32.mrb[7].mxu1  ;;  %v917_v62 = vadd.f32 %v3012_v53, %v916_v63 }
 0x124   :  { %v2961_v3 = vpop.f32.mrb[8].mxu0  ;;  %v2963_v4 = vpop.f32.mrb[8].mxu1 }
 0x125   :  { %v923_v5 = vpop.f32.mrb[9].mxu0  ;;  %v1115_v6 = vpop.f32.mrb[9].mxu1 }
 0x126   :  { %v2965_v7 = vpop.f32.mrb[10].mxu0  ;;  %v2967_v8 = vpop.f32.mrb[10].mxu1  ;;  %v909_v6 = vadd.f32 %v3012_v53, %v2953_v55 }
 0x127   :  { %v926_v9 = vpop.f32.mrb[11].mxu0  ;;  %v1118_v10 = vpop.f32.mrb[11].mxu1 }
 0x12c   :  { %v2969_v11 = vpop.f32.mrb[12].mxu0  ;;  %v2971_v12 = vpop.f32.mrb[12].mxu1 }
 0x12d   :  { %v931_v13 = vpop.f32.mrb[13].mxu0  ;;  %v1123_v14 = vpop.f32.mrb[13].mxu1 }
 0x12e   :  { %v2973_v15 = vpop.f32.mrb[14].mxu0  ;;  %v2975_v16 = vpop.f32.mrb[14].mxu1 }
 0x12f   :  { %v934_v17 = vpop.f32.mrb[15].mxu0  ;;  %v1126_v18 = vpop.f32.mrb[15].mxu1 }
 0x134   :  { %v2977_v19 = vpop.f32.mrb[16].mxu0  ;;  %v2979_v20 = vpop.f32.mrb[16].mxu1 }
 0x135   :  { %v939_v21 = vpop.f32.mrb[17].mxu0  ;;  %v1131_v22 = vpop.f32.mrb[17].mxu1 }
 0x136   :  { %v2981_v23 = vpop.f32.mrb[18].mxu0  ;;  %v2983_v24 = vpop.f32.mrb[18].mxu1 }
 0x137   :  { %v942_v25 = vpop.f32.mrb[19].mxu0  ;;  %v1134_v26 = vpop.f32.mrb[19].mxu1 }
 0x138   :  { %v930_v26 = vadd.f32 %v3012_v53, %v2969_v11  ;;  %v925_v11 = vadd.f32 %v3012_v53, %v2965_v7 }
 0x13c   :  { %v2985_v27 = vpop.f32.mrb[20].mxu0  ;;  %v2987_v28 = vpop.f32.mrb[20].mxu1 }
 0x13d   :  { %v947_v29 = vpop.f32.mrb[21].mxu0  ;;  %v1139_v30 = vpop.f32.mrb[21].mxu1 }
 0x13e   :  { %v2989_v31 = vpop.f32.mrb[22].mxu0  ;;  %v2991_v32 = vpop.f32.mrb[22].mxu1  ;;  %v922_v30 = vadd.f32 %v3012_v53, %v2961_v3 }
 0x13f   :  { %v950_v33 = vpop.f32.mrb[23].mxu0  ;;  %v1142_v34 = vpop.f32.mrb[23].mxu1 }
 0x144   :  { %v2993_v35 = vpop.f32.mrb[24].mxu0  ;;  %v2995_v36 = vpop.f32.mrb[24].mxu1 }
 0x145   :  { %v955_v37 = vpop.f32.mrb[25].mxu0  ;;  %v1147_v38 = vpop.f32.mrb[25].mxu1 }
 0x146   :  { %v2997_v39 = vpop.f32.mrb[26].mxu0  ;;  %v2999_v40 = vpop.f32.mrb[26].mxu1  ;;  %v933_v38 = vadd.f32 %v3012_v53, %v2973_v15 }
 0x147   :  { %v958_v41 = vpop.f32.mrb[27].mxu0  ;;  %v1150_v42 = vpop.f32.mrb[27].mxu1 }
 0x14c   :  { %v3001_v43 = vpop.f32.mrb[28].mxu0  ;;  %v3003_v44 = vpop.f32.mrb[28].mxu1 }
 0x14d   :  { %v963_v45 = vpop.f32.mrb[29].mxu0  ;;  %v1155_v46 = vpop.f32.mrb[29].mxu1 }
 0x14e   :  { %v3005_v47 = vpop.f32.mrb[30].mxu0  ;;  %v3007_v48 = vpop.f32.mrb[30].mxu1 }
 0x14f   :  { %v966_v49 = vpop.f32.mrb[31].mxu0  ;;  %v1158_v50 = vpop.f32.mrb[31].mxu1 }
 0x154   :  { %v3017_v58 = vpop.f32.mrb[32].mxu0  ;;  %v2152_v61 = vpop.f32.mrb[32].mxu1 }
 0x155   :  { %v3020_v1 = vadd.f32 %v2152_v61, %v914_v54  ;;  %v971_v2 = vpop.f32.mrb[33].mxu0  ;;  %v1194_v5 = vpop.f32.mrb[33].mxu1 }
 0x156   :  { %v3024_v9 = vadd.f32 %v1194_v5, %v906_v57  ;;  %v3026_v10 = vpop.f32.mrb[34].mxu0  ;;  %v2153_v59 = vpop.f32.mrb[34].mxu1 }
 0x157   :  { %v1515_v13 = vmin.f32 %v3020_v1, 0.0  ;;  %v3029_v51 = vadd.f32 %v2153_v59, %v917_v62  ;;  %v974_v14 = vpop.f32.mrb[35].mxu0  ;;  %v1197_v17 = vpop.f32.mrb[35].mxu1  ;;  %v946_v59 = vadd.f32 %v3012_v53, %v2985_v27  ;;  %vm1451_vm1 = vcmp.gt.f32.partialorder %v3020_v1, 0.0 }
 0x158   :  { %v1513_v63 = vmin.f32 %v3024_v9, 0.0  ;;  %v3032_v18 = vadd.f32 %v1197_v17, %v909_v6  ;;  %v938_v14 = vadd.f32 %v3012_v53, %v2977_v19  ;;  %vm1449_vm2 = vcmp.gt.f32.partialorder %v3024_v9, 0.0 }
 0x159   :  { %v1581_v21 = vmul.f32 1.442695, %v1515_v13  ;;  %v1516_v22 = vmin.f32 %v3029_v51, 0.0  ;;  %vm1452_vm3 = vcmp.gt.f32.partialorder %v3029_v51, 0.0 }
 0x15a   :  { %v1577_v25 = vmul.f32 1.442695, %v1513_v63  ;;  %v1514_v55 = vmin.f32 %v3032_v18, 0.0  ;;  %vm1450_vm4 = vcmp.gt.f32.partialorder %v3032_v18, 0.0 }
 0x15b   :  { %2393 = vpow2.f32 %v1581_v21  ;;  %v1583_v29 = vmul.f32 1.442695, %v1516_v22 }
 0x15c   :  { %2395 = vpow2.f32 %v1577_v25  ;;  %v1579_v33 = vmul.f32 1.442695, %v1514_v55  ;;  %v3040_v34 = vpop.f32.mrb[36].mxu0  ;;  %v2156_v37 = vpop.f32.mrb[36].mxu1  ;;  %v941_v25 = vadd.f32 %v3012_v53, %v2981_v23 }
 0x15d   :  { %2397 = vpow2.f32 %v1583_v29  ;;  %v3044_v41 = vadd.f32 %v2156_v37, %v930_v26  ;;  %v979_v42 = vpop.f32.mrb[37].mxu0  ;;  %v1210_v45 = vpop.f32.mrb[37].mxu1 }
 0x15e   :  { %2399 = vpow2.f32 %v1579_v33  ;;  %v3048_v46 = vadd.f32 %v1210_v45, %v922_v30  ;;  %v3050_v3 = vpop.f32.mrb[38].mxu0  ;;  %v2157_v49 = vpop.f32.mrb[38].mxu1  ;;  %v949_v30 = vadd.f32 %v3012_v53, %v2989_v31 }
 0x15f   :  { %v1519_v50 = vmin.f32 %v3044_v41, 0.0  ;;  %v3053_v54 = vadd.f32 %v2157_v49, %v933_v38  ;;  %v982_v57 = vpop.f32.mrb[39].mxu0  ;;  %v1213_v15 = vpop.f32.mrb[39].mxu1  ;;  %vm1455_vm5 = vcmp.gt.f32.partialorder %v3044_v41, 0.0 }
 0x160   :  { %v1517_v61 = vmin.f32 %v3048_v46, 0.0  ;;  %v3056_v62 = vadd.f32 %v1213_v15, %v925_v11  ;;  %vm1453_vm6 = vcmp.gt.f32.partialorder %v3048_v46, 0.0 }
 0x161   :  { %v1589_v2 = vmul.f32 1.442695, %v1519_v50  ;;  %v1520_v5 = vmin.f32 %v3053_v54, 0.0  ;;  %vm1456_vm7 = vcmp.gt.f32.partialorder %v3053_v54, 0.0 }
 0x162   :  { %v1585_v7 = vmul.f32 1.442695, %v1517_v61  ;;  %v1518_v6 = vmin.f32 %v3056_v62, 0.0  ;;  %vm1454_vm8 = vcmp.gt.f32.partialorder %v3056_v62, 0.0 }
 0x163   :  { %2401 = vpow2.f32 %v1589_v2  ;;  %v1591_v13 = vmul.f32 1.442695, %v1520_v5 }
 0x164   :  { %2403 = vpow2.f32 %v1585_v7  ;;  %v1587_v17 = vmul.f32 1.442695, %v1518_v6  ;;  %v3064_v63 = vpop.f32.mrb[40].mxu0  ;;  %v2160_v21 = vpop.f32.mrb[40].mxu1 }
 0x165   :  { %v2394_v22 = vpop.eup %2393  ;;  %2405 = vpow2.f32 %v1591_v13  ;;  %v3068_v55 = vadd.f32 %v2160_v21, %v946_v59  ;;  %v987_v26 = vpop.f32.mrb[41].mxu0  ;;  %v962_v13 = vadd.f32 %v3012_v53, %v3001_v43 }
 0x166   :  { %v1226_v29 = vpop.f32.mrb[41].mxu1  ;;  %v2396_v27 = vpop.eup %2395  ;;  %v2050_v33 = vadd.f32 -1.0, %v2394_v22  ;;  %2407 = vpow2.f32 %v1587_v17 }
 0x167   :  { %v3072_v19 = vadd.f32 %v1226_v29, %v938_v14  ;;  %v3074_v37 = vpop.f32.mrb[42].mxu0  ;;  %v2161_v38 = vpop.f32.mrb[42].mxu1  ;;  %v2048_v23 = vadd.f32 -1.0, %v2396_v27  ;;  %v1523_v45 = vmin.f32 %v3068_v55, 0.0  ;;  %vm1459_vm9 = vcmp.gt.f32.partialorder %v3068_v55, 0.0 }
 0x168   :  { %v2398_v42 = vpop.eup %2397  ;;  %v990_v11 = vpop.f32.mrb[43].mxu0  ;;  %v1771_v31 = vsel %vm1451_vm1, %v3020_v1, %v2050_v33  ;;  %v3086_v7 = vadd.f32 %v2161_v38, %v949_v30 }
 0x169   :  { %v1229_v49 = vpop.f32.mrb[43].mxu1  ;;  %v2400_v50 = vpop.eup %2399  ;;  %v2051_v57 = vadd.f32 -1.0, %v2398_v42  ;;  %v1521_v15 = vmin.f32 %v3072_v19, 0.0  ;;  %1835 = vst [vmem:[%s3740_s3 + $0x10] sm:$0xff] %v1771_v31  ;;  %v1769_v61 = vsel %vm1449_vm2, %v3024_v9, %v2048_v23  ;;  %v1597_v5 = vmul.f32 1.442695, %v1523_v45 }
 0x16a   :  { %v2049_v2 = vadd.f32 -1.0, %v2400_v50  ;;  %1833 = vst [vmem:[%s3740_s3] sm:$0xff] %v1769_v61  ;;  %v3093_v59 = vadd.f32 %v1229_v49, %v941_v25  ;;  %v1524_v14 = vmin.f32 %v3086_v7, 0.0  ;;  %v965_v25 = vadd.f32 %v3012_v53, %v3005_v47 }
 0x16b   :  { %v1772_v1 = vsel %vm1452_vm3, %v3029_v51, %v2051_v57  ;;  %v1593_v6 = vmul.f32 1.442695, %v1521_v15  ;;  %2409 = vpow2.f32 %v1597_v5  ;;  %v954_v51 = vadd.f32 %v3012_v53, %v2993_v35 }
 0x16c   :  { %1836 = vst [vmem:[%s3740_s3 + $0x18] sm:$0xff] %v1772_v1  ;;  %v1770_v9 = vsel %vm1450_vm4, %v3032_v18, %v2049_v2  ;;  %v1522_v17 = vmin.f32 %v3093_v59, 0.0  ;;  %v3108_v43 = vpop.f32.mrb[44].mxu0  ;;  %v2164_v21 = vpop.f32.mrb[44].mxu1  ;;  %v957_v18 = vadd.f32 %v3012_v53, %v2997_v39  ;;  %v1599_v26 = vmul.f32 1.442695, %v1524_v14 }
 0x16d   :  { %1834 = vst [vmem:[%s3740_s3 + $0x8] sm:$0xff] %v1770_v9  ;;  %2411 = vpow2.f32 %v1593_v6  ;;  %v2402_v22 = vpop.eup %2401  ;;  %v3114_v29 = vadd.f32 %v2164_v21, %v962_v13  ;;  %v995_v35 = vpop.f32.mrb[45].mxu0  ;;  %v978_v9 = vadd.f32 %v3012_v53, %v3040_v34  ;;  %vm1457_vm10 = vcmp.gt.f32.partialorder %v3072_v19, 0.0 }
 0x16e   :  { %v1242_v27 = vpop.f32.mrb[45].mxu1  ;;  %v2404_v30 = vpop.eup %2403  ;;  %v2054_v33 = vadd.f32 -1.0, %v2402_v22  ;;  %v1595_v38 = vmul.f32 1.442695, %v1522_v17  ;;  %2413 = vpow2.f32 %v1599_v26  ;;  %vm1460_vm11 = vcmp.gt.f32.partialorder %v3086_v7, 0.0 }
 0x16f   :  { %v3117_v42 = vadd.f32 %v1242_v27, %v954_v51  ;;  %v3119_v23 = vpop.f32.mrb[46].mxu0  ;;  %v2165_v45 = vpop.f32.mrb[46].mxu1  ;;  %v2052_v39 = vadd.f32 -1.0, %v2404_v30  ;;  %v1527_v47 = vmin.f32 %v3114_v29, 0.0  ;;  %vm1458_vm12 = vcmp.gt.f32.partialorder %v3093_v59, 0.0 }
 0x170   :  { %v2406_v11 = vpop.eup %2405  ;;  %v998_v49 = vpop.f32.mrb[47].mxu0  ;;  %v1775_v57 = vsel %vm1455_vm5, %v3044_v41, %v2054_v33  ;;  %2415 = vpow2.f32 %v1595_v38  ;;  %v3135_v6 = vadd.f32 %v2165_v45, %v965_v25  ;;  %vm1463_vm13 = vcmp.gt.f32.partialorder %v3114_v29, 0.0 }
 0x171   :  { %v1245_v50 = vpop.f32.mrb[47].mxu1  ;;  %v2408_v31 = vpop.eup %2407  ;;  %v2055_v15 = vadd.f32 -1.0, %v2406_v11  ;;  %1839 = vst [vmem:[%s3740_s3 + $0x30] sm:$0xff] %v1775_v57  ;;  %v1773_v61 = vsel %vm1453_vm6, %v3048_v46, %v2052_v39  ;;  %v1605_v5 = vmul.f32 1.442695, %v1527_v47  ;;  %v1525_v1 = vmin.f32 %v3117_v42, 0.0 }
 0x172   :  { %v2053_v2 = vadd.f32 -1.0, %v2408_v31  ;;  %1837 = vst [vmem:[%s3740_s3 + $0x20] sm:$0xff] %v1773_v61  ;;  %v3137_v13 = vadd.f32 %v1245_v50, %v957_v18  ;;  %v1528_v51 = vmin.f32 %v3135_v6, 0.0  ;;  %v981_v18 = vadd.f32 %v3012_v53, %v3050_v3 }
 0x173   :  { %v1776_v41 = vsel %vm1456_vm7, %v3053_v54, %v2055_v15  ;;  %2417 = vpow2.f32 %v1605_v5  ;;  %v1601_v14 = vmul.f32 1.442695, %v1525_v1  ;;  %v970_v54 = vadd.f32 %v3012_v53, %v3017_v58 }
 0x174   :  { %1840 = vst [vmem:[%s3740_s3 + $0x38] sm:$0xff] %v1776_v41  ;;  %v1774_v46 = vsel %vm1454_vm8, %v3056_v62, %v2053_v2  ;;  %v1526_v17 = vmin.f32 %v3137_v13, 0.0  ;;  %v3152_v34 = vpop.f32.mrb[48].mxu0  ;;  %v2168_v21 = vpop.f32.mrb[48].mxu1  ;;  %v973_v62 = vadd.f32 %v3012_v53, %v3026_v10  ;;  %v1607_v30 = vmul.f32 1.442695, %v1528_v51 }
 0x175   :  { %1838 = vst [vmem:[%s3740_s3 + $0x28] sm:$0xff] %v1774_v46  ;;  %v2410_v22 = vpop.eup %2409  ;;  %2419 = vpow2.f32 %v1601_v14  ;;  %v3158_v58 = vadd.f32 %v2168_v21, %v978_v9  ;;  %v1003_v25 = vpop.f32.mrb[49].mxu0  ;;  %v986_v11 = vadd.f32 %v3012_v53, %v3064_v63  ;;  %v994_v9 = vadd.f32 %v3012_v53, %v3108_v43 }
 0x176   :  { %v1258_v26 = vpop.f32.mrb[49].mxu1  ;;  %v2058_v27 = vadd.f32 -1.0, %v2410_v22  ;;  %v1603_v33 = vmul.f32 1.442695, %v1526_v17  ;;  %v3162_v45 = vpop.f32.mrb[50].mxu0  ;;  %2421 = vpow2.f32 %v1607_v30  ;;  %vm1461_vm14 = vcmp.gt.f32.partialorder %v3117_v42, 0.0 }
 0x177   :  { %v2412_v35 = vpop.eup %2411  ;;  %v3160_v38 = vadd.f32 %v1258_v26, %v970_v54  ;;  %v1531_v3 = vmin.f32 %v3158_v58, 0.0  ;;  %v2169_v39 = vpop.f32.mrb[50].mxu1  ;;  %vm1464_vm15 = vcmp.gt.f32.partialorder %v3135_v6, 0.0  ;;  %vm1462_vm0 = vcmp.gt.f32.partialorder %v3137_v13, 0.0 }
 0x178   :  { %v2056_v10 = vadd.f32 -1.0, %v2412_v35  ;;  %v1006_v47 = vpop.f32.mrb[51].mxu0  ;;  %v1779_v49 = vsel %vm1459_vm9, %v3068_v55, %v2058_v27  ;;  %v1261_v31 = vpop.f32.mrb[51].mxu1  ;;  %2423 = vpow2.f32 %v1603_v33  ;;  %v3175_v61 = vadd.f32 %v2169_v39, %v981_v18 }
 0x179   :  { %v1529_v50 = vmin.f32 %v3160_v38, 0.0  ;;  %v2414_v57 = vpop.eup %2413  ;;  %1843 = vst [vmem:[%s3740_s3 + $0x50] sm:$0xff] %v1779_v49  ;;  %v1613_v15 = vmul.f32 1.442695, %v1531_v3  ;;  %v3181_v1 = vadd.f32 %v1261_v31, %v973_v62  ;;  %vm1467_vm1 = vcmp.gt.f32.partialorder %v3158_v58, 0.0 }
 0x17a   :  { %v1777_v63 = vsel %vm1457_vm10, %v3072_v19, %v2056_v10  ;;  %v2416_v2 = vpop.eup %2415  ;;  %v2059_v55 = vadd.f32 -1.0, %v2414_v57  ;;  %v1532_v19 = vmin.f32 %v3175_v61, 0.0  ;;  %vm1465_vm2 = vcmp.gt.f32.partialorder %v3160_v38, 0.0 }
 0x17b   :  { %1841 = vst [vmem:[%s3740_s3 + $0x40] sm:$0xff] %v1777_v63  ;;  %v1609_v5 = vmul.f32 1.442695, %v1529_v50  ;;  %v2057_v41 = vadd.f32 -1.0, %v2416_v2  ;;  %2425 = vpow2.f32 %v1613_v15  ;;  %v1530_v14 = vmin.f32 %v3181_v1, 0.0 }
 0x17c   :  { %v1780_v46 = vsel %vm1460_vm11, %v3086_v7, %v2059_v55  ;;  %v1009_v54 = vpop.f32.mrb[52].mxu0  ;;  %v2172_v51 = vpop.f32.mrb[52].mxu1  ;;  %v1615_v43 = vmul.f32 1.442695, %v1532_v19  ;;  %v989_v7 = vadd.f32 %v3012_v53, %v3074_v37  ;;  %vm1468_vm3 = vcmp.gt.f32.partialorder %v3175_v61, 0.0 }
 0x17d   :  { %2427 = vpow2.f32 %v1609_v5  ;;  %v2418_v17 = vpop.eup %2417  ;;  %1844 = vst [vmem:[%s3740_s3 + $0x58] sm:$0xff] %v1780_v46  ;;  %v1778_v21 = vsel %vm1458_vm12, %v3093_v59, %v2057_v41  ;;  %v3193_v22 = vadd.f32 %v2172_v51, %v994_v9  ;;  %v1011_v62 = vpop.f32.mrb[53].mxu0  ;;  %v1611_v26 = vmul.f32 1.442695, %v1530_v14 }
 0x17e   :  { %v1274_v18 = vpop.f32.mrb[53].mxu1  ;;  %1842 = vst [vmem:[%s3740_s3 + $0x48] sm:$0xff] %v1778_v21  ;;  %v2062_v25 = vadd.f32 -1.0, %v2418_v17  ;;  %v1012_v27 = vpop.f32.mrb[54].mxu0  ;;  %v997_v59 = vadd.f32 %v3012_v53, %v3119_v23  ;;  %2429 = vpow2.f32 %v1615_v43  ;;  %v1010_v15 = vadd.f32 %v3012_v53, %v1009_v54 }
 0x17f   :  { %v3200_v35 = vadd.f32 %v1274_v18, %v986_v11  ;;  %v2173_v30 = vpop.f32.mrb[54].mxu1  ;;  %v2420_v33 = vpop.eup %2419  ;;  %v1535_v10 = vmin.f32 %v3193_v22, 0.0  ;;  %2431 = vpow2.f32 %v1611_v26  ;;  %v1002_v5 = vadd.f32 %v3012_v53, %v3152_v34 }
 0x180   :  { %v1014_v37 = vpop.f32.mrb[55].mxu0  ;;  %v1277_v3 = vpop.f32.mrb[55].mxu1  ;;  %v1783_v39 = vsel %vm1463_vm13, %v3114_v29, %v2062_v25  ;;  %v2060_v47 = vadd.f32 -1.0, %v2420_v33  ;;  %v3212_v50 = vadd.f32 %v2173_v30, %v997_v59  ;;  %v1013_v51 = vadd.f32 %v3012_v53, %v1012_v27 }
 0x181   :  { %1847 = vst [vmem:[%s3740_s3 + $0x70] sm:$0xff] %v1783_v39  ;;  %v1621_v11 = vmul.f32 1.442695, %v1535_v10  ;;  %v1533_v49 = vmin.f32 %v3200_v35, 0.0  ;;  %v3214_v23 = vadd.f32 %v1277_v3, %v989_v7  ;;  %v2422_v31 = vpop.eup %2421  ;;  %v1005_v39 = vadd.f32 %v3012_v53, %v3162_v45 }
 0x182   :  { %v1781_v57 = vsel %vm1461_vm14, %v3117_v42, %v2060_v47  ;;  %v2424_v29 = vpop.eup %2423  ;;  %v2063_v63 = vadd.f32 -1.0, %v2422_v31  ;;  %v1536_v42 = vmin.f32 %v3212_v50, 0.0  ;;  %vm1466_vm4 = vcmp.gt.f32.partialorder %v3181_v1, 0.0 }
 0x183   :  { %1845 = vst [vmem:[%s3740_s3 + $0x60] sm:$0xff] %v1781_v57  ;;  %2433 = vpow2.f32 %v1621_v11  ;;  %v1617_v2 = vmul.f32 1.442695, %v1533_v49  ;;  %v2061_v55 = vadd.f32 -1.0, %v2424_v29  ;;  %v1534_v41 = vmin.f32 %v3214_v23, 0.0 }
 0x184   :  { %v1017_v9 = vpop.f32.mrb[56].mxu0  ;;  %v2176_v19 = vpop.f32.mrb[56].mxu1  ;;  %v1784_v14 = vsel %vm1464_vm15, %v3135_v6, %v2063_v63  ;;  %v1623_v18 = vmul.f32 1.442695, %v1536_v42  ;;  %vm1471_vm5 = vcmp.gt.f32.partialorder %v3193_v22, 0.0  ;;  %vm1469_vm6 = vcmp.gt.f32.partialorder %v3200_v35, 0.0 }
 0x185   :  { %v2426_v46 = vpop.eup %2425  ;;  %2435 = vpow2.f32 %v1617_v2  ;;  %v3229_v17 = vadd.f32 %v2176_v19, %v1010_v15  ;;  %v1019_v54 = vpop.f32.mrb[57].mxu0  ;;  %1848 = vst [vmem:[%s3740_s3 + $0x78] sm:$0xff] %v1784_v14  ;;  %v1782_v34 = vsel %vm1462_vm0, %v3137_v13, %v2061_v55  ;;  %v1619_v7 = vmul.f32 1.442695, %v1534_v41 }
 0x186   :  { %v1290_v21 = vpop.f32.mrb[57].mxu1  ;;  %v2066_v62 = vadd.f32 -1.0, %v2426_v46  ;;  %v1020_v6 = vpop.f32.mrb[58].mxu0  ;;  %1846 = vst [vmem:[%s3740_s3 + $0x68] sm:$0xff] %v1782_v34  ;;  %2437 = vpow2.f32 %v1623_v18  ;;  %v1018_v29 = vadd.f32 %v3012_v53, %v1017_v9  ;;  %vm1472_vm7 = vcmp.gt.f32.partialorder %v3212_v50, 0.0 }
 0x187   :  { %v2428_v43 = vpop.eup %2427  ;;  %v1539_v26 = vmin.f32 %v3229_v17, 0.0  ;;  %v3242_v27 = vadd.f32 %v1290_v21, %v1002_v5  ;;  %v2177_v30 = vpop.f32.mrb[58].mxu1  ;;  %2439 = vpow2.f32 %v1619_v7  ;;  %vm1470_vm8 = vcmp.gt.f32.partialorder %v3214_v23, 0.0 }
 0x188   :  { %v2064_v25 = vadd.f32 -1.0, %v2428_v43  ;;  %v1022_v33 = vpop.f32.mrb[59].mxu0  ;;  %v1787_v59 = vsel %vm1467_vm1, %v3158_v58, %v2066_v62  ;;  %v3246_v13 = vadd.f32 %v2177_v30, %v1013_v51  ;;  %v1293_v10 = vpop.f32.mrb[59].mxu1  ;;  %vm1475_vm9 = vcmp.gt.f32.partialorder %v3229_v17, 0.0 }
 0x189   :  { %v2430_v37 = vpop.eup %2429  ;;  %1851 = vst [vmem:[%s3740_s3 + $0x90] sm:$0xff] %v1787_v59  ;;  %v1629_v47 = vmul.f32 1.442695, %v1539_v26  ;;  %v1537_v49 = vmin.f32 %v3242_v27, 0.0  ;;  %v3261_v57 = vadd.f32 %v1293_v10, %v1005_v39  ;;  %v1021_v26 = vadd.f32 %v3012_v53, %v1020_v6 }
 0x18a   :  { %v1785_v3 = vsel %vm1465_vm2, %v3160_v38, %v2064_v25  ;;  %v2432_v11 = vpop.eup %2431  ;;  %v2067_v58 = vadd.f32 -1.0, %v2430_v37  ;;  %v1540_v31 = vmin.f32 %v3246_v13, 0.0  ;;  %vm1473_vm10 = vcmp.gt.f32.partialorder %v3242_v27, 0.0 }
 0x18b   :  { %1849 = vst [vmem:[%s3740_s3 + $0x80] sm:$0xff] %v1785_v3  ;;  %v2065_v38 = vadd.f32 -1.0, %v2432_v11  ;;  %2441 = vpow2.f32 %v1629_v47  ;;  %v1625_v63 = vmul.f32 1.442695, %v1537_v49  ;;  %v1538_v41 = vmin.f32 %v3261_v57, 0.0 }
 0x18c   :  { %v1788_v45 = vsel %vm1468_vm3, %v3175_v61, %v2067_v58  ;;  %v1631_v15 = vmul.f32 1.442695, %v1540_v31  ;;  %v1025_v2 = vpop.f32.mrb[60].mxu0  ;;  %v2180_v55 = vpop.f32.mrb[60].mxu1  ;;  %vm1476_vm11 = vcmp.gt.f32.partialorder %v3246_v13, 0.0  ;;  %vm1474_vm12 = vcmp.gt.f32.partialorder %v3261_v57, 0.0 }
 0x18d   :  { %v2434_v5 = vpop.eup %2433  ;;  %1852 = vst [vmem:[%s3740_s3 + $0x98] sm:$0xff] %v1788_v45  ;;  %v1786_v42 = vsel %vm1466_vm4, %v3181_v1, %v2065_v38  ;;  %v1026_v19 = vadd.f32 %v3012_v53, %v1025_v2  ;;  %v1027_v46 = vpop.f32.mrb[61].mxu0  ;;  %2443 = vpow2.f32 %v1625_v63  ;;  %v1627_v1 = vmul.f32 1.442695, %v1538_v41 }
 0x18e   :  { %v1306_v14 = vpop.f32.mrb[61].mxu1  ;;  %1850 = vst [vmem:[%s3740_s3 + $0x88] sm:$0xff] %v1786_v42  ;;  %v2070_v61 = vadd.f32 -1.0, %v2434_v5  ;;  %v1028_v51 = vpop.f32.mrb[62].mxu0  ;;  %2445 = vpow2.f32 %v1631_v15 }
 0x18f   :  { %v3275_v9 = vadd.f32 %v1306_v14, %v1018_v29  ;;  %v2181_v54 = vpop.f32.mrb[62].mxu1  ;;  %v2436_v21 = vpop.eup %2435  ;;  %v3277_v43 = vadd.f32 %v2180_v55, %v1026_v19  ;;  %v1029_v34 = vadd.f32 %v3012_v53, %v1028_v51  ;;  %2447 = vpow2.f32 %v1627_v1 }
 0x190   :  { %v1030_v62 = vpop.f32.mrb[63].mxu0  ;;  %v1309_v18 = vpop.f32.mrb[63].mxu1  ;;  %v1791_v7 = vsel %vm1471_vm5, %v3193_v22, %v2070_v61  ;;  %v2068_v25 = vadd.f32 -1.0, %v2436_v21 }
 0x191   :  { %v1541_v30 = vmin.f32 %v3275_v9, 0.0  ;;  %1855 = vst [vmem:[%s3740_s3 + $0xb0] sm:$0xff] %v1791_v7  ;;  %v1543_v33 = vmin.f32 %v3277_v43, 0.0  ;;  %v3288_v59 = vadd.f32 %v2181_v54, %v1029_v34  ;;  %v2438_v10 = vpop.eup %2437  ;;  %v3291_v3 = vadd.f32 %v1309_v18, %v1021_v26 }
 0x192   :  { %v1789_v37 = vsel %vm1469_vm6, %v3200_v35, %v2068_v25  ;;  %v2440_v6 = vpop.eup %2439  ;;  %v2071_v39 = vadd.f32 -1.0, %v2438_v10  ;;  %vm1477_vm13 = vcmp.gt.f32.partialorder %v3275_v9, 0.0  ;;  %vm1479_vm14 = vcmp.gt.f32.partialorder %v3277_v43, 0.0 }
 0x193   :  { %v1633_v22 = vmul.f32 1.442695, %v1541_v30  ;;  %1853 = vst [vmem:[%s3740_s3 + $0xa0] sm:$0xff] %v1789_v37  ;;  %v1637_v47 = vmul.f32 1.442695, %v1543_v33  ;;  %v1544_v11 = vmin.f32 %v3288_v59, 0.0 }
 0x194   :  { %v2069_v58 = vadd.f32 -1.0, %v2440_v6  ;;  %v1542_v35 = vmin.f32 %v3291_v3, 0.0  ;;  %v1033_v49 = vpop.f32.mrb[64].mxu0  ;;  %v2184_v31 = vpop.f32.mrb[64].mxu1  ;;  %v1792_v45 = vsel %vm1472_vm7, %v3212_v50, %v2071_v39  ;;  %vm1480_vm15 = vcmp.gt.f32.partialorder %v3288_v59, 0.0 }
 0x195   :  { %2449 = vpow2.f32 %v1633_v22  ;;  %v2442_v38 = vpop.eup %2441  ;;  %v1639_v29 = vmul.f32 1.442695, %v1544_v11  ;;  %v1034_v63 = vadd.f32 %v3012_v53, %v1033_v49  ;;  %v1035_v15 = vpop.f32.mrb[65].mxu0  ;;  %1856 = vst [vmem:[%s3740_s3 + $0xb8] sm:$0xff] %v1792_v45  ;;  %vm1478_vm0 = vcmp.gt.f32.partialorder %v3291_v3, 0.0 }
 0x196   :  { %2451 = vpow2.f32 %v1637_v47  ;;  %v1322_v2 = vpop.f32.mrb[65].mxu1  ;;  %v1790_v55 = vsel %vm1470_vm8, %v3214_v23, %v2069_v58  ;;  %v2074_v5 = vadd.f32 -1.0, %v2442_v38  ;;  %v1635_v42 = vmul.f32 1.442695, %v1542_v35  ;;  %v1036_v41 = vpop.f32.mrb[66].mxu0 }
 0x197   :  { %v2185_v19 = vpop.f32.mrb[66].mxu1  ;;  %1854 = vst [vmem:[%s3740_s3 + $0xa8] sm:$0xff] %v1790_v55  ;;  %2453 = vpow2.f32 %v1639_v29  ;;  %v3310_v50 = vadd.f32 %v1322_v2, %v1034_v63  ;;  %v1037_v46 = vadd.f32 %v3012_v53, %v1036_v41  ;;  %v1038_v14 = vpop.f32.mrb[67].mxu0 }
 0x198   :  { %v1325_v61 = vpop.f32.mrb[67].mxu1  ;;  %v2444_v51 = vpop.eup %2443  ;;  %v1795_v23 = vsel %vm1475_vm9, %v3229_v17, %v2074_v5  ;;  %2455 = vpow2.f32 %v1635_v42 }
 0x199   :  { %v2446_v54 = vpop.eup %2445  ;;  %1859 = vst [vmem:[%s3740_s3 + $0xd0] sm:$0xff] %v1795_v23  ;;  %v2072_v21 = vadd.f32 -1.0, %v2444_v51  ;;  %v1545_v1 = vmin.f32 %v3310_v50, 0.0  ;;  %v3318_v34 = vadd.f32 %v1325_v61, %v1037_v46  ;;  %vm1481_vm1 = vcmp.gt.f32.partialorder %v3310_v50, 0.0 }
 0x19a   :  { %v2075_v62 = vadd.f32 -1.0, %v2446_v54  ;;  %v2448_v18 = vpop.eup %2447 }
 0x19b   :  { %v1793_v7 = vsel %vm1473_vm10, %v3242_v27, %v2072_v21  ;;  %v1641_v17 = vmul.f32 1.442695, %v1545_v1  ;;  %v1546_v25 = vmin.f32 %v3318_v34, 0.0  ;;  %v2073_v30 = vadd.f32 -1.0, %v2448_v18 }
 0x19c   :  { %1857 = vst [vmem:[%s3740_s3 + $0xc0] sm:$0xff] %v1793_v7  ;;  %v1796_v26 = vsel %vm1476_vm11, %v3246_v13, %v2075_v62  ;;  %v1041_v33 = vpop.f32.mrb[68].mxu0  ;;  %v3328_v10 = vpop.f32.mrb[68].mxu1  ;;  %vm1482_vm2 = vcmp.gt.f32.partialorder %v3318_v34, 0.0 }
 0x19d   :  { %1860 = vst [vmem:[%s3740_s3 + $0xd8] sm:$0xff] %v1796_v26  ;;  %2457 = vpow2.f32 %v1641_v17  ;;  %v1643_v27 = vmul.f32 1.442695, %v1546_v25  ;;  %v1042_v37 = vadd.f32 %v3012_v53, %v1041_v33  ;;  %v1043_v22 = vpop.f32.mrb[69].mxu0  ;;  %v1338_v6 = vpop.f32.mrb[69].mxu1  ;;  %v1794_v47 = vsel %vm1474_vm12, %v3261_v57, %v2073_v30 }
 0x19e   :  { %v1044_v13 = vpop.f32.mrb[70].mxu0  ;;  %v3336_v11 = vpop.f32.mrb[70].mxu1  ;;  %1858 = vst [vmem:[%s3740_s3 + $0xc8] sm:$0xff] %v1794_v47 }
 0x19f   :  { %v2450_v39 = vpop.eup %2449  ;;  %2459 = vpow2.f32 %v1643_v27  ;;  %v3341_v49 = vadd.f32 %v2184_v31, %v1042_v37  ;;  %v1045_v38 = vadd.f32 %v3012_v53, %v1044_v13  ;;  %v1046_v45 = vpop.f32.mrb[71].mxu0 }
 0x1a0   :  { %v2452_v58 = vpop.eup %2451  ;;  %v2076_v35 = vadd.f32 -1.0, %v2450_v39  ;;  %v1341_v29 = vpop.f32.mrb[71].mxu1 }
 0x1a1   :  { %v2078_v63 = vadd.f32 -1.0, %v2452_v58  ;;  %v2454_v57 = vpop.eup %2453  ;;  %v1547_v2 = vmin.f32 %v3341_v49, 0.0  ;;  %v3348_v55 = vadd.f32 %v2185_v19, %v1045_v38  ;;  %vm1483_vm3 = vcmp.gt.f32.partialorder %v3341_v49, 0.0 }
 0x1a2   :  { %v1797_v15 = vsel %vm1477_vm13, %v3275_v9, %v2076_v35  ;;  %v2456_v5 = vpop.eup %2455  ;;  %v2079_v42 = vadd.f32 -1.0, %v2454_v57 }
 0x1a3   :  { %v1799_v31 = vsel %vm1479_vm14, %v3277_v43, %v2078_v63  ;;  %1861 = vst [vmem:[%s3740_s3 + $0xe0] sm:$0xff] %v1797_v15  ;;  %v2077_v41 = vadd.f32 -1.0, %v2456_v5  ;;  %v1645_v9 = vmul.f32 1.442695, %v1547_v2  ;;  %v1548_v46 = vmin.f32 %v3348_v55, 0.0 }
 0x1a4   :  { %1863 = vst [vmem:[%s3740_s3 + $0xf0] sm:$0xff] %v1799_v31  ;;  %v1800_v19 = vsel %vm1480_vm15, %v3288_v59, %v2079_v42  ;;  %v1049_v43 = vpop.f32.mrb[72].mxu0  ;;  %v3361_v14 = vpop.f32.mrb[72].mxu1  ;;  %v1098_v5 = vadd.f32 %v3012_v53, %v2951_v52  ;;  %vm1484_vm4 = vcmp.gt.f32.partialorder %v3348_v55, 0.0 }
 0x1a5   :  { %1864 = vst [vmem:[%s3740_s3 + $0xf8] sm:$0xff] %v1800_v19  ;;  %v1798_v61 = vsel %vm1478_vm0, %v3291_v3, %v2077_v41  ;;  %2461 = vpow2.f32 %v1645_v9  ;;  %v1647_v51 = vmul.f32 1.442695, %v1548_v46  ;;  %v1050_v23 = vadd.f32 %v3012_v53, %v1049_v43  ;;  %v1051_v54 = vpop.f32.mrb[73].mxu0  ;;  %v3368_v21 = vpop.f32.mrb[73].mxu1 }
 0x1a6   :  { %1862 = vst [vmem:[%s3740_s3 + $0xe8] sm:$0xff] %v1798_v61  ;;  %v1052_v59 = vpop.f32.mrb[74].mxu0  ;;  %v3373_v1 = vpop.f32.mrb[74].mxu1  ;;  %v3411_v41 = vadd.f32 %v3012_v53, %v2955_v56  ;;  %v1106_v46 = vadd.f32 %v3012_v53, %v2957_v60  ;;  %v1109_v19 = vadd.f32 %v3012_v53, %v2959_v0  ;;  %v3425_v56 = vadd.f32 %v3012_v53, %v2963_v4 }
 0x1a7   :  { %v2458_v62 = vpop.eup %2457  ;;  %2463 = vpow2.f32 %v1647_v51  ;;  %v3375_v18 = vadd.f32 %v1338_v6, %v1050_v23  ;;  %v1053_v3 = vadd.f32 %v3012_v53, %v1052_v59  ;;  %v1054_v7 = vpop.f32.mrb[75].mxu0  ;;  %v3434_v60 = vadd.f32 %v3012_v53, %v2967_v8 }
 0x1a8   :  { %v3378_v17 = vpop.f32.mrb[75].mxu1  ;;  %v2080_v25 = vadd.f32 -1.0, %v2458_v62  ;;  %v1122_v0 = vadd.f32 %v3012_v53, %v2971_v12  ;;  %v3440_v4 = vadd.f32 %v3012_v53, %v2975_v16  ;;  %v3451_v16 = vadd.f32 %v3012_v53, %v2979_v20 }
 0x1a9   :  { %v2460_v26 = vpop.eup %2459  ;;  %v1549_v30 = vmin.f32 %v3375_v18, 0.0  ;;  %v3382_v33 = vadd.f32 %v1341_v29, %v1053_v3  ;;  %v3459_v3 = vadd.f32 %v3012_v53, %v2987_v28  ;;  %v3473_v28 = vadd.f32 %v3012_v53, %v2995_v36 }
 0x1aa   :  { %v1801_v27 = vsel %vm1481_vm1, %v3310_v50, %v2080_v25  ;;  %v2081_v37 = vadd.f32 -1.0, %v2460_v26  ;;  %vm1485_vm5 = vcmp.gt.f32.partialorder %v3375_v18, 0.0 }
 0x1ab   :  { %1865 = vst [vmem:[%s3740_s3 + $0x100] sm:$0xff] %v1801_v27  ;;  %v1649_v22 = vmul.f32 1.442695, %v1549_v30  ;;  %v1550_v6 = vmin.f32 %v3382_v33, 0.0  ;;  %v3465_v27 = vadd.f32 %v3012_v53, %v2991_v32  ;;  %vm1486_vm6 = vcmp.gt.f32.partialorder %v3382_v33, 0.0 }
 0x1ac   :  { %v1802_v39 = vsel %vm1482_vm2, %v3318_v34, %v2081_v37  ;;  %v1057_v47 = vpop.f32.mrb[76].mxu0  ;;  %v3391_v13 = vpop.f32.mrb[76].mxu1 }
 0x1ad   :  { %1866 = vst [vmem:[%s3740_s3 + $0x108] sm:$0xff] %v1802_v39  ;;  %2465 = vpow2.f32 %v1649_v22  ;;  %v1651_v50 = vmul.f32 1.442695, %v1550_v6  ;;  %v1058_v58 = vadd.f32 %v3012_v53, %v1057_v47  ;;  %v1059_v35 = vpop.f32.mrb[77].mxu0  ;;  %v3397_v38 = vpop.f32.mrb[77].mxu1 }
 0x1ae   :  { %v1060_v45 = vpop.f32.mrb[78].mxu0  ;;  %v3399_v29 = vpop.f32.mrb[78].mxu1 }
 0x1af   :  { %v2462_v63 = vpop.eup %2461  ;;  %2467 = vpow2.f32 %v1651_v50  ;;  %v3402_v34 = vadd.f32 %v3328_v10, %v1058_v58  ;;  %v1061_v57 = vadd.f32 %v3012_v53, %v1060_v45  ;;  %v1062_v15 = vpop.f32.mrb[79].mxu0 }
 0x1b0   :  { %v3405_v2 = vpop.f32.mrb[79].mxu1  ;;  %v2082_v31 = vadd.f32 -1.0, %v2462_v63  ;;  %v3493_v15 = vld [vmem:[%s3739_s2] ss:$0 sm:$0xff] }
 0x1b1   :  { %v2464_v42 = vpop.eup %2463  ;;  %v1551_v9 = vmin.f32 %v3402_v34, 0.0  ;;  %v3416_v10 = vadd.f32 %v3336_v11, %v1061_v57  ;;  %vm1487_vm7 = vcmp.gt.f32.partialorder %v3402_v34, 0.0 }
 0x1b2   :  { %v1803_v52 = vsel %vm1483_vm3, %v3341_v49, %v2082_v31  ;;  %v2083_v43 = vadd.f32 -1.0, %v2464_v42 }
 0x1b3   :  { %1867 = vst [vmem:[%s3740_s3 + $0x110] sm:$0xff] %v1803_v52  ;;  %v1653_v11 = vmul.f32 1.442695, %v1551_v9  ;;  %v1552_v61 = vmin.f32 %v3416_v10, 0.0  ;;  %vm1488_vm8 = vcmp.gt.f32.partialorder %v3416_v10, 0.0 }
 0x1b4   :  { %v1804_v49 = vsel %vm1484_vm4, %v3348_v55, %v2083_v43  ;;  %v1065_v51 = vpop.f32.mrb[80].mxu0  ;;  %v2200_v23 = vpop.f32.mrb[80].mxu1  ;;  %v3455_v55 = vadd.f32 %v3012_v53, %v2983_v24 }
 0x1b5   :  { %1868 = vst [vmem:[%s3740_s3 + $0x118] sm:$0xff] %v1804_v49  ;;  %2469 = vpow2.f32 %v1653_v11  ;;  %v1655_v54 = vmul.f32 1.442695, %v1552_v61  ;;  %v1066_v8 = vadd.f32 %v3012_v53, %v1065_v51  ;;  %v3447_v59 = vadd.f32 %v2200_v23, %v1106_v46  ;;  %v1067_v62 = vpop.f32.mrb[81].mxu0  ;;  %v1386_v12 = vpop.f32.mrb[81].mxu1 }
 0x1b6   :  { %v3461_v7 = vadd.f32 %v1386_v12, %v1098_v5  ;;  %v1068_v25 = vpop.f32.mrb[82].mxu0  ;;  %v2201_v26 = vpop.f32.mrb[82].mxu1 }
 0x1b7   :  { %v2466_v30 = vpop.eup %2465  ;;  %2471 = vpow2.f32 %v1655_v54  ;;  %v3468_v20 = vadd.f32 %v3368_v21, %v1066_v8  ;;  %v1563_v24 = vmin.f32 %v3447_v59, 0.0  ;;  %v1070_v37 = vpop.f32.mrb[83].mxu0  ;;  %v1069_v47 = vadd.f32 %v3012_v53, %v1068_v25 }
 0x1b8   :  { %v1389_v22 = vpop.f32.mrb[83].mxu1  ;;  %v2084_v6 = vadd.f32 -1.0, %v2466_v30  ;;  %v1561_v39 = vmin.f32 %v3461_v7, 0.0  ;;  %v3479_v58 = vadd.f32 %v2201_v26, %v1109_v19  ;;  %vm1499_vm9 = vcmp.gt.f32.partialorder %v3447_v59, 0.0 }
 0x1b9   :  { %v2468_v50 = vpop.eup %2467  ;;  %v1553_v32 = vmin.f32 %v3468_v20, 0.0  ;;  %v1677_v21 = vmul.f32 1.442695, %v1563_v24  ;;  %v3483_v36 = vadd.f32 %v3378_v17, %v1069_v47  ;;  %v3505_v46 = vadd.f32 %v1389_v22, %v3411_v41 }
 0x1ba   :  { %v1805_v35 = vsel %vm1485_vm5, %v3375_v18, %v2084_v6  ;;  %v2085_v45 = vadd.f32 -1.0, %v2468_v50  ;;  %v1673_v63 = vmul.f32 1.442695, %v1561_v39  ;;  %v1564_v57 = vmin.f32 %v3479_v58, 0.0 }
 0x1bb   :  { %1869 = vst [vmem:[%s3740_s3 + $0x120] sm:$0xff] %v1805_v35  ;;  %v1657_v53 = vmul.f32 1.442695, %v1553_v32  ;;  %2473 = vpow2.f32 %v1677_v21  ;;  %v3497_v18 = vadd.f32 %v3493_v15, %v2999_v40  ;;  %v1554_v5 = vmin.f32 %v3483_v36, 0.0 }
 0x1bc   :  { %v1806_v17 = vsel %vm1486_vm6, %v3382_v33, %v2085_v45  ;;  %2475 = vpow2.f32 %v1673_v63  ;;  %v1073_v31 = vpop.f32.mrb[84].mxu0  ;;  %v2204_v42 = vpop.f32.mrb[84].mxu1  ;;  %v1679_v9 = vmul.f32 1.442695, %v1564_v57  ;;  %v3510_v33 = vadd.f32 %v3493_v15, %v3003_v44 }
 0x1bd   :  { %1870 = vst [vmem:[%s3740_s3 + $0x128] sm:$0xff] %v1806_v17  ;;  %2477 = vpow2.f32 %v1657_v53  ;;  %v1074_v19 = vadd.f32 %v3493_v15, %v1073_v31  ;;  %v1075_v40 = vpop.f32.mrb[85].mxu0  ;;  %v1402_v52 = vpop.f32.mrb[85].mxu1  ;;  %v1659_v43 = vmul.f32 1.442695, %v1554_v5  ;;  %v3512_v11 = vadd.f32 %v2204_v42, %v1122_v0 }
 0x1be   :  { %v3515_v61 = vadd.f32 %v1402_v52, %v3425_v56  ;;  %v1076_v49 = vpop.f32.mrb[86].mxu0  ;;  %v2205_v51 = vpop.f32.mrb[86].mxu1  ;;  %v3519_v41 = vadd.f32 %v3493_v15, %v3007_v48  ;;  %2479 = vpow2.f32 %v1679_v9  ;;  %v1562_v54 = vmin.f32 %v3505_v46, 0.0 }
 0x1bf   :  { %v2470_v23 = vpop.eup %2469  ;;  %v3523_v8 = vadd.f32 %v3361_v14, %v1074_v19  ;;  %v1078_v44 = vpop.f32.mrb[87].mxu0  ;;  %2481 = vpow2.f32 %v1659_v43  ;;  %v1567_v56 = vmin.f32 %v3512_v11, 0.0  ;;  %v1077_v22 = vadd.f32 %v3493_v15, %v1076_v49 }
 0x1c0   :  { %v1405_v62 = vpop.f32.mrb[87].mxu1  ;;  %v2086_v0 = vadd.f32 -1.0, %v2470_v23  ;;  %v1675_v48 = vmul.f32 1.442695, %v1562_v54  ;;  %v1565_v24 = vmin.f32 %v3515_v61, 0.0  ;;  %v3537_v6 = vadd.f32 %v2205_v51, %v3440_v4 }
 0x1c1   :  { %v2472_v12 = vpop.eup %2471  ;;  %v1555_v25 = vmin.f32 %v3523_v8, 0.0  ;;  %v1685_v30 = vmul.f32 1.442695, %v1567_v56  ;;  %vm1497_vm10 = vcmp.gt.f32.partialorder %v3461_v7, 0.0  ;;  %v3548_v4 = vadd.f32 %v3373_v1, %v1077_v22 }
 0x1c2   :  { %v1807_v26 = vsel %vm1487_vm7, %v3402_v34, %v2086_v0  ;;  %v2087_v14 = vadd.f32 -1.0, %v2472_v12  ;;  %2483 = vpow2.f32 %v1675_v48  ;;  %v1681_v47 = vmul.f32 1.442695, %v1565_v24 }
 0x1c3   :  { %1871 = vst [vmem:[%s3740_s3 + $0x130] sm:$0xff] %v1807_v26  ;;  %v1661_v37 = vmul.f32 1.442695, %v1555_v25  ;;  %2485 = vpow2.f32 %v1685_v30  ;;  %v3541_v34 = vadd.f32 %v1405_v62, %v3434_v60  ;;  %vm1489_vm11 = vcmp.gt.f32.partialorder %v3468_v20, 0.0 }
 0x1c4   :  { %v1808_v39 = vsel %vm1488_vm8, %v3416_v10, %v2087_v14  ;;  %v1081_v50 = vpop.f32.mrb[88].mxu0  ;;  %v2208_v32 = vpop.f32.mrb[88].mxu1  ;;  %v1568_v10 = vmin.f32 %v3537_v6, 0.0  ;;  %vm1500_vm12 = vcmp.gt.f32.partialorder %v3479_v58, 0.0  ;;  %v1556_v1 = vmin.f32 %v3548_v4, 0.0 }
 0x1c5   :  { %v2474_v21 = vpop.eup %2473  ;;  %1872 = vst [vmem:[%s3740_s3 + $0x138] sm:$0xff] %v1808_v39  ;;  %2487 = vpow2.f32 %v1661_v37  ;;  %v1083_v35 = vpop.f32.mrb[89].mxu0  ;;  %v1566_v53 = vmin.f32 %v3541_v34, 0.0  ;;  %v1082_v43 = vadd.f32 %v3493_v15, %v1081_v50  ;;  %v3566_v44 = vadd.f32 %v2208_v32, %v3459_v3 }
 0x1c6   :  { %v1418_v45 = vpop.f32.mrb[89].mxu1  ;;  %v2476_v63 = vpop.eup %2475  ;;  %v2098_v60 = vadd.f32 -1.0, %v2474_v21  ;;  %2489 = vpow2.f32 %v1681_v47  ;;  %v1687_v42 = vmul.f32 1.442695, %v1568_v10  ;;  %v1663_v54 = vmul.f32 1.442695, %v1556_v1 }
 0x1c7   :  { %v1084_v57 = vpop.f32.mrb[90].mxu0  ;;  %v2209_v17 = vpop.f32.mrb[90].mxu1  ;;  %v2096_v31 = vadd.f32 -1.0, %v2476_v63  ;;  %v1683_v52 = vmul.f32 1.442695, %v1566_v53  ;;  %v3575_v56 = vadd.f32 %v3397_v38, %v1082_v43  ;;  %vm1490_vm13 = vcmp.gt.f32.partialorder %v3483_v36, 0.0 }
 0x1c8   :  { %v2478_v5 = vpop.eup %2477  ;;  %v1086_v9 = vpop.f32.mrb[91].mxu0  ;;  %v1819_v40 = vsel %vm1499_vm9, %v3447_v59, %v2098_v60  ;;  %2491 = vpow2.f32 %v1687_v42  ;;  %vm1498_vm14 = vcmp.gt.f32.partialorder %v3505_v46, 0.0  ;;  %v3588_v38 = vadd.f32 %v1418_v45, %v3451_v16 }
 0x1c9   :  { %v2088_v19 = vadd.f32 -1.0, %v2478_v5  ;;  %v1421_v49 = vpop.f32.mrb[91].mxu1  ;;  %v2480_v51 = vpop.eup %2479  ;;  %1883 = vst [vmem:[%s3740_s3 + $0x190] sm:$0xff] %v1819_v40  ;;  %v1817_v23 = vsel %vm1497_vm10, %v3461_v7, %v2096_v31  ;;  %2493 = vpow2.f32 %v1683_v52  ;;  %v1571_v7 = vmin.f32 %v3566_v44, 0.0 }
 0x1ca   :  { %v2482_v62 = vpop.eup %2481  ;;  %1881 = vst [vmem:[%s3740_s3 + $0x180] sm:$0xff] %v1817_v23  ;;  %v2099_v0 = vadd.f32 -1.0, %v2480_v51  ;;  %2495 = vpow2.f32 %v1663_v54  ;;  %v1557_v12 = vmin.f32 %v3575_v56, 0.0  ;;  %v1085_v24 = vadd.f32 %v3493_v15, %v1084_v57 }
 0x1cb   :  { %v1809_v59 = vsel %vm1489_vm11, %v3468_v20, %v2088_v19  ;;  %v2089_v3 = vadd.f32 -1.0, %v2482_v62  ;;  %v1693_v30 = vmul.f32 1.442695, %v1571_v7  ;;  %vm1503_vm15 = vcmp.gt.f32.partialorder %v3512_v11, 0.0 }
 0x1cc   :  { %1873 = vst [vmem:[%s3740_s3 + $0x140] sm:$0xff] %v1809_v59  ;;  %v1820_v20 = vsel %vm1500_vm12, %v3479_v58, %v2099_v0  ;;  %v1089_v48 = vpop.f32.mrb[92].mxu0  ;;  %v2212_v25 = vpop.f32.mrb[92].mxu1  ;;  %v3596_v58 = vadd.f32 %v2209_v17, %v3465_v27  ;;  %v1569_v47 = vmin.f32 %v3588_v38, 0.0  ;;  %vm1491_vm0 = vcmp.gt.f32.partialorder %v3523_v8, 0.0 }
 0x1cd   :  { %v2484_v26 = vpop.eup %2483  ;;  %v1810_v14 = vsel %vm1490_vm13, %v3483_v36, %v2089_v3  ;;  %1884 = vst [vmem:[%s3740_s3 + $0x198] sm:$0xff] %v1820_v20  ;;  %v1091_v37 = vpop.f32.mrb[93].mxu0  ;;  %v1665_v36 = vmul.f32 1.442695, %v1557_v12  ;;  %2497 = vpow2.f32 %v1693_v30  ;;  %v3605_v27 = vadd.f32 %v3405_v2, %v1085_v24 }
 0x1ce   :  { %v1434_v22 = vpop.f32.mrb[93].mxu1  ;;  %v2486_v39 = vpop.eup %2485  ;;  %1874 = vst [vmem:[%s3740_s3 + $0x148] sm:$0xff] %v1810_v14  ;;  %v2097_v16 = vadd.f32 -1.0, %v2484_v26  ;;  %v1689_v53 = vmul.f32 1.442695, %v1569_v47  ;;  %vm1501_vm1 = vcmp.gt.f32.partialorder %v3515_v61, 0.0  ;;  %v3626_v1 = vadd.f32 %v1421_v49, %v3455_v55 }
 0x1cf   :  { %v1092_v50 = vpop.f32.mrb[94].mxu0  ;;  %v2488_v32 = vpop.eup %2487  ;;  %v2102_v21 = vadd.f32 -1.0, %v2486_v39  ;;  %2499 = vpow2.f32 %v1665_v36  ;;  %v1558_v5 = vmin.f32 %v3605_v27, 0.0  ;;  %v1572_v31 = vmin.f32 %v3596_v58, 0.0 }
 0x1d0   :  { %v2213_v10 = vpop.f32.mrb[94].mxu1  ;;  %v1094_v35 = vpop.f32.mrb[95].mxu0  ;;  %v1818_v63 = vsel %vm1498_vm14, %v3505_v46, %v2097_v16  ;;  %v2090_v60 = vadd.f32 -1.0, %v2488_v32  ;;  %2501 = vpow2.f32 %v1689_v53  ;;  %v3634_v19 = vadd.f32 %v2212_v25, %v3510_v33 }
 0x1d1   :  { %v2490_v45 = vpop.eup %2489  ;;  %v1437_v57 = vpop.f32.mrb[95].mxu1  ;;  %1882 = vst [vmem:[%s3740_s3 + $0x188] sm:$0xff] %v1818_v63  ;;  %v1823_v2 = vsel %vm1503_vm15, %v3512_v11, %v2102_v21  ;;  %v1667_v9 = vmul.f32 1.442695, %v1558_v5  ;;  %vm1504_vm2 = vcmp.gt.f32.partialorder %v3537_v6, 0.0  ;;  %v1570_v43 = vmin.f32 %v3626_v1, 0.0 }
 0x1d2   :  { %v2100_v17 = vadd.f32 -1.0, %v2490_v45  ;;  %v1811_v46 = vsel %vm1491_vm0, %v3523_v8, %v2090_v60  ;;  %1887 = vst [vmem:[%s3740_s3 + $0x1b0] sm:$0xff] %v1823_v2  ;;  %v2492_v11 = vpop.eup %2491  ;;  %v1090_v8 = vadd.f32 %v3493_v15, %v1089_v48  ;;  %v1695_v52 = vmul.f32 1.442695, %v1572_v31 }
 0x1d3   :  { %1875 = vst [vmem:[%s3740_s3 + $0x150] sm:$0xff] %v1811_v46  ;;  %v2494_v40 = vpop.eup %2493  ;;  %v2103_v55 = vadd.f32 -1.0, %v2492_v11  ;;  %vm1502_vm3 = vcmp.gt.f32.partialorder %v3541_v34, 0.0  ;;  %2503 = vpow2.f32 %v1667_v9  ;;  %v1691_v54 = vmul.f32 1.442695, %v1570_v43 }
 0x1d4   :  { %v1821_v42 = vsel %vm1501_vm1, %v3515_v61, %v2100_v17  ;;  %v2496_v49 = vpop.eup %2495  ;;  %v2101_v61 = vadd.f32 -1.0, %v2494_v40  ;;  %v3643_v51 = vadd.f32 %v3391_v13, %v1090_v8  ;;  %2505 = vpow2.f32 %v1695_v52 }
 0x1d5   :  { %1885 = vst [vmem:[%s3740_s3 + $0x1a0] sm:$0xff] %v1821_v42  ;;  %v2091_v33 = vadd.f32 -1.0, %v2496_v49  ;;  %v1824_v23 = vsel %vm1504_vm2, %v3537_v6, %v2103_v55  ;;  %vm1492_vm4 = vcmp.gt.f32.partialorder %v3548_v4, 0.0  ;;  %v1575_v0 = vmin.f32 %v3634_v19, 0.0 }
 0x1d6   :  { %1888 = vst [vmem:[%s3740_s3 + $0x1b8] sm:$0xff] %v1824_v23  ;;  %v1822_v62 = vsel %vm1502_vm3, %v3541_v34, %v2101_v61  ;;  %v1559_v59 = vmin.f32 %v3643_v51, 0.0  ;;  %2507 = vpow2.f32 %v1691_v54  ;;  %v3658_v6 = vadd.f32 %v1434_v22, %v3473_v28 }
 0x1d7   :  { %v1812_v13 = vsel %vm1492_vm4, %v3548_v4, %v2091_v33  ;;  %1886 = vst [vmem:[%s3740_s3 + $0x1a8] sm:$0xff] %v1822_v62  ;;  %v1093_v3 = vadd.f32 %v3493_v15, %v1092_v50  ;;  %v2498_v7 = vpop.eup %2497  ;;  %v1701_v20 = vmul.f32 1.442695, %v1575_v0  ;;  %v3665_v12 = vadd.f32 %v2213_v10, %v3519_v41 }
 0x1d8   :  { %1876 = vst [vmem:[%s3740_s3 + $0x158] sm:$0xff] %v1812_v13  ;;  %v1669_v34 = vmul.f32 1.442695, %v1559_v59  ;;  %v3668_v4 = vadd.f32 %v1437_v57, %v3497_v18  ;;  %v2106_v25 = vadd.f32 -1.0, %v2498_v7  ;;  %v1573_v28 = vmin.f32 %v3658_v6, 0.0 }
 0x1d9   :  { %v2500_v48 = vpop.eup %2499  ;;  %v3672_v26 = vadd.f32 %v3399_v29, %v1093_v3  ;;  %vm1507_vm5 = vcmp.gt.f32.partialorder %v3566_v44, 0.0  ;;  %v1576_v14 = vmin.f32 %v3665_v12, 0.0  ;;  %vm1493_vm6 = vcmp.gt.f32.partialorder %v3575_v56, 0.0 }
 0x1da   :  { %v2092_v15 = vadd.f32 -1.0, %v2500_v48  ;;  %2509 = vpow2.f32 %v1669_v34  ;;  %v2502_v30 = vpop.eup %2501  ;;  %v1827_v41 = vsel %vm1507_vm5, %v3566_v44, %v2106_v25  ;;  %v1697_v18 = vmul.f32 1.442695, %v1573_v28 }
 0x1db   :  { %2511 = vpow2.f32 %v1701_v20  ;;  %1891 = vst [vmem:[%s3740_s3 + $0x1d0] sm:$0xff] %v1827_v41  ;;  %v2104_v29 = vadd.f32 -1.0, %v2502_v30  ;;  %v1560_v37 = vmin.f32 %v3672_v26, 0.0  ;;  %v1703_v22 = vmul.f32 1.442695, %v1576_v14 }
 0x1dc   :  { %v1813_v24 = vsel %vm1493_vm6, %v3575_v56, %v2092_v15  ;;  %vm1505_vm7 = vcmp.gt.f32.partialorder %v3588_v38, 0.0  ;;  %2513 = vpow2.f32 %v1697_v18  ;;  %v1574_v44 = vmin.f32 %v3668_v4, 0.0 }
 0x1dd   :  { %1877 = vst [vmem:[%s3740_s3 + $0x160] sm:$0xff] %v1813_v24  ;;  %v2504_v39 = vpop.eup %2503  ;;  %v1825_v56 = vsel %vm1505_vm7, %v3588_v38, %v2104_v29  ;;  %v1671_v16 = vmul.f32 1.442695, %v1560_v37  ;;  %2515 = vpow2.f32 %v1703_v22  ;;  %vm1494_vm8 = vcmp.gt.f32.partialorder %v3605_v27, 0.0 }
 0x1de   :  { %v2506_v36 = vpop.eup %2505  ;;  %1889 = vst [vmem:[%s3740_s3 + $0x1c0] sm:$0xff] %v1825_v56  ;;  %v2093_v47 = vadd.f32 -1.0, %v2504_v39  ;;  %v1699_v50 = vmul.f32 1.442695, %v1574_v44  ;;  %vm1508_vm9 = vcmp.gt.f32.partialorder %v3596_v58, 0.0  ;;  %vm1506_vm10 = vcmp.gt.f32.partialorder %v3626_v1, 0.0 }
 0x1df   :  { %v2107_v32 = vadd.f32 -1.0, %v2506_v36  ;;  %2517 = vpow2.f32 %v1671_v16  ;;  %vm1495_vm11 = vcmp.gt.f32.partialorder %v3643_v51, 0.0  ;;  %vm1511_vm12 = vcmp.gt.f32.partialorder %v3634_v19, 0.0 }
 0x1e0   :  { %v2508_v21 = vpop.eup %2507  ;;  %v1814_v10 = vsel %vm1494_vm8, %v3605_v27, %v2093_v47  ;;  %2519 = vpow2.f32 %v1699_v50  ;;  %vm1509_vm13 = vcmp.gt.f32.partialorder %v3658_v6, 0.0  ;;  %vm1512_vm14 = vcmp.gt.f32.partialorder %v3665_v12, 0.0 }
 0x1e1   :  { %1878 = vst [vmem:[%s3740_s3 + $0x168] sm:$0xff] %v1814_v10  ;;  %v1828_v38 = vsel %vm1508_vm9, %v3596_v58, %v2107_v32  ;;  %v2105_v35 = vadd.f32 -1.0, %v2508_v21  ;;  %vm1496_vm15 = vcmp.gt.f32.partialorder %v3672_v26, 0.0  ;;  %vm1510_vm0 = vcmp.gt.f32.partialorder %v3668_v4, 0.0 }
 0x1e2   :  { %1892 = vst [vmem:[%s3740_s3 + $0x1d8] sm:$0xff] %v1828_v38 }
 0x1e3   :  { %v1826_v63 = vsel %vm1506_vm10, %v3626_v1, %v2105_v35 }
 0x1e4   :  { %v2510_v45 = vpop.eup %2509  ;;  %1890 = vst [vmem:[%s3740_s3 + $0x1c8] sm:$0xff] %v1826_v63 }
 0x1e5   :  { %v2512_v27 = vpop.eup %2511  ;;  %v2094_v60 = vadd.f32 -1.0, %v2510_v45 }
 0x1e6   :  { %v2110_v53 = vadd.f32 -1.0, %v2512_v27  ;;  %v2514_v58 = vpop.eup %2513 }
 0x1e7   :  { %v1815_v57 = vsel %vm1495_vm11, %v3643_v51, %v2094_v60  ;;  %v2516_v2 = vpop.eup %2515  ;;  %v2108_v5 = vadd.f32 -1.0, %v2514_v58 }
 0x1e8   :  { %1879 = vst [vmem:[%s3740_s3 + $0x170] sm:$0xff] %v1815_v57  ;;  %v1831_v17 = vsel %vm1511_vm12, %v3634_v19, %v2110_v53  ;;  %v2111_v46 = vadd.f32 -1.0, %v2516_v2 }
 0x1e9   :  { %1895 = vst [vmem:[%s3740_s3 + $0x1f0] sm:$0xff] %v1831_v17  ;;  %v2518_v31 = vpop.eup %2517  ;;  %v1829_v1 = vsel %vm1509_vm13, %v3658_v6, %v2108_v5 }
 0x1ea   :  { %v2520_v11 = vpop.eup %2519  ;;  %1893 = vst [vmem:[%s3740_s3 + $0x1e0] sm:$0xff] %v1829_v1  ;;  %v2095_v42 = vadd.f32 -1.0, %v2518_v31  ;;  %v1832_v9 = vsel %vm1512_vm14, %v3665_v12, %v2111_v46 }
 0x1eb   :  { %1896 = vst [vmem:[%s3740_s3 + $0x1f8] sm:$0xff] %v1832_v9  ;;  %v2109_v8 = vadd.f32 -1.0, %v2520_v11 }
 0x1ec   :  { %v1816_v19 = vsel %vm1496_vm15, %v3672_v26, %v2095_v42 }
 0x1ed   :  { %1880 = vst [vmem:[%s3740_s3 + $0x178] sm:$0xff] %v1816_v19  ;;  %v1830_v40 = vsel %vm1510_vm0, %v3668_v4, %v2109_v8 }
 0x1ee   :  { %1894 = vst [vmem:[%s3740_s3 + $0x1e8] sm:$0xff] %v1830_v40 }

// kernel: dilation_block_forward.7
= control target key start
LH: loop header
LB: loop body
LE: loop exit
PB: predicated region body
PF: predicated region fallthrough
CT: control target
= control target key end

     0   :  { %vm267_vm0 = vcmask 293888   ;;  %vm364_vm1 = vcmask 1041408   ;;  %s2296_s0 = inlined_call_operand.vmem [shape: bf16[512,36], index: 0, kind: input, shape index: {}]   ;;  %s2297_s1 = inlined_call_operand.vmem [shape: bf16[36,128], index: 1, kind: input, shape index: {}]   ;;  %s2298_s2 = inlined_call_operand.vmem [shape: f32[1,128], index: 2, kind: input, shape index: {}]   ;;  %s2299_s3 = inlined_call_operand.hbm [shape: f32[512,128], index: 3, kind: output, shape index: {}]  }
   0x1   :  { %v1369_v0 = vld [vmem:[%s2297_s1] sm:$0xff]   ;;  %v1370_v1 = vld [vmem:[%s2297_s1 + $0x8] sm:$0xff]   ;;  %v1371_v2 = vld [vmem:[%s2297_s1 + $0x10] ss:$0 sps:$4 sm:$0x33]  }
   0x2   :  { %1288 = vmatprep.subr.bf16.mxu0 %v1369_v0  ;;  %1358 = vmatprep.subr.bf16.mxu1 %v1369_v0  ;;  %v1372_v3 = vld [vmem:[%s2296_s0] sm:$0xff]   ;;  %v366_v5 = vsel %vm364_vm1, %v1371_v2, 0  ;;  %v1374_v6 = vld [vmem:[%s2296_s0 + $0x8] sm:$0xff]   ;;  %v1376_v8 = vld [vmem:[%s2296_s0 + $0x10] sm:$0xff]  }
   0x3   :  { %1289 = vmatpush3.bf16.msra.mxu0 %v1369_v0  ;;  %1361 = vmatpush3.bf16.msra.mxu1 %v1369_v0  ;;  %v1373_v4 = vld [vmem:[%s2296_s0 + $0x80] sm:$0xff]   ;;  %v1375_v7 = vld [vmem:[%s2296_s0 + $0x88] sm:$0xff]   ;;  %v1377_v9 = vld [vmem:[%s2296_s0 + $0x90] sm:$0xff]  }
   0x4   :  { %1290 = vmatprep.subr.bf16.mxu0 %v1370_v1  ;;  %1359 = vmatprep.subr.bf16.mxu1 %v1370_v1  ;;  %v1378_v10 = vld [vmem:[%s2296_s0 + $0x18] sm:$0xff]   ;;  %v1380_v12 = vld [vmem:[%s2296_s0 + $0x20] sm:$0xff]   ;;  %v1382_v14 = vld [vmem:[%s2296_s0 + $0x28] sm:$0xff]  }
   0x5   :  { %1294 = vmatprep.mubr.msk.bf16.mxu0 %vm267_vm0, %v1372_v3  ;;  %1326 = vmatprep.mubr.msk.bf16.mxu1 %vm267_vm0, %v1373_v4  ;;  %v1379_v11 = vld [vmem:[%s2296_s0 + $0x98] sm:$0xff]   ;;  %v1381_v13 = vld [vmem:[%s2296_s0 + $0xa0] sm:$0xff]   ;;  %v1383_v15 = vld [vmem:[%s2296_s0 + $0xa8] sm:$0xff]  }
   0x6   :  { %v1384_v16 = vld [vmem:[%s2296_s0 + $0x30] sm:$0xff]   ;;  %v1386_v18 = vld [vmem:[%s2296_s0 + $0x38] sm:$0xff]  }
   0x7   :  { %1291 = vmatpush3.bf16.msra.mxu0 %v1370_v1  ;;  %1362 = vmatpush3.bf16.msra.mxu1 %v1370_v1  ;;  %v1385_v17 = vld [vmem:[%s2296_s0 + $0xb0] sm:$0xff]   ;;  %v1387_v19 = vld [vmem:[%s2296_s0 + $0xb8] sm:$0xff]  }
   0x8   :  { %1364 = vmatprep.subr.msk.bf16.mxu0 %vm364_vm1, %v1371_v2  ;;  %1365 = vmatprep.subr.msk.bf16.mxu1 %vm364_vm1, %v1371_v2 }
   0xb   :  { %1293 = vmatpush3.bf16.msra.mxu0 %v366_v5  ;;  %1363 = vmatpush3.bf16.msra.mxu1 %v366_v5 }
   0xe   :  { %1295 = vmatmul.mubr.msk.bf16.vlgmr.msra.gmra.mrb[0].mxu0 %vm267_vm0, %v1374_v6  ;;  %1327 = vmatmul.mubr.msk.bf16.vlgmr.msra.gmra.mrb[0].mxu1 %vm267_vm0, %v1375_v7 }
   0xf   :  { %1298 = vmatprep.mubr.msk.bf16.mxu0 %vm267_vm0, %v1376_v8  ;;  %1330 = vmatprep.mubr.msk.bf16.mxu1 %vm267_vm0, %v1377_v9 }
  0x16   :  { %1299 = vmatmul.mubr.msk.bf16.gmra.mrb[4].mxu0 %vm267_vm0, %v1378_v10  ;;  %1331 = vmatmul.mubr.msk.bf16.gmra.mrb[4].mxu1 %vm267_vm0, %v1379_v11 }
  0x17   :  { %1302 = vmatprep.mubr.msk.bf16.mxu0 %vm267_vm0, %v1380_v12  ;;  %1334 = vmatprep.mubr.msk.bf16.mxu1 %vm267_vm0, %v1381_v13 }
  0x1e   :  { %1303 = vmatmul.mubr.msk.bf16.gmra.mrb[8].mxu0 %vm267_vm0, %v1382_v14  ;;  %1335 = vmatmul.mubr.msk.bf16.gmra.mrb[8].mxu1 %vm267_vm0, %v1383_v15 }
  0x1f   :  { %1306 = vmatprep.mubr.msk.bf16.mxu0 %vm267_vm0, %v1384_v16  ;;  %1338 = vmatprep.mubr.msk.bf16.mxu1 %vm267_vm0, %v1385_v17 }
  0x20   :  { %8 = vsyncpa [#allocation3], 0  ;;  %v1388_v20 = vld [vmem:[%s2296_s0 + $0x40] sm:$0xff]   ;;  %v1390_v22 = vld [vmem:[%s2296_s0 + $0x48] sm:$0xff]  }
  0x21   :  { %v1389_v21 = vld [vmem:[%s2296_s0 + $0xc0] sm:$0xff]   ;;  %v1391_v23 = vld [vmem:[%s2296_s0 + $0xc8] sm:$0xff]   ;;  %v1392_v24 = vld [vmem:[%s2296_s0 + $0x50] sm:$0xff]  }
  0x22   :  { %v1393_v25 = vld [vmem:[%s2296_s0 + $0xd0] sm:$0xff]   ;;  %v1394_v26 = vld [vmem:[%s2296_s0 + $0x58] sm:$0xff]   ;;  %v1396_v28 = vld [vmem:[%s2296_s0 + $0x60] sm:$0xff]  }
  0x23   :  { %v1395_v27 = vld [vmem:[%s2296_s0 + $0xd8] sm:$0xff]   ;;  %v1397_v29 = vld [vmem:[%s2296_s0 + $0xe0] sm:$0xff]   ;;  %v1398_v30 = vld [vmem:[%s2296_s0 + $0x68] sm:$0xff]  }
  0x24   :  { %v1399_v31 = vld [vmem:[%s2296_s0 + $0xe8] sm:$0xff]   ;;  %v1400_v32 = vld [vmem:[%s2296_s0 + $0x70] sm:$0xff]   ;;  %v1402_v34 = vld [vmem:[%s2296_s0 + $0x78] sm:$0xff]  }
  0x25   :  { %v1401_v33 = vld [vmem:[%s2296_s0 + $0xf0] sm:$0xff]   ;;  %v1403_v35 = vld [vmem:[%s2296_s0 + $0xf8] sm:$0xff]   ;;  %v1720_v36 = vld [vmem:[%s2298_s2] ss:$0 sm:$0xff] }
  0x26   :  { %1307 = vmatmul.mubr.msk.bf16.gmra.mrb[12].mxu0 %vm267_vm0, %v1386_v18  ;;  %1339 = vmatmul.mubr.msk.bf16.gmra.mrb[12].mxu1 %vm267_vm0, %v1387_v19 }
  0x27   :  { %1310 = vmatprep.mubr.msk.bf16.mxu0 %vm267_vm0, %v1388_v20  ;;  %1342 = vmatprep.mubr.msk.bf16.mxu1 %vm267_vm0, %v1389_v21 }
  0x2e   :  { %1311 = vmatmul.mubr.msk.bf16.gmra.mrb[16].mxu0 %vm267_vm0, %v1390_v22  ;;  %1343 = vmatmul.mubr.msk.bf16.gmra.mrb[16].mxu1 %vm267_vm0, %v1391_v23 }
  0x2f   :  { %1314 = vmatprep.mubr.msk.bf16.mxu0 %vm267_vm0, %v1392_v24  ;;  %1346 = vmatprep.mubr.msk.bf16.mxu1 %vm267_vm0, %v1393_v25 }
  0x36   :  { %1315 = vmatmul.mubr.msk.bf16.gmra.mrb[20].mxu0 %vm267_vm0, %v1394_v26  ;;  %1347 = vmatmul.mubr.msk.bf16.gmra.mrb[20].mxu1 %vm267_vm0, %v1395_v27 }
  0x37   :  { %1318 = vmatprep.mubr.msk.bf16.mxu0 %vm267_vm0, %v1396_v28  ;;  %1350 = vmatprep.mubr.msk.bf16.mxu1 %vm267_vm0, %v1397_v29 }
  0x3e   :  { %1319 = vmatmul.mubr.msk.bf16.gmra.mrb[24].mxu0 %vm267_vm0, %v1398_v30  ;;  %1351 = vmatmul.mubr.msk.bf16.gmra.mrb[24].mxu1 %vm267_vm0, %v1399_v31 }
  0x3f   :  { %1322 = vmatprep.mubr.msk.bf16.mxu0 %vm267_vm0, %v1400_v32  ;;  %1354 = vmatprep.mubr.msk.bf16.mxu1 %vm267_vm0, %v1401_v33 }
  0x46   :  { %1323 = vmatmul.mubr.msk.bf16.gmra.mrb[28].mxu0 %vm267_vm0, %v1402_v34  ;;  %1355 = vmatmul.mubr.msk.bf16.gmra.mrb[28].mxu1 %vm267_vm0, %v1403_v35 }
  0xe1   :  { %v1296_v37 = vpop.f32.mrb[0].mxu0  ;;  %v1328_v38 = vpop.f32.mrb[0].mxu1 }
  0xe2   :  { %v1723_v39 = vadd.f32 %v1296_v37, %v1720_v36  ;;  %v1726_v40 = vadd.f32 %v1328_v38, %v1720_v36  ;;  %v402_v41 = vpop.f32.mrb[1].mxu0  ;;  %v530_v42 = vpop.f32.mrb[1].mxu1 }
  0xe3   :  { %v1729_v43 = vadd.f32 %v1720_v36, %v402_v41  ;;  %v1732_v44 = vadd.f32 %v1720_v36, %v530_v42  ;;  %v1297_v45 = vpop.f32.mrb[2].mxu0  ;;  %v1329_v46 = vpop.f32.mrb[2].mxu1 }
  0xe4   :  { %v723_v47 = vmin.f32 %v1723_v39, 0.0  ;;  %v755_v48 = vmin.f32 %v1726_v40, 0.0  ;;  %v405_v49 = vpop.f32.mrb[3].mxu0  ;;  %v533_v50 = vpop.f32.mrb[3].mxu1  ;;  %v1739_v55 = vadd.f32 %v1297_v45, %v1720_v36  ;;  %v1742_v56 = vadd.f32 %v1329_v46, %v1720_v36 }
  0xe5   :  { %v721_v51 = vmin.f32 %v1729_v43, 0.0  ;;  %v753_v52 = vmin.f32 %v1732_v44, 0.0  ;;  %v1745_v59 = vadd.f32 %v1720_v36, %v405_v49  ;;  %v1748_v60 = vadd.f32 %v1720_v36, %v533_v50 }
  0xe6   :  { %v789_v53 = vmul.f32 1.442695, %v723_v47  ;;  %v853_v54 = vmul.f32 1.442695, %v755_v48  ;;  %v724_v61 = vmin.f32 %v1739_v55, 0.0  ;;  %v756_v62 = vmin.f32 %v1742_v56, 0.0 }
  0xe7   :  { %v785_v57 = vmul.f32 1.442695, %v721_v51  ;;  %v849_v58 = vmul.f32 1.442695, %v753_v52  ;;  %v722_v63 = vmin.f32 %v1745_v59, 0.0  ;;  %v754_v3 = vmin.f32 %v1748_v60, 0.0 }
  0xe8   :  { %1404 = vpow2.f32 %v789_v53  ;;  %v791_v2 = vmul.f32 1.442695, %v724_v61  ;;  %v855_v6 = vmul.f32 1.442695, %v756_v62  ;;  %vm659_vm2 = vcmp.gt.f32.partialorder %v1723_v39, 0.0 }
  0xe9   :  { %1406 = vpow2.f32 %v853_v54  ;;  %v1300_v0 = vpop.f32.mrb[4].mxu0  ;;  %v1332_v1 = vpop.f32.mrb[4].mxu1  ;;  %v787_v7 = vmul.f32 1.442695, %v722_v63  ;;  %v851_v11 = vmul.f32 1.442695, %v754_v3 }
  0xea   :  { %1408 = vpow2.f32 %v785_v57  ;;  %v418_v4 = vpop.f32.mrb[5].mxu0  ;;  %v546_v5 = vpop.f32.mrb[5].mxu1  ;;  %v1755_v8 = vadd.f32 %v1300_v0, %v1720_v36  ;;  %v1758_v12 = vadd.f32 %v1332_v1, %v1720_v36  ;;  %vm691_vm3 = vcmp.gt.f32.partialorder %v1726_v40, 0.0 }
  0xeb   :  { %1410 = vpow2.f32 %v849_v58  ;;  %v1301_v9 = vpop.f32.mrb[6].mxu0  ;;  %v1333_v10 = vpop.f32.mrb[6].mxu1  ;;  %v1761_v13 = vadd.f32 %v1720_v36, %v418_v4  ;;  %v1766_v17 = vadd.f32 %v1720_v36, %v546_v5  ;;  %vm657_vm4 = vcmp.gt.f32.partialorder %v1729_v43, 0.0 }
  0xec   :  { %1412 = vpow2.f32 %v791_v2  ;;  %v421_v14 = vpop.f32.mrb[7].mxu0  ;;  %v549_v15 = vpop.f32.mrb[7].mxu1  ;;  %v727_v16 = vmin.f32 %v1755_v8, 0.0  ;;  %v759_v18 = vmin.f32 %v1758_v12, 0.0  ;;  %vm689_vm5 = vcmp.gt.f32.partialorder %v1732_v44, 0.0 }
  0xed   :  { %1414 = vpow2.f32 %v855_v6  ;;  %v725_v20 = vmin.f32 %v1761_v13, 0.0  ;;  %vm660_vm6 = vcmp.gt.f32.partialorder %v1739_v55, 0.0  ;;  %v757_v22 = vmin.f32 %v1766_v17, 0.0 }
  0xee   :  { %1416 = vpow2.f32 %v787_v7  ;;  %v797_v19 = vmul.f32 1.442695, %v727_v16  ;;  %v861_v21 = vmul.f32 1.442695, %v759_v18  ;;  %v1776_v23 = vadd.f32 %v1301_v9, %v1720_v36 }
  0xef   :  { %1418 = vpow2.f32 %v851_v11  ;;  %v1779_v24 = vadd.f32 %v1333_v10, %v1720_v36  ;;  %vm692_vm7 = vcmp.gt.f32.partialorder %v1742_v56, 0.0  ;;  %v793_v25 = vmul.f32 1.442695, %v725_v20 }
  0xf0   :  { %1420 = vpow2.f32 %v797_v19  ;;  %v1783_v26 = vadd.f32 %v1720_v36, %v421_v14  ;;  %vm658_vm8 = vcmp.gt.f32.partialorder %v1745_v59, 0.0  ;;  %v857_v30 = vmul.f32 1.442695, %v757_v22 }
  0xf1   :  { %v1304_v27 = vpop.f32.mrb[8].mxu0  ;;  %v1336_v28 = vpop.f32.mrb[8].mxu1  ;;  %1422 = vpow2.f32 %v861_v21  ;;  %v728_v31 = vmin.f32 %v1776_v23, 0.0  ;;  %vm690_vm9 = vcmp.gt.f32.partialorder %v1748_v60, 0.0  ;;  %v760_v37 = vmin.f32 %v1779_v24, 0.0 }
  0xf2   :  { %v1405_v29 = vpop.eup %1404  ;;  %v1787_v32 = vpop.f32.mrb[9].mxu0  ;;  %1424 = vpow2.f32 %v793_v25  ;;  %v1798_v47 = vadd.f32 %v1720_v36, %v549_v15  ;;  %v726_v54 = vmin.f32 %v1783_v26, 0.0  ;;  %vm663_vm10 = vcmp.gt.f32.partialorder %v1755_v8, 0.0 }
  0xf3   :  { %v1789_v33 = vpop.f32.mrb[9].mxu1  ;;  %v1407_v34 = vpop.eup %1406  ;;  %v1191_v35 = vadd.f32 -1.0, %v1405_v29  ;;  %1426 = vpow2.f32 %v857_v30  ;;  %v799_v46 = vmul.f32 1.442695, %v728_v31  ;;  %v863_v53 = vmul.f32 1.442695, %v760_v37 }
  0xf4   :  { %v1793_v38 = vpop.f32.mrb[10].mxu0  ;;  %v1795_v41 = vpop.f32.mrb[10].mxu1  ;;  %v1223_v45 = vadd.f32 -1.0, %v1407_v34  ;;  %v795_v0 = vmul.f32 1.442695, %v726_v54  ;;  %v758_v3 = vmin.f32 %v1798_v47, 0.0  ;;  %v1820_v4 = vadd.f32 %v1304_v27, %v1720_v36 }
  0xf5   :  { %v1409_v42 = vpop.eup %1408  ;;  %v1800_v48 = vpop.f32.mrb[11].mxu0  ;;  %v979_v51 = vsel %vm659_vm2, %v1723_v39, %v1191_v35  ;;  %1428 = vpow2.f32 %v799_v46  ;;  %v1826_v7 = vadd.f32 %v1336_v28, %v1720_v36  ;;  %vm695_vm11 = vcmp.gt.f32.partialorder %v1758_v12, 0.0 }
  0xf6   :  { %v1802_v49 = vpop.f32.mrb[11].mxu1  ;;  %v1411_v50 = vpop.eup %1410  ;;  %v1189_v52 = vadd.f32 -1.0, %v1409_v42  ;;  %1043 = vst [vmem:[#allocation2 + $0x10] sm:$0xff] %v979_v51  ;;  %v1011_v58 = vsel %vm691_vm3, %v1726_v40, %v1223_v45  ;;  %1430 = vpow2.f32 %v863_v53  ;;  %v859_v14 = vmul.f32 1.442695, %v758_v3 }
  0xf7   :  { %v1413_v57 = vpop.eup %1412  ;;  %v1221_v61 = vadd.f32 -1.0, %v1411_v50  ;;  %1075 = vst [vmem:[#allocation2 + $0x110] sm:$0xff] %v1011_v58  ;;  %1432 = vpow2.f32 %v795_v0  ;;  %vm661_vm12 = vcmp.gt.f32.partialorder %v1761_v13, 0.0  ;;  %v731_v19 = vmin.f32 %v1820_v4, 0.0 }
  0xf8   :  { %v1415_v62 = vpop.eup %1414  ;;  %v977_v39 = vsel %vm657_vm4, %v1729_v43, %v1189_v52  ;;  %v1192_v63 = vadd.f32 -1.0, %v1413_v57  ;;  %1434 = vpow2.f32 %v859_v14  ;;  %v1863_v37 = vadd.f32 %v1720_v36, %v1789_v33 }
  0xf9   :  { %v1417_v1 = vpop.eup %1416  ;;  %1041 = vst [vmem:[#allocation2] sm:$0xff] %v977_v39  ;;  %v1009_v2 = vsel %vm689_vm5, %v1732_v44, %v1221_v61  ;;  %v1224_v40 = vadd.f32 -1.0, %v1415_v62  ;;  %v1828_v9 = vpop.f32.mrb[12].mxu0  ;;  %v805_v34 = vmul.f32 1.442695, %v731_v19  ;;  %vm693_vm13 = vcmp.gt.f32.partialorder %v1766_v17, 0.0 }
  0xfa   :  { %v1419_v5 = vpop.eup %1418  ;;  %1073 = vst [vmem:[#allocation2 + $0x100] sm:$0xff] %v1009_v2  ;;  %v980_v43 = vsel %vm660_vm6, %v1739_v55, %v1192_v63  ;;  %v1190_v6 = vadd.f32 -1.0, %v1417_v1  ;;  %v1830_v44 = vpop.f32.mrb[12].mxu1  ;;  %vm664_vm14 = vcmp.gt.f32.partialorder %v1776_v23, 0.0  ;;  %v761_v52 = vmin.f32 %v1863_v37, 0.0 }
  0xfb   :  { %1044 = vst [vmem:[#allocation2 + $0x18] sm:$0xff] %v980_v43  ;;  %v1012_v10 = vsel %vm692_vm7, %v1742_v56, %v1224_v40  ;;  %v1222_v11 = vadd.f32 -1.0, %v1419_v5  ;;  %v1836_v15 = vpop.f32.mrb[13].mxu0  ;;  %v1838_v55 = vpop.f32.mrb[13].mxu1  ;;  %v763_v56 = vmin.f32 %v1826_v7, 0.0  ;;  %1436 = vpow2.f32 %v805_v34 }
  0xfc   :  { %v1421_v16 = vpop.eup %1420  ;;  %1076 = vst [vmem:[#allocation2 + $0x118] sm:$0xff] %v1012_v10  ;;  %v978_v18 = vsel %vm658_vm8, %v1745_v59, %v1190_v6  ;;  %v1846_v20 = vpop.f32.mrb[14].mxu0  ;;  %v1855_v59 = vadd.f32 %v1720_v36, %v1787_v32  ;;  %v1885_v58 = vadd.f32 %v1795_v41, %v1720_v36  ;;  %v865_v39 = vmul.f32 1.442695, %v761_v52 }
  0xfd   :  { %v1848_v21 = vpop.f32.mrb[14].mxu1  ;;  %v1423_v22 = vpop.eup %1422  ;;  %1042 = vst [vmem:[#allocation2 + $0x8] sm:$0xff] %v978_v18  ;;  %v1010_v25 = vsel %vm690_vm9, %v1748_v60, %v1222_v11  ;;  %v1195_v27 = vadd.f32 -1.0, %v1421_v16  ;;  %v869_v35 = vmul.f32 1.442695, %v763_v56  ;;  %vm696_vm15 = vcmp.gt.f32.partialorder %v1779_v24, 0.0 }
  0xfe   :  { %v1857_v28 = vpop.f32.mrb[15].mxu0  ;;  %v1859_v29 = vpop.f32.mrb[15].mxu1  ;;  %1074 = vst [vmem:[#allocation2 + $0x108] sm:$0xff] %v1010_v25  ;;  %v1227_v31 = vadd.f32 -1.0, %v1423_v22  ;;  %v729_v45 = vmin.f32 %v1855_v59, 0.0  ;;  %v764_v5 = vmin.f32 %v1885_v58, 0.0  ;;  %v1918_v11 = vadd.f32 %v1720_v36, %v1802_v49 }
  0xff   :  { %v1425_v30 = vpop.eup %1424  ;;  %v983_v42 = vsel %vm663_vm10, %v1755_v8, %v1195_v27  ;;  %1438 = vpow2.f32 %v869_v35  ;;  %vm662_vm0 = vcmp.gt.f32.partialorder %v1783_v26, 0.0  ;;  %v1923_v18 = vadd.f32 %v1828_v9, %v1720_v36 }
 0x100   :  { %v1427_v60 = vpop.eup %1426  ;;  %v1193_v32 = vadd.f32 -1.0, %v1425_v30  ;;  %1047 = vst [vmem:[#allocation2 + $0x30] sm:$0xff] %v983_v42  ;;  %v1015_v46 = vsel %vm695_vm11, %v1758_v12, %v1227_v31  ;;  %v801_v51 = vmul.f32 1.442695, %v729_v45  ;;  %v1881_v12 = vadd.f32 %v1793_v38, %v1720_v36 }
 0x101   :  { %v1225_v50 = vadd.f32 -1.0, %v1427_v60  ;;  %v1429_v33 = vpop.eup %1428  ;;  %1079 = vst [vmem:[#allocation2 + $0x130] sm:$0xff] %v1015_v46  ;;  %v1887_v61 = vpop.f32.mrb[16].mxu0  ;;  %v871_v16 = vmul.f32 1.442695, %v764_v5  ;;  %v1927_v19 = vadd.f32 %v1830_v44, %v1720_v36  ;;  %vm694_vm1 = vcmp.gt.f32.partialorder %v1798_v47, 0.0 }
 0x102   :  { %v981_v8 = vsel %vm661_vm12, %v1761_v13, %v1193_v32  ;;  %v1431_v53 = vpop.eup %1430  ;;  %v1196_v57 = vadd.f32 -1.0, %v1429_v33  ;;  %v1889_v13 = vpop.f32.mrb[16].mxu1  ;;  %1440 = vpow2.f32 %v801_v51  ;;  %v732_v1 = vmin.f32 %v1881_v12, 0.0 }
 0x103   :  { %1045 = vst [vmem:[#allocation2 + $0x20] sm:$0xff] %v981_v8  ;;  %v1013_v54 = vsel %vm693_vm13, %v1766_v17, %v1225_v50  ;;  %v1228_v62 = vadd.f32 -1.0, %v1431_v53  ;;  %v1893_v17 = vadd.f32 %v1720_v36, %v1800_v48  ;;  %v1895_v63 = vpop.f32.mrb[17].mxu0  ;;  %v1897_v38 = vpop.f32.mrb[17].mxu1  ;;  %1442 = vpow2.f32 %v865_v39 }
 0x104   :  { %1077 = vst [vmem:[#allocation2 + $0x120] sm:$0xff] %v1013_v54  ;;  %v1433_v0 = vpop.eup %1432  ;;  %v984_v41 = vsel %vm664_vm14, %v1776_v23, %v1196_v57  ;;  %v1904_v2 = vpop.f32.mrb[18].mxu0  ;;  %v807_v23 = vmul.f32 1.442695, %v732_v1  ;;  %v762_v49 = vmin.f32 %v1918_v11, 0.0  ;;  %vm667_vm2 = vcmp.gt.f32.partialorder %v1820_v4, 0.0 }
 0x105   :  { %v1906_v40 = vpop.f32.mrb[18].mxu1  ;;  %1048 = vst [vmem:[#allocation2 + $0x38] sm:$0xff] %v984_v41  ;;  %v1016_v48 = vsel %vm696_vm15, %v1779_v24, %v1228_v62  ;;  %v1194_v3 = vadd.f32 -1.0, %v1433_v0  ;;  %v1910_v43 = vpop.f32.mrb[19].mxu0  ;;  %v730_v10 = vmin.f32 %v1893_v17, 0.0  ;;  %v767_v9 = vmin.f32 %v1927_v19, 0.0 }
 0x106   :  { %v1912_v6 = vpop.f32.mrb[19].mxu1  ;;  %1080 = vst [vmem:[#allocation2 + $0x138] sm:$0xff] %v1016_v48  ;;  %v1435_v14 = vpop.eup %1434  ;;  %1444 = vpow2.f32 %v807_v23  ;;  %v867_v35 = vmul.f32 1.442695, %v762_v49  ;;  %v1941_v42 = vadd.f32 %v1720_v36, %v1836_v15  ;;  %v1947_v46 = vadd.f32 %v1720_v36, %v1838_v55 }
 0x107   :  { %v982_v24 = vsel %vm662_vm0, %v1783_v26, %v1194_v3  ;;  %v1226_v56 = vadd.f32 -1.0, %v1435_v14  ;;  %v803_v22 = vmul.f32 1.442695, %v730_v10  ;;  %1446 = vpow2.f32 %v871_v16  ;;  %v1437_v25 = vpop.eup %1436 }
 0x108   :  { %1046 = vst [vmem:[#allocation2 + $0x28] sm:$0xff] %v982_v24  ;;  %v735_v26 = vmin.f32 %v1923_v18, 0.0  ;;  %v1199_v34 = vadd.f32 -1.0, %v1437_v25  ;;  %v877_v45 = vmul.f32 1.442695, %v767_v9  ;;  %v1951_v50 = vadd.f32 %v1846_v20, %v1720_v36 }
 0x109   :  { %v1014_v27 = vsel %vm694_vm1, %v1798_v47, %v1226_v56  ;;  %1448 = vpow2.f32 %v803_v22  ;;  %v1935_v44 = vpop.f32.mrb[20].mxu0  ;;  %v1937_v30 = vpop.f32.mrb[20].mxu1  ;;  %vm699_vm3 = vcmp.gt.f32.partialorder %v1826_v7, 0.0  ;;  %v733_v52 = vmin.f32 %v1941_v42, 0.0 }
 0x10a   :  { %v1439_v31 = vpop.eup %1438  ;;  %1078 = vst [vmem:[#allocation2 + $0x128] sm:$0xff] %v1014_v27  ;;  %v813_v60 = vmul.f32 1.442695, %v735_v26  ;;  %v1943_v32 = vpop.f32.mrb[21].mxu0  ;;  %v987_v15 = vsel %vm667_vm2, %v1820_v4, %v1199_v34  ;;  %1450 = vpow2.f32 %v867_v35  ;;  %vm665_vm4 = vcmp.gt.f32.partialorder %v1855_v59, 0.0 }
 0x10b   :  { %v1231_v47 = vadd.f32 -1.0, %v1439_v31  ;;  %v1953_v33 = vpop.f32.mrb[21].mxu1  ;;  %v1955_v8 = vpop.f32.mrb[22].mxu0  ;;  %1051 = vst [vmem:[#allocation2 + $0x50] sm:$0xff] %v987_v15  ;;  %vm697_vm5 = vcmp.gt.f32.partialorder %v1863_v37, 0.0  ;;  %v765_v39 = vmin.f32 %v1947_v46, 0.0  ;;  %v1980_v3 = vadd.f32 %v1720_v36, %v1857_v28 }
 0x10c   :  { %v1441_v51 = vpop.eup %1440  ;;  %v1962_v55 = vpop.f32.mrb[22].mxu1  ;;  %1452 = vpow2.f32 %v813_v60  ;;  %v809_v4 = vmul.f32 1.442695, %v733_v52  ;;  %v736_v1 = vmin.f32 %v1951_v50, 0.0  ;;  %v1984_v5 = vadd.f32 %v1720_v36, %v1859_v29 }
 0x10d   :  { %v1964_v53 = vpop.f32.mrb[23].mxu0  ;;  %v1019_v20 = vsel %vm699_vm3, %v1826_v7, %v1231_v47  ;;  %v1197_v54 = vadd.f32 -1.0, %v1441_v51  ;;  %v1968_v57 = vpop.f32.mrb[23].mxu1  ;;  %1454 = vpow2.f32 %v877_v45  ;;  %v1976_v7 = vadd.f32 %v1848_v21, %v1720_v36 }
 0x10e   :  { %v1443_v62 = vpop.eup %1442  ;;  %1083 = vst [vmem:[#allocation2 + $0x150] sm:$0xff] %v1019_v20  ;;  %1456 = vpow2.f32 %v809_v4  ;;  %v873_v48 = vmul.f32 1.442695, %v765_v39  ;;  %vm668_vm6 = vcmp.gt.f32.partialorder %v1881_v12, 0.0  ;;  %v815_v10 = vmul.f32 1.442695, %v736_v1 }
 0x10f   :  { %v985_v0 = vsel %vm665_vm4, %v1855_v59, %v1197_v54  ;;  %v1229_v41 = vadd.f32 -1.0, %v1443_v62  ;;  %v768_v21 = vmin.f32 %v1976_v7, 0.0  ;;  %vm700_vm7 = vcmp.gt.f32.partialorder %v1885_v58, 0.0 }
 0x110   :  { %1049 = vst [vmem:[#allocation2 + $0x40] sm:$0xff] %v985_v0  ;;  %v1445_v23 = vpop.eup %1444  ;;  %1458 = vpow2.f32 %v873_v48  ;;  %v734_v29 = vmin.f32 %v1980_v3, 0.0  ;;  %vm666_vm8 = vcmp.gt.f32.partialorder %v1893_v17, 0.0  ;;  %v766_v35 = vmin.f32 %v1984_v5, 0.0 }
 0x111   :  { %v1017_v59 = vsel %vm697_vm5, %v1863_v37, %v1229_v41  ;;  %v1989_v14 = vpop.f32.mrb[24].mxu0  ;;  %v1991_v24 = vpop.f32.mrb[24].mxu1  ;;  %v1200_v28 = vadd.f32 -1.0, %v1445_v23  ;;  %1460 = vpow2.f32 %v815_v10  ;;  %v879_v26 = vmul.f32 1.442695, %v768_v21 }
 0x112   :  { %v1447_v16 = vpop.eup %1446  ;;  %1081 = vst [vmem:[#allocation2 + $0x140] sm:$0xff] %v1017_v59  ;;  %v1995_v56 = vpop.f32.mrb[25].mxu0  ;;  %v811_v34 = vmul.f32 1.442695, %v734_v29  ;;  %v2017_v51 = vadd.f32 %v1887_v61, %v1720_v36  ;;  %v875_v20 = vmul.f32 1.442695, %v766_v35  ;;  %v2044_v21 = vadd.f32 %v1720_v36, %v1897_v38 }
 0x113   :  { %v1997_v37 = vpop.f32.mrb[25].mxu1  ;;  %v1449_v22 = vpop.eup %1448  ;;  %v1232_v49 = vadd.f32 -1.0, %v1447_v16  ;;  %v988_v9 = vsel %vm668_vm6, %v1881_v12, %v1200_v28  ;;  %1462 = vpow2.f32 %v879_v26  ;;  %v2021_v12 = vadd.f32 %v1889_v13, %v1720_v36 }
 0x114   :  { %v2000_v25 = vpop.f32.mrb[26].mxu0  ;;  %v2002_v27 = vpop.f32.mrb[26].mxu1  ;;  %v1198_v31 = vadd.f32 -1.0, %v1449_v22  ;;  %1052 = vst [vmem:[#allocation2 + $0x58] sm:$0xff] %v988_v9  ;;  %1464 = vpow2.f32 %v811_v34  ;;  %vm698_vm9 = vcmp.gt.f32.partialorder %v1918_v11, 0.0  ;;  %vm671_vm10 = vcmp.gt.f32.partialorder %v1923_v18, 0.0 }
 0x115   :  { %v2008_v60 = vpop.f32.mrb[27].mxu0  ;;  %v2010_v47 = vpop.f32.mrb[27].mxu1  ;;  %v1020_v45 = vsel %vm700_vm7, %v1885_v58, %v1232_v49  ;;  %v2028_v58 = vadd.f32 %v1720_v36, %v1895_v63  ;;  %v739_v13 = vmin.f32 %v2017_v51, 0.0  ;;  %vm703_vm11 = vcmp.gt.f32.partialorder %v1927_v19, 0.0 }
 0x116   :  { %v1451_v15 = vpop.eup %1450  ;;  %1084 = vst [vmem:[#allocation2 + $0x158] sm:$0xff] %v1020_v45  ;;  %v986_v52 = vsel %vm666_vm8, %v1893_v17, %v1198_v31  ;;  %1466 = vpow2.f32 %v875_v20  ;;  %v771_v17 = vmin.f32 %v2021_v12, 0.0  ;;  %vm669_vm12 = vcmp.gt.f32.partialorder %v1941_v42, 0.0 }
 0x117   :  { %v1453_v54 = vpop.eup %1452  ;;  %1050 = vst [vmem:[#allocation2 + $0x48] sm:$0xff] %v986_v52  ;;  %v1230_v61 = vadd.f32 -1.0, %v1451_v15  ;;  %v821_v0 = vmul.f32 1.442695, %v739_v13  ;;  %v737_v41 = vmin.f32 %v2028_v58, 0.0  ;;  %vm701_vm13 = vcmp.gt.f32.partialorder %v1947_v46, 0.0 }
 0x118   :  { %v1455_v62 = vpop.eup %1454  ;;  %v1203_v4 = vadd.f32 -1.0, %v1453_v54  ;;  %v885_v10 = vmul.f32 1.442695, %v771_v17  ;;  %v2072_v20 = vadd.f32 %v1906_v40, %v1720_v36  ;;  %v2076_v54 = vadd.f32 %v1720_v36, %v1910_v43 }
 0x119   :  { %v1018_v39 = vsel %vm698_vm9, %v1918_v11, %v1230_v61  ;;  %v1235_v63 = vadd.f32 -1.0, %v1455_v62  ;;  %v2037_v1 = vpop.f32.mrb[28].mxu0  ;;  %v2039_v48 = vpop.f32.mrb[28].mxu1  ;;  %v2048_v11 = vadd.f32 %v1904_v2, %v1720_v36  ;;  %1468 = vpow2.f32 %v821_v0 }
 0x11a   :  { %v1457_v23 = vpop.eup %1456  ;;  %1082 = vst [vmem:[#allocation2 + $0x148] sm:$0xff] %v1018_v39  ;;  %v991_v59 = vsel %vm671_vm10, %v1923_v18, %v1203_v4  ;;  %v2050_v16 = vpop.f32.mrb[29].mxu0  ;;  %v817_v18 = vmul.f32 1.442695, %v737_v41  ;;  %1470 = vpow2.f32 %v885_v10  ;;  %v769_v2 = vmin.f32 %v2044_v21, 0.0 }
 0x11b   :  { %v2052_v28 = vpop.f32.mrb[29].mxu1  ;;  %1055 = vst [vmem:[#allocation2 + $0x70] sm:$0xff] %v991_v59  ;;  %v1023_v29 = vsel %vm703_vm11, %v1927_v19, %v1235_v63  ;;  %v1201_v22 = vadd.f32 -1.0, %v1457_v23  ;;  %v2057_v49 = vpop.f32.mrb[30].mxu0  ;;  %v740_v45 = vmin.f32 %v2048_v11, 0.0  ;;  %vm672_vm14 = vcmp.gt.f32.partialorder %v1951_v50, 0.0 }
 0x11c   :  { %v2059_v38 = vpop.f32.mrb[30].mxu1  ;;  %v1459_v26 = vpop.eup %1458  ;;  %1087 = vst [vmem:[#allocation2 + $0x170] sm:$0xff] %v1023_v29  ;;  %1472 = vpow2.f32 %v817_v18  ;;  %v881_v52 = vmul.f32 1.442695, %v769_v2  ;;  %v2084_v62 = vadd.f32 %v1720_v36, %v1912_v6  ;;  %v2089_v43 = vadd.f32 %v1935_v44, %v1720_v36 }
 0x11d   :  { %v2064_v9 = vpop.f32.mrb[31].mxu0  ;;  %v2066_v31 = vpop.f32.mrb[31].mxu1  ;;  %v989_v34 = vsel %vm669_vm12, %v1941_v42, %v1201_v22  ;;  %v1233_v35 = vadd.f32 -1.0, %v1459_v26  ;;  %v823_v13 = vmul.f32 1.442695, %v740_v45  ;;  %vm704_vm15 = vcmp.gt.f32.partialorder %v1976_v7, 0.0 }
 0x11e   :  { %v1461_v19 = vpop.eup %1460  ;;  %1053 = vst [vmem:[#allocation2 + $0x60] sm:$0xff] %v989_v34  ;;  %1474 = vpow2.f32 %v881_v52  ;;  %v772_v39 = vmin.f32 %v2072_v20, 0.0  ;;  %vm670_vm0 = vcmp.gt.f32.partialorder %v1980_v3, 0.0  ;;  %v770_v0 = vmin.f32 %v2084_v62, 0.0 }
 0x11f   :  { %v1204_v15 = vadd.f32 -1.0, %v1461_v19  ;;  %v1463_v61 = vpop.eup %1462  ;;  %v1021_v42 = vsel %vm701_vm13, %v1947_v46, %v1233_v35  ;;  %1476 = vpow2.f32 %v823_v13  ;;  %vm702_vm1 = vcmp.gt.f32.partialorder %v1984_v5, 0.0 }
 0x120   :  { %v1465_v4 = vpop.eup %1464  ;;  %1085 = vst [vmem:[#allocation2 + $0x160] sm:$0xff] %v1021_v42  ;;  %v1236_v17 = vadd.f32 -1.0, %v1463_v61  ;;  %v887_v23 = vmul.f32 1.442695, %v772_v39  ;;  %v883_v10 = vmul.f32 1.442695, %v770_v0  ;;  %v2111_v26 = vadd.f32 %v1720_v36, %v1953_v33 }
 0x121   :  { %v992_v40 = vsel %vm672_vm14, %v1951_v50, %v1204_v15  ;;  %v1202_v46 = vadd.f32 -1.0, %v1465_v4  ;;  %v1467_v63 = vpop.eup %1466  ;;  %v738_v50 = vmin.f32 %v2076_v54, 0.0  ;;  %v743_v29 = vmin.f32 %v2089_v43, 0.0 }
 0x122   :  { %1056 = vst [vmem:[#allocation2 + $0x78] sm:$0xff] %v992_v40  ;;  %v1024_v6 = vsel %vm704_vm15, %v1976_v7, %v1236_v17  ;;  %v1234_v41 = vadd.f32 -1.0, %v1467_v63  ;;  %v2102_v7 = vadd.f32 %v1937_v30, %v1720_v36  ;;  %1478 = vpow2.f32 %v887_v23 }
 0x123   :  { %1088 = vst [vmem:[#allocation2 + $0x178] sm:$0xff] %v1024_v6  ;;  %v990_v44 = vsel %vm670_vm0, %v1980_v3, %v1202_v46  ;;  %v819_v59 = vmul.f32 1.442695, %v738_v50  ;;  %v1469_v22 = vpop.eup %1468  ;;  %v2107_v3 = vadd.f32 %v1720_v36, %v1943_v32  ;;  %vm675_vm2 = vcmp.gt.f32.partialorder %v2017_v51, 0.0 }
 0x124   :  { %1054 = vst [vmem:[#allocation2 + $0x68] sm:$0xff] %v990_v44  ;;  %v1022_v18 = vsel %vm702_vm1, %v1984_v5, %v1234_v41  ;;  %v1471_v2 = vpop.eup %1470  ;;  %v1207_v19 = vadd.f32 -1.0, %v1469_v22  ;;  %v829_v30 = vmul.f32 1.442695, %v743_v29  ;;  %vm707_vm3 = vcmp.gt.f32.partialorder %v2021_v12, 0.0 }
 0x125   :  { %1086 = vst [vmem:[#allocation2 + $0x168] sm:$0xff] %v1022_v18  ;;  %1480 = vpow2.f32 %v819_v59  ;;  %v1239_v5 = vadd.f32 -1.0, %v1471_v2  ;;  %v775_v35 = vmin.f32 %v2102_v7, 0.0  ;;  %v741_v33 = vmin.f32 %v2107_v3, 0.0 }
 0x126   :  { %v1473_v34 = vpop.eup %1472  ;;  %1482 = vpow2.f32 %v883_v10  ;;  %v995_v32 = vsel %vm675_vm2, %v2017_v51, %v1207_v19  ;;  %vm673_vm4 = vcmp.gt.f32.partialorder %v2028_v58, 0.0  ;;  %v773_v61 = vmin.f32 %v2111_v26, 0.0 }
 0x127   :  { %v1205_v45 = vadd.f32 -1.0, %v1473_v34  ;;  %1484 = vpow2.f32 %v829_v30  ;;  %1059 = vst [vmem:[#allocation2 + $0x90] sm:$0xff] %v995_v32  ;;  %v1027_v15 = vsel %vm707_vm3, %v2021_v12, %v1239_v5  ;;  %v893_v52 = vmul.f32 1.442695, %v775_v35 }
 0x128   :  { %v1475_v42 = vpop.eup %1474  ;;  %1091 = vst [vmem:[#allocation2 + $0x190] sm:$0xff] %v1027_v15  ;;  %v825_v4 = vmul.f32 1.442695, %v741_v33  ;;  %v2124_v51 = vadd.f32 %v1955_v8, %v1720_v36  ;;  %v2128_v40 = vadd.f32 %v1962_v55, %v1720_v36  ;;  %v889_v46 = vmul.f32 1.442695, %v773_v61 }
 0x129   :  { %v993_v13 = vsel %vm673_vm4, %v2028_v58, %v1205_v45  ;;  %v1477_v17 = vpop.eup %1476  ;;  %v1237_v12 = vadd.f32 -1.0, %v1475_v42  ;;  %1486 = vpow2.f32 %v893_v52  ;;  %v2132_v39 = vadd.f32 %v1720_v36, %v1964_v53 }
 0x12a   :  { %1057 = vst [vmem:[#allocation2 + $0x80] sm:$0xff] %v993_v13  ;;  %vm705_vm5 = vcmp.gt.f32.partialorder %v2044_v21, 0.0  ;;  %v1208_v58 = vadd.f32 -1.0, %v1477_v17  ;;  %1488 = vpow2.f32 %v825_v4  ;;  %v744_v8 = vmin.f32 %v2124_v51, 0.0 }
 0x12b   :  { %v1025_v63 = vsel %vm705_vm5, %v2044_v21, %v1237_v12  ;;  %vm676_vm6 = vcmp.gt.f32.partialorder %v2048_v11, 0.0  ;;  %1490 = vpow2.f32 %v889_v46  ;;  %v776_v55 = vmin.f32 %v2128_v40, 0.0 }
 0x12c   :  { %1089 = vst [vmem:[#allocation2 + $0x180] sm:$0xff] %v1025_v63  ;;  %v996_v6 = vsel %vm676_vm6, %v2048_v11, %v1208_v58  ;;  %vm708_vm7 = vcmp.gt.f32.partialorder %v2072_v20, 0.0  ;;  %v831_v53 = vmul.f32 1.442695, %v744_v8  ;;  %v742_v50 = vmin.f32 %v2132_v39, 0.0  ;;  %v1479_v0 = vpop.eup %1478 }
 0x12d   :  { %1060 = vst [vmem:[#allocation2 + $0x98] sm:$0xff] %v996_v6  ;;  %vm674_vm8 = vcmp.gt.f32.partialorder %v2076_v54, 0.0  ;;  %v895_v44 = vmul.f32 1.442695, %v776_v55  ;;  %v2145_v21 = vadd.f32 %v1720_v36, %v1968_v57  ;;  %v2149_v41 = vadd.f32 %v1989_v14, %v1720_v36 }
 0x12e   :  { %v1240_v11 = vadd.f32 -1.0, %v1479_v0  ;;  %1492 = vpow2.f32 %v831_v53  ;;  %v827_v59 = vmul.f32 1.442695, %v742_v50  ;;  %v2153_v10 = vadd.f32 %v1991_v24, %v1720_v36 }
 0x12f   :  { %v1481_v23 = vpop.eup %1480  ;;  %1494 = vpow2.f32 %v895_v44  ;;  %v774_v18 = vmin.f32 %v2145_v21, 0.0  ;;  %v2158_v57 = vadd.f32 %v1720_v36, %v1995_v56  ;;  %vm706_vm9 = vcmp.gt.f32.partialorder %v2084_v62, 0.0 }
 0x130   :  { %v1483_v29 = vpop.eup %1482  ;;  %v1206_v22 = vadd.f32 -1.0, %v1481_v23  ;;  %v1028_v14 = vsel %vm708_vm7, %v2072_v20, %v1240_v11  ;;  %1496 = vpow2.f32 %v827_v59  ;;  %v747_v5 = vmin.f32 %v2149_v41, 0.0 }
 0x131   :  { %v1485_v2 = vpop.eup %1484  ;;  %v1238_v19 = vadd.f32 -1.0, %v1483_v29  ;;  %1092 = vst [vmem:[#allocation2 + $0x198] sm:$0xff] %v1028_v14  ;;  %v891_v34 = vmul.f32 1.442695, %v774_v18  ;;  %vm679_vm10 = vcmp.gt.f32.partialorder %v2089_v43, 0.0  ;;  %vm711_vm11 = vcmp.gt.f32.partialorder %v2102_v7, 0.0 }
 0x132   :  { %v994_v24 = vsel %vm674_vm8, %v2076_v54, %v1206_v22  ;;  %v1211_v30 = vadd.f32 -1.0, %v1485_v2  ;;  %v779_v20 = vmin.f32 %v2153_v10, 0.0  ;;  %v837_v45 = vmul.f32 1.442695, %v747_v5 }
 0x133   :  { %1058 = vst [vmem:[#allocation2 + $0x88] sm:$0xff] %v994_v24  ;;  %v1026_v56 = vsel %vm706_vm9, %v2084_v62, %v1238_v19  ;;  %v1487_v35 = vpop.eup %1486  ;;  %1498 = vpow2.f32 %v891_v34  ;;  %v745_v54 = vmin.f32 %v2158_v57, 0.0  ;;  %v2176_v62 = vadd.f32 %v1720_v36, %v1997_v37 }
 0x134   :  { %1090 = vst [vmem:[#allocation2 + $0x188] sm:$0xff] %v1026_v56  ;;  %v999_v32 = vsel %vm679_vm10, %v2089_v43, %v1211_v30  ;;  %v1489_v33 = vpop.eup %1488  ;;  %v1243_v15 = vadd.f32 -1.0, %v1487_v35  ;;  %v901_v52 = vmul.f32 1.442695, %v779_v20  ;;  %v2180_v61 = vadd.f32 %v2000_v25, %v1720_v36 }
 0x135   :  { %1063 = vst [vmem:[#allocation2 + $0xb0] sm:$0xff] %v999_v32  ;;  %v1491_v42 = vpop.eup %1490  ;;  %v1209_v13 = vadd.f32 -1.0, %v1489_v33  ;;  %1500 = vpow2.f32 %v837_v45  ;;  %v833_v43 = vmul.f32 1.442695, %v745_v54  ;;  %v2184_v4 = vadd.f32 %v2002_v27, %v1720_v36 }
 0x136   :  { %v1031_v17 = vsel %vm711_vm11, %v2102_v7, %v1243_v15  ;;  %vm677_vm12 = vcmp.gt.f32.partialorder %v2107_v3, 0.0  ;;  %v1241_v37 = vadd.f32 -1.0, %v1491_v42  ;;  %1502 = vpow2.f32 %v901_v52 }
 0x137   :  { %1095 = vst [vmem:[#allocation2 + $0x1b0] sm:$0xff] %v1031_v17  ;;  %v997_v25 = vsel %vm677_vm12, %v2107_v3, %v1209_v13  ;;  %vm709_vm13 = vcmp.gt.f32.partialorder %v2111_v26, 0.0  ;;  %1504 = vpow2.f32 %v833_v43  ;;  %v777_v12 = vmin.f32 %v2176_v62, 0.0 }
 0x138   :  { %v1493_v46 = vpop.eup %1492  ;;  %1061 = vst [vmem:[#allocation2 + $0xa0] sm:$0xff] %v997_v25  ;;  %v1029_v27 = vsel %vm709_vm13, %v2111_v26, %v1241_v37  ;;  %vm680_vm14 = vcmp.gt.f32.partialorder %v2124_v51, 0.0  ;;  %v748_v7 = vmin.f32 %v2180_v61, 0.0  ;;  %v780_v58 = vmin.f32 %v2184_v4, 0.0 }
 0x139   :  { %v1495_v8 = vpop.eup %1494  ;;  %1093 = vst [vmem:[#allocation2 + $0x1a0] sm:$0xff] %v1029_v27  ;;  %v1212_v63 = vadd.f32 -1.0, %v1493_v46  ;;  %v897_v55 = vmul.f32 1.442695, %v777_v12  ;;  %v2199_v3 = vadd.f32 %v1720_v36, %v2008_v60  ;;  %v2203_v6 = vadd.f32 %v1720_v36, %v2010_v47 }
 0x13a   :  { %v1497_v53 = vpop.eup %1496  ;;  %v1244_v26 = vadd.f32 -1.0, %v1495_v8  ;;  %v839_v50 = vmul.f32 1.442695, %v748_v7  ;;  %v903_v0 = vmul.f32 1.442695, %v780_v58  ;;  %v2207_v44 = vadd.f32 %v2037_v1, %v1720_v36 }
 0x13b   :  { %v1000_v23 = vsel %vm680_vm14, %v2124_v51, %v1212_v63  ;;  %vm712_vm15 = vcmp.gt.f32.partialorder %v2128_v40, 0.0  ;;  %v1210_v11 = vadd.f32 -1.0, %v1497_v53  ;;  %1506 = vpow2.f32 %v897_v55 }
 0x13c   :  { %1064 = vst [vmem:[#allocation2 + $0xb8] sm:$0xff] %v1000_v23  ;;  %v1032_v60 = vsel %vm712_vm15, %v2128_v40, %v1244_v26  ;;  %vm678_vm0 = vcmp.gt.f32.partialorder %v2132_v39, 0.0  ;;  %1508 = vpow2.f32 %v839_v50  ;;  %v746_v47 = vmin.f32 %v2199_v3, 0.0  ;;  %v1532_v40 = vld [vmem:[%s2298_s2] ss:$0 sm:$0xff]  ;;  %s1557_s2 = smov [#allocation2]  }
 0x13d   :  { %v1499_v59 = vpop.eup %1498  ;;  %1096 = vst [vmem:[#allocation2 + $0x1b8] sm:$0xff] %v1032_v60  ;;  %v998_v29 = vsel %vm678_vm0, %v2132_v39, %v1210_v11  ;;  %vm710_vm1 = vcmp.gt.f32.partialorder %v2145_v21, 0.0  ;;  %1510 = vpow2.f32 %v903_v0  ;;  %v778_v36 = vmin.f32 %v2203_v6, 0.0  ;;  %s1110_s28 = sshll.u32 %s1557_s2, 4  ;;  %s1111_s28 = int_to_ptr.vmem [resolvable:$true] %s1110_s28 }
 0x13e   :  { %1062 = vst [vmem:[#allocation2 + $0xa8] sm:$0xff] %v998_v29  ;;  %v1242_v1 = vadd.f32 -1.0, %v1499_v59  ;;  %v835_v51 = vmul.f32 1.442695, %v746_v47  ;;  %v751_v22 = vmin.f32 %v2207_v44, 0.0  ;;  %v2222_v18 = vadd.f32 %v1532_v40, %v2039_v48  ;;  %s1533_s29 = scalar_lea.vmem %s1111_s28, 8192  ;;  %p1538_p1 = scmp.lt.s32.totalorder %s1111_s28, %s1111_s28 }
 0x13f   :  { %v1501_v2 = vpop.eup %1500  ;;  %v899_v14 = vmul.f32 1.442695, %v778_v36  ;;  %v2225_v39 = vadd.f32 %v1532_v40, %v2050_v16  ;;  %v2228_v19 = vadd.f32 %v1532_v40, %v2052_v28  ;;  %v2231_v24 = vadd.f32 %v1532_v40, %v2057_v49  ;;  %p1534_p0 = scmp.ne.s32.totalorder %s1111_s28, %s1533_s29  ;;  %p1539_p2 = scmp.lt.s32.totalorder %s1533_s29, %s1533_s29 }
 0x140   :  { %v1503_v30 = vpop.eup %1502  ;;  %v1030_v34 = vsel %vm710_vm1, %v2145_v21, %v1242_v1  ;;  %v1215_v5 = vadd.f32 -1.0, %v1501_v2  ;;  %1512 = vpow2.f32 %v835_v51  ;;  %v845_v56 = vmul.f32 1.442695, %v751_v22 }
 0x141   :  { %v1505_v20 = vpop.eup %1504  ;;  %1094 = vst [vmem:[#allocation2 + $0x1a8] sm:$0xff] %v1030_v34  ;;  %vm683_vm2 = vcmp.gt.f32.partialorder %v2149_v41, 0.0  ;;  %v1247_v48 = vadd.f32 -1.0, %v1503_v30  ;;  %1514 = vpow2.f32 %v899_v14  ;;  %v783_v16 = vmin.f32 %v2222_v18, 0.0  ;;  %p1540_p3 = por %p1539_p2, %p1538_p1 }
 0x142   :  { %v1003_v28 = vsel %vm683_vm2, %v2149_v41, %v1215_v5  ;;  %vm715_vm3 = vcmp.gt.f32.partialorder %v2153_v10, 0.0  ;;  %v1213_v49 = vadd.f32 -1.0, %v1505_v20  ;;  %1516 = vpow2.f32 %v845_v56 }
 0x143   :  { %1067 = vst [vmem:[#allocation2 + $0xd0] sm:$0xff] %v1003_v28  ;;  %v1035_v21 = vsel %vm715_vm3, %v2153_v10, %v1247_v48  ;;  %vm681_vm4 = vcmp.gt.f32.partialorder %v2158_v57, 0.0  ;;  %v909_v35 = vmul.f32 1.442695, %v783_v16  ;;  %v749_v32 = vmin.f32 %v2225_v39, 0.0  ;;  %p1541_p4 = pnand %p1540_p3, %p1534_p0 }
 0x144   :  { %1099 = vst [vmem:[#allocation2 + $0x1d0] sm:$0xff] %v1035_v21  ;;  %v1001_v45 = vsel %vm681_vm4, %v2158_v57, %v1213_v49  ;;  %vm713_vm5 = vcmp.gt.f32.partialorder %v2176_v62, 0.0  ;;  %v781_v54 = vmin.f32 %v2228_v19, 0.0  ;;  %v752_v41 = vmin.f32 %v2231_v24, 0.0 }
 0x145   :  { %v1507_v33 = vpop.eup %1506  ;;  %1065 = vst [vmem:[#allocation2 + $0xc0] sm:$0xff] %v1001_v45  ;;  %1518 = vpow2.f32 %v909_v35  ;;  %v841_v15 = vmul.f32 1.442695, %v749_v32  ;;  %v2246_v10 = vadd.f32 %v1532_v40, %v2059_v38  ;;  %v2249_v52 = vadd.f32 %v1532_v40, %v2064_v9 }
 0x146   :  { %v1509_v42 = vpop.eup %1508  ;;  %v1245_v13 = vadd.f32 -1.0, %v1507_v33  ;;  %v905_v43 = vmul.f32 1.442695, %v781_v54  ;;  %v847_v57 = vmul.f32 1.442695, %v752_v41  ;;  %v2252_v17 = vadd.f32 %v1532_v40, %v2066_v31 }
 0x147   :  { %v1511_v37 = vpop.eup %1510  ;;  %vm684_vm6 = vcmp.gt.f32.partialorder %v2180_v61, 0.0  ;;  %v1216_v25 = vadd.f32 -1.0, %v1509_v42  ;;  %1520 = vpow2.f32 %v841_v15  ;;  %v784_v12 = vmin.f32 %v2246_v10, 0.0 }
 0x148   :  { %v1033_v38 = vsel %vm713_vm5, %v2176_v62, %v1245_v13  ;;  %vm716_vm7 = vcmp.gt.f32.partialorder %v2184_v4, 0.0  ;;  %v1248_v9 = vadd.f32 -1.0, %v1511_v37  ;;  %1522 = vpow2.f32 %v905_v43 }
 0x149   :  { %1097 = vst [vmem:[#allocation2 + $0x1c0] sm:$0xff] %v1033_v38  ;;  %v1004_v46 = vsel %vm684_vm6, %v2180_v61, %v1216_v25  ;;  %1524 = vpow2.f32 %v847_v57  ;;  %v911_v31 = vmul.f32 1.442695, %v784_v12  ;;  %v750_v27 = vmin.f32 %v2249_v52, 0.0 }
 0x14a   :  { %v1513_v7 = vpop.eup %1512  ;;  %1068 = vst [vmem:[#allocation2 + $0xd8] sm:$0xff] %v1004_v46  ;;  %v1036_v58 = vsel %vm716_vm7, %v2184_v4, %v1248_v9  ;;  %v782_v8 = vmin.f32 %v2252_v17, 0.0  ;;  %vm682_vm8 = vcmp.gt.f32.partialorder %v2199_v3, 0.0  ;;  %vm714_vm9 = vcmp.gt.f32.partialorder %v2203_v6, 0.0 }
 0x14b   :  { %v1515_v63 = vpop.eup %1514  ;;  %1100 = vst [vmem:[#allocation2 + $0x1d8] sm:$0xff] %v1036_v58  ;;  %v1214_v62 = vadd.f32 -1.0, %v1513_v7  ;;  %1526 = vpow2.f32 %v911_v31  ;;  %v843_v55 = vmul.f32 1.442695, %v750_v27  ;;  %vm687_vm10 = vcmp.gt.f32.partialorder %v2207_v44, 0.0 }
 0x14c   :  { %v1517_v53 = vpop.eup %1516  ;;  %v1246_v26 = vadd.f32 -1.0, %v1515_v63  ;;  %v907_v61 = vmul.f32 1.442695, %v782_v8  ;;  %vm719_vm11 = vcmp.gt.f32.partialorder %v2222_v18, 0.0  ;;  %vm685_vm12 = vcmp.gt.f32.partialorder %v2225_v39, 0.0 }
 0x14d   :  { %v1002_v50 = vsel %vm682_vm8, %v2199_v3, %v1214_v62  ;;  %v1219_v0 = vadd.f32 -1.0, %v1517_v53  ;;  %1528 = vpow2.f32 %v843_v55  ;;  %vm717_vm13 = vcmp.gt.f32.partialorder %v2228_v19, 0.0 }
 0x14e   :  { %1066 = vst [vmem:[#allocation2 + $0xc8] sm:$0xff] %v1002_v50  ;;  %v1034_v4 = vsel %vm714_vm9, %v2203_v6, %v1246_v26  ;;  %1530 = vpow2.f32 %v907_v61  ;;  %vm688_vm14 = vcmp.gt.f32.partialorder %v2231_v24, 0.0  ;;  %vm720_vm15 = vcmp.gt.f32.partialorder %v2246_v10, 0.0 }
 0x14f   :  { %v1519_v23 = vpop.eup %1518  ;;  %1098 = vst [vmem:[#allocation2 + $0x1c8] sm:$0xff] %v1034_v4  ;;  %v1007_v11 = vsel %vm687_vm10, %v2207_v44, %v1219_v0  ;;  %vm686_vm0 = vcmp.gt.f32.partialorder %v2249_v52, 0.0  ;;  %vm718_vm1 = vcmp.gt.f32.partialorder %v2252_v17, 0.0 }
 0x150   :  { %1071 = vst [vmem:[#allocation2 + $0xf0] sm:$0xff] %v1007_v11  ;;  %v1251_v60 = vadd.f32 -1.0, %v1519_v23 }
 0x151   :  { %v1521_v47 = vpop.eup %1520 }
 0x152   :  { %v1523_v3 = vpop.eup %1522  ;;  %v1039_v59 = vsel %vm719_vm11, %v2222_v18, %v1251_v60  ;;  %v1217_v29 = vadd.f32 -1.0, %v1521_v47 }
 0x153   :  { %v1525_v36 = vpop.eup %1524  ;;  %1103 = vst [vmem:[#allocation2 + $0x1f0] sm:$0xff] %v1039_v59  ;;  %v1249_v6 = vadd.f32 -1.0, %v1523_v3 }
 0x154   :  { %v1005_v1 = vsel %vm685_vm12, %v2225_v39, %v1217_v29  ;;  %v1220_v51 = vadd.f32 -1.0, %v1525_v36 }
 0x155   :  { %v1527_v44 = vpop.eup %1526  ;;  %1069 = vst [vmem:[#allocation2 + $0xe0] sm:$0xff] %v1005_v1  ;;  %v1037_v22 = vsel %vm717_vm13, %v2228_v19, %v1249_v6 }
 0x156   :  { %1101 = vst [vmem:[#allocation2 + $0x1e0] sm:$0xff] %v1037_v22  ;;  %v1008_v40 = vsel %vm688_vm14, %v2231_v24, %v1220_v51  ;;  %v1252_v18 = vadd.f32 -1.0, %v1527_v44 }
 0x157   :  { %v1529_v2 = vpop.eup %1528  ;;  %1072 = vst [vmem:[#allocation2 + $0xf8] sm:$0xff] %v1008_v40 }
 0x158   :  { %v1531_v14 = vpop.eup %1530  ;;  %v1040_v39 = vsel %vm720_vm15, %v2246_v10, %v1252_v18  ;;  %v1218_v30 = vadd.f32 -1.0, %v1529_v2 }
 0x159   :  { %1104 = vst [vmem:[#allocation2 + $0x1f8] sm:$0xff] %v1040_v39  ;;  %v1250_v19 = vadd.f32 -1.0, %v1531_v14 }
 0x15a   :  { %v1006_v34 = vsel %vm686_vm0, %v2249_v52, %v1218_v30 }
 0x15b   :  { %1070 = vst [vmem:[#allocation2 + $0xe8] sm:$0xff] %v1006_v34  ;;  %v1038_v24 = vsel %vm718_vm1, %v2252_v17, %v1250_v19 }
 0x15c   :  { %1102 = vst [vmem:[#allocation2 + $0x1e8] sm:$0xff] %v1038_v24 }
 0x15d   :  { %1544 = shalt.err (!%p1541_p4)
}
 0x15e   :  { %s1545_s5 = scalar_lea.hbm %s2299_s3, 8192 }
 0x15f   :  { %p1546_p5 = scmp.ne.s32.totalorder %s2299_s3, %s1545_s5  ;;  %p1549_p6 = scmp.lt.u32.totalorder %s1545_s5, %s2299_s3 }
 0x161   :  { %p1551_p7 = pnand %p1549_p6, %p1546_p5 }
 0x163   :  { %1554 = shalt.err (!%p1551_p7)
}
 0x164   :  { %s1558_s10 = smov 128   ;;  %s1559_s11 = smov 8  }
 0x165   :  { %1116 = dma.vmem_to_hbm [thread:$0]  %s1111_s28, 8192, %s2299_s3, [#allocation3], %s1558_s10, %s1558_s10, %s1559_s11  }
 0x166   :  { %1555 = dma.done.wait [#allocation3], 8192  }
 0x167   :  { %1556 = vsyncadd [#allocation3], 4294959104 }
 0x168   :  { %1120 = vsyncpa [#allocation3], 1 }

</bundles_post_ra>
